<compile_context>
chip_gen: v5e
topology: v5e:2x2
jax: 0.10.0
libtpu: 0.0.40
codegen_flags: <defaults>
</compile_context>

<pallas_src>
import functools

import jax
import jax.numpy as jnp
from jax.experimental import pallas as pl
from jax.experimental.pallas import tpu as pltpu

POOL = 7  # self.pool_size


# ----------------------------------------------------------------------------
# Generic fused matmul Pallas kernel
#   grid = leading "slab" axis G (frames, or the obj/rel FC slab)
#   out[g] = norm?( sum_i (relu?(x_i[g]) * mult_i[g]?) @ w_i[(g)] + b[(g)] )
# ----------------------------------------------------------------------------
def _fused_mm_kernel(*refs, part_cfg, bias_stacked, relu_input, normalize):
    it = iter(refs)
    acc = None
    for has_mult, w_stacked in part_cfg:
        x = next(it)[0]                                    # (R, Ki)
        if relu_input:
            x = jnp.maximum(x, 0.0)
        if has_mult:
            x = x * next(it)[0]                            # (R, 1) broadcast
        w_ref = next(it)
        w = w_ref[0] if w_stacked else w_ref[...]          # (Ki, N)
        p = jnp.dot(x, w, preferred_element_type=jnp.float32)
        acc = p if acc is None else acc + p
    b_ref = next(it)
    b = b_ref[0] if bias_stacked else b_ref[...]           # (1, N)
    o_ref = next(it)
    y = acc + b
    if normalize:
        nrm = jnp.sqrt(jnp.sum(y * y, axis=-1, keepdims=True))
        y = y / (nrm + 1e-7)                               # exact: x/(||x||+eps)
    o_ref[0] = y.astype(o_ref.dtype)


def fused_matmul(parts, bias, *, relu_input=False, normalize=False,
                 out_dtype=jnp.float32):
    """parts: list of (x, w, mult):
         x:    (G, R, Ki) activation slab (channels-last rows)
         w:    (Ki, N) shared weight or (G, Ki, N) per-slab weight
         mult: None or (G, R, 1) broadcast multiplier (applied after ReLU)
       bias: (N,) shared or (G, 1, N) per-slab.
       Returns (G, R, N) float32.  Grid is the G axis (parallel)."""
    G, R, _ = parts[0][0].shape
    N = parts[0][1].shape[-1]

    inputs, in_specs, part_cfg = [], [], []
    for x, w, mult in parts:
        Ki = x.shape[-1]
        inputs.append(x)
        in_specs.append(pl.BlockSpec((1, R, Ki), lambda g: (g, 0, 0)))
        has_mult = mult is not None
        if has_mult:
            inputs.append(mult)
            in_specs.append(pl.BlockSpec((1, R, 1), lambda g: (g, 0, 0)))
        w_stacked = (w.ndim == 3)
        inputs.append(w)
        if w_stacked:
            in_specs.append(pl.BlockSpec((1, Ki, N), lambda g: (g, 0, 0)))
        else:
            in_specs.append(pl.BlockSpec((Ki, N), lambda g: (0, 0)))
        part_cfg.append((has_mult, w_stacked))

    if bias.ndim == 1:
        bias_stacked = False
        inputs.append(bias.reshape(1, N))
        in_specs.append(pl.BlockSpec((1, N), lambda g: (0, 0)))
    else:                                                  # (G, 1, N)
        bias_stacked = True
        inputs.append(bias)
        in_specs.append(pl.BlockSpec((1, 1, N), lambda g: (g, 0, 0)))

    return pl.pallas_call(
        functools.partial(_fused_mm_kernel, part_cfg=tuple(part_cfg),
                          bias_stacked=bias_stacked,
                          relu_input=relu_input, normalize=normalize),
        out_shape=jax.ShapeDtypeStruct((G, R, N), out_dtype),
        grid=(G,),
        in_specs=in_specs,
        out_specs=pl.BlockSpec((1, R, N), lambda g: (g, 0, 0)),
        compiler_params=pltpu.CompilerParams(
            dimension_semantics=("parallel",)),
    )(*inputs)


def l2norm_jnp(x):
    """x / (||x||_2 + 1e-7) along last dim (tiny tail tensors, plain jnp)."""
    return x / (jnp.sqrt(jnp.sum(x * x, axis=-1, keepdims=True)) + 1e-7)


# ----------------------------------------------------------------------------
# Box / ROI glue (plain JAX; interpolation expressed as matmuls -> MXU)
# ----------------------------------------------------------------------------
def generate_union_box(b1, b2):
    return jnp.stack(
        [
            jnp.minimum(b1[:, 0], b2[:, 0]),
            jnp.minimum(b1[:, 1], b2[:, 1]),
            jnp.maximum(b1[:, 2], b2[:, 2]),
            jnp.maximum(b1[:, 3], b2[:, 3]),
        ],
        axis=-1,
    )


def intersection_map(input_box, anchor_box, pool_size):
    """Fraction of each pool_size x pool_size cell of anchor_box covered by
    input_box. Returns channels-last (R, P, P, 1); rows = y, cols = x."""
    eps = 1e-9
    ix1, iy1, ix2, iy2 = (input_box[:, i] for i in range(4))
    ax1, ay1, ax2, ay2 = (anchor_box[:, i] for i in range(4))
    cell_w = (ax2 - ax1) / pool_size
    cell_h = (ay2 - ay1) / pool_size
    g = jnp.arange(pool_size, dtype=jnp.float32)
    cx1 = ax1[:, None] + g[None, :] * cell_w[:, None]
    cx2 = cx1 + cell_w[:, None]
    cy1 = ay1[:, None] + g[None, :] * cell_h[:, None]
    cy2 = cy1 + cell_h[:, None]
    ox = jnp.maximum(jnp.minimum(cx2, ix2[:, None]) - jnp.maximum(cx1, ix1[:, None]), 0.0)
    oy = jnp.maximum(jnp.minimum(cy2, iy2[:, None]) - jnp.maximum(cy1, iy1[:, None]), 0.0)
    frac = (oy / (cell_h[:, None] + eps))[:, :, None] * (ox / (cell_w[:, None] + eps))[:, None, :]
    return frac[:, :, :, None]


def _interp_matrices(boxes_flat, pool_size, scale, H, W):
    """One-bilinear-sample-per-bin interpolation weights.
    Returns Ry: (R, P, H), Cx: (R, W, P) such that pooled = Ry @ feat @ Cx."""
    b = boxes_flat * scale
    x1, y1, x2, y2 = b[:, 0], b[:, 1], b[:, 2], b[:, 3]
    idx = (jnp.arange(pool_size, dtype=jnp.float32) + 0.5) / pool_size
    cx = jnp.clip(x1[:, None] + idx[None, :] * (x2 - x1)[:, None], 0.0, W - 1.0)
    cy = jnp.clip(y1[:, None] + idx[None, :] * (y2 - y1)[:, None], 0.0, H - 1.0)
    x0 = jnp.floor(cx)
    y0 = jnp.floor(cy)
    wx = cx - x0
    wy = cy - y0
    x0i = x0.astype(jnp.int32)
    y0i = y0.astype(jnp.int32)
    x1i = jnp.minimum(x0i + 1, W - 1)
    y1i = jnp.minimum(y0i + 1, H - 1)
    oh = lambda i, n: jax.nn.one_hot(i, n, dtype=jnp.float32)
    Ry = oh(y0i, H) * (1.0 - wy)[..., None] + oh(y1i, H) * wy[..., None]   # (R,P,H)
    Cp = oh(x0i, W) * (1.0 - wx)[..., None] + oh(x1i, W) * wx[..., None]   # (R,P,W)
    return Ry, jnp.swapaxes(Cp, -1, -2)                                    # (R,W,P)


def roi_pool(feat_cl, boxes_tr, pool_size, scale):
    """feat_cl: (T, H, W, C) channels-last; boxes_tr: (T, R, 4) -> (T, R, P, P, C)."""
    T, H, W, C = feat_cl.shape
    R = boxes_tr.shape[1]
    Ry, Cx = _interp_matrices(boxes_tr.reshape(T * R, 4), pool_size, scale, H, W)
    Ry = Ry.reshape(T, R, pool_size, H)
    Cx = Cx.reshape(T, R, W, pool_size)
    t1 = jnp.einsum('trph,thwc->trpwc', Ry, feat_cl)
    return jnp.einsum('trpwc,trwq->trpqc', t1, Cx)


def roi_pool_single_box(feat_cl, box, pool_size, scale):
    """Pool every frame with the same single box -> (T, P, P, C)."""
    Ry, Cx = _interp_matrices(box[None], pool_size, scale,
                              feat_cl.shape[1], feat_cl.shape[2])
    t1 = jnp.einsum('ph,thwc->tpwc', Ry[0], feat_cl)
    return jnp.einsum('tpwc,wq->tpqc', t1, Cx[0])


# ----------------------------------------------------------------------------
# Parameters (deterministic, kaiming-normal-like; biases zero)
# FC weight rows are stored in PyTorch NCHW-flatten order (c, p, q).
# ----------------------------------------------------------------------------
def init_params(key, feature_dim, output_dims):
    d1, d2 = output_dims[1], output_dims[2]
    rel_c = feature_dim // 2 * 3
    rel_fuse_in = rel_c + d1 * 2
    ks = jax.random.split(key, 6)

    def kaiming(k, fan_in, shape):
        return jax.random.normal(k, shape, jnp.float32) * jnp.sqrt(2.0 / fan_in)

    return {
        "ctx_w": kaiming(ks[0], feature_dim, (feature_dim, feature_dim)),
        "ctx_b": jnp.zeros((feature_dim,), jnp.float32),
        "rel_w": kaiming(ks[1], feature_dim, (feature_dim, rel_c)),
        "rel_b": jnp.zeros((rel_c,), jnp.float32),
        "obj_fuse_w": kaiming(ks[2], feature_dim * 2, (feature_dim * 2, d1)),
        "obj_fuse_b": jnp.zeros((d1,), jnp.float32),
        "rel_fuse_w": kaiming(ks[3], rel_fuse_in, (rel_fuse_in, d2)),
        "rel_fuse_b": jnp.zeros((d2,), jnp.float32),
        "obj_fc_w": kaiming(ks[4], d1 * POOL * POOL, (d1 * POOL * POOL, d1)),
        "obj_fc_b": jnp.zeros((d1,), jnp.float32),
        "rel_fc_w": kaiming(ks[5], d2 * POOL * POOL, (d2 * POOL * POOL, d2)),
        "rel_fc_b": jnp.zeros((d2,), jnp.float32),
    }


# ----------------------------------------------------------------------------
# Forward pass (SceneGraphComphy.forward + merge_tube_obj_ftr, mode=0)
# ----------------------------------------------------------------------------
def scene_graph_forward(params, feat, boxes, downsample_rate, output_dims):
    """feat: (T, C, H, W) NCHW; boxes: (T, N, 4) pixel x1,y1,x2,y2."""
    T, C, H, W = feat.shape
    N = boxes.shape[1]
    d1, d2 = output_dims[1], output_dims[2]
    P = POOL
    rel_c = C // 2 * 3
    half_c = C // 2
    rc = rel_c // 3

    # channels-last once; all activations stay (frames, rows, C) slabs.
    feat_cl = jnp.transpose(feat, (0, 2, 3, 1))             # (T, H, W, C)

    # (1) fused context + relation 1x1 convs: one matmul over all pixels,
    #     grid over frames (2 parallel blocks -> both v7x TensorCores).
    w_cat = jnp.concatenate([params["ctx_w"], params["rel_w"]], axis=1)
    b_cat = jnp.concatenate([params["ctx_b"], params["rel_b"]], axis=0)
    ctxrel = fused_matmul([(feat_cl.reshape(T, H * W, C), w_cat, None)], b_cat)
    ctx = ctxrel[..., :C].reshape(T, H, W, C)               # context_features
    rel = ctxrel[..., C:].reshape(T, H, W, rel_c)           # relation_features

    image_h = float(H * downsample_rate)
    image_w = float(W * downsample_rate)
    scale = 1.0 / downsample_rate

    # box bookkeeping, batched over all T frames.
    sub_id = jnp.repeat(jnp.arange(N), N)
    obj_id = jnp.tile(jnp.arange(N), N)
    boxes_flat = boxes.reshape(T * N, 4)
    sub_box = boxes[:, sub_id].reshape(T * N * N, 4)
    obj_box = boxes[:, obj_id].reshape(T * N * N, 4)
    union_box = generate_union_box(sub_box, obj_box)
    image_box = jnp.array([[0.0, 0.0, image_w, image_h]], jnp.float32)

    box_ctx_imap = intersection_map(
        boxes_flat, jnp.tile(image_box, (T * N, 1)), P).reshape(T, N * P * P, 1)
    sub_union_imap = intersection_map(sub_box, union_box, P).reshape(T, N * N * P * P, 1)
    obj_union_imap = intersection_map(obj_box, union_box, P).reshape(T, N * N * P * P, 1)

    # (2) ROI pooling as matmuls (MXU), channels-last.
    ctx_pool1 = roi_pool_single_box(ctx, image_box[0], P, scale)     # (T,P,P,C)
    ctx_pool = jnp.broadcast_to(ctx_pool1[:, None], (T, N, P, P, C))
    obj_pool = roi_pool(feat_cl, boxes, P, scale)                    # (T,N,P,P,C)
    rel_pool = roi_pool(rel, union_box.reshape(T, N * N, 4), P, scale)

    # (3) object feature fuse: concat-free. Channel order of the reference
    #     torch.cat([obj_roi, x, y*imap], dim=1) is reproduced by the weight
    #     row slices; the y*imap product happens inside the kernel.
    w_of = params["obj_fuse_w"]
    this_obj = fused_matmul(
        [(obj_pool.reshape(T, N * P * P, C), w_of[:C], None),
         (ctx_pool[..., :half_c].reshape(T, N * P * P, half_c),
          w_of[C:C + half_c], None),
         (ctx_pool[..., half_c:].reshape(T, N * P * P, half_c),
          w_of[C + half_c:], box_ctx_imap)],
        params["obj_fuse_b"]).reshape(T, N, P, P, d1)

    # (4) relation feature fuse: likewise concat-free over all N^2 pairs.
    w_rf = params["rel_fuse_w"]
    sub_feat = this_obj[:, sub_id].reshape(T, N * N * P * P, d1)
    obj_feat = this_obj[:, obj_id].reshape(T, N * N * P * P, d1)
    x_r = rel_pool[..., :rc].reshape(T, N * N * P * P, rc)
    y_r = rel_pool[..., rc:2 * rc].reshape(T, N * N * P * P, rc)
    z_r = rel_pool[..., 2 * rc:].reshape(T, N * N * P * P, rc)
    this_rel = fused_matmul(
        [(sub_feat, w_rf[:d1], None),
         (obj_feat, w_rf[d1:2 * d1], None),
         (x_r, w_rf[2 * d1:2 * d1 + rc], None),
         (y_r, w_rf[2 * d1 + rc:2 * d1 + 2 * rc], sub_union_imap),
         (z_r, w_rf[2 * d1 + 2 * rc:], obj_union_imap)],
        params["rel_fuse_b"]).reshape(T, N * N, P, P, d2)

    # (5) final FCs: ReLU -> Linear -> L2 norm fused in-kernel.  FC weight
    #     rows are stored in PyTorch (c, p, q) flatten order; permute once to
    #     the channels-last (p, q, c) flatten used here (exact equivalence).
    obj_fc_w = params["obj_fc_w"].reshape(d1, P, P, d1).transpose(
        1, 2, 0, 3).reshape(P * P * d1, d1)
    rel_fc_w = params["rel_fc_w"].reshape(d2, P, P, d2).transpose(
        1, 2, 0, 3).reshape(P * P * d2, d2)
    xo = this_obj.reshape(T * N, P * P * d1)
    xr = this_rel.reshape(T * N * N, P * P * d2)
    if d1 == d2:
        # merged obj-FC + rel-FC: one pallas_call, 2-wide parallel grid over a
        # stacked weight (one slab per TensorCore on v7x).
        K = P * P * d1
        Mo, Mr = T * N, T * N * N
        Rm = max(Mo, Mr)
        x_stack = jnp.zeros((2, Rm, K), jnp.float32)
        x_stack = x_stack.at[0, :Mo].set(xo).at[1, :Mr].set(xr)
        w_stack = jnp.stack([obj_fc_w, rel_fc_w])                    # (2,K,d)
        b_stack = jnp.stack([params["obj_fc_b"], params["rel_fc_b"]]
                            ).reshape(2, 1, d1)
        fc = fused_matmul([(x_stack, w_stack, None)], b_stack,
                          relu_input=True, normalize=True)
        obj_vec = fc[0, :Mo].reshape(T, N, d1)
        rel_vec = fc[1, :Mr].reshape(T, N, N, d2)
    else:
        obj_vec = fused_matmul([(xo.reshape(T, N, P * P * d1), obj_fc_w, None)],
                               params["obj_fc_b"], relu_input=True,
                               normalize=True).reshape(T, N, d1)
        rel_vec = fused_matmul([(xr.reshape(T, N * N, P * P * d2), rel_fc_w, None)],
                               params["rel_fc_b"], relu_input=True,
                               normalize=True).reshape(T, N, N, d2)

    # merge_tube_obj_ftr (mode=0, colli_ftr_type=1, all tubes present per frame)
    obj_ftr_exp = jnp.transpose(obj_vec, (1, 0, 2))         # (N, T, d1)
    obj_ftr = jnp.sum(obj_vec, axis=0)                      # (N, d1)
    rel_ftr_exp = jnp.transpose(rel_vec, (1, 2, 0, 3))      # (N, N, T, d2)

    box_ftr = jnp.zeros((N, 128 * 4), jnp.float32)
    tube_tensor = jnp.transpose(boxes, (1, 0, 2)).reshape(N, -1)  # (N, T*4)
    box_dim = min(128 * 4, tube_tensor.shape[1])
    box_ftr = box_ftr.at[:, :box_dim].set(tube_tensor[:, :box_dim])

    # tail re-normalization (reference re-normalizes even though FC rows are
    # already unit norm): <4 KB total, done in plain jnp, no Pallas launch.
    return (l2norm_jnp(obj_ftr_exp), l2norm_jnp(obj_ftr),
            l2norm_jnp(rel_ftr_exp), box_ftr)


# ----------------------------------------------------------------------------
if __name__ == "__main__":
    key = jax.random.PRNGKey(0)
    feature_dim = 16
    output_dims = [None, 32, 32]
    downsample_rate = 4
    T, H, W = 2, 16, 16   # 2 frames, 16x16 feature map -> 64x64 image
    N = 3                 # objects per frame

    k1, k2, k3 = jax.random.split(key, 3)
    params = init_params(k1, feature_dim, output_dims)
    feat = jax.random.normal(k2, (T, feature_dim, H, W), jnp.float32)
    centers = jax.random.uniform(k3, (T, N, 2), minval=8.0, maxval=56.0)
    half = 6.0
    boxes = jnp.concatenate([centers - half, centers + half], axis=-1)  # (T,N,4)

    fwd = jax.jit(functools.partial(scene_graph_forward,
                                    downsample_rate=downsample_rate,
                                    output_dims=tuple(output_dims)))
    outs = fwd(params, feat, boxes)
    outs = jax.block_until_ready(outs)
    assert outs[0].shape == (N, T, output_dims[1])
    assert outs[1].shape == (N, output_dims[1])
    assert outs[2].shape == (N, N, T, output_dims[2])
    assert outs[3].shape == (N, 128 * 4)
    assert all(bool(jnp.all(jnp.isfinite(o))) for o in outs)
    print("KERNEL_OK")
</pallas_src>

<mosaic_0001>
module attributes {stable_mosaic.version = 11 : i64} {
  func.func @_fused_mm_kernel(%arg0: i32, %arg1: memref<1x256x16xf32, #tpu.memory_space<vmem>>, %arg2: memref<16x40xf32, #tpu.memory_space<vmem>>, %arg3: memref<1x40xf32, #tpu.memory_space<vmem>>, %arg4: memref<1x256x40xf32, #tpu.memory_space<vmem>>) attributes {dimension_semantics = [#tpu.dimension_semantics<parallel>], iteration_bounds = array<i64: 2>, scalar_prefetch = 0 : i64, scratch_operands = 0 : i64, tpu.core_type = #tpu.core_type<tc>, window_params = [{transform_indices = @transform_0, window_bounds = array<i64: 1, 256, 16>}, {pipeline_mode = #tpu.pipeline_mode<synchronous>, transform_indices = @transform_1, window_bounds = array<i64: 16, 40>}, {pipeline_mode = #tpu.pipeline_mode<synchronous>, transform_indices = @transform_2, window_bounds = array<i64: 1, 40>}, {transform_indices = @transform_3, window_bounds = array<i64: 1, 256, 40>}]} {
    %c0 = arith.constant 0 : index
    %c0_0 = arith.constant 0 : index
    %c0_1 = arith.constant 0 : index
    %0 = vector.load %arg1[%c0, %c0_0, %c0_1] : memref<1x256x16xf32, #tpu.memory_space<vmem>>, vector<1x256x16xf32>
    %1 = vector.shape_cast %0 : vector<1x256x16xf32> to vector<256x16xf32>
    %c0_2 = arith.constant 0 : index
    %c0_3 = arith.constant 0 : index
    %2 = vector.load %arg2[%c0_2, %c0_3] : memref<16x40xf32, #tpu.memory_space<vmem>>, vector<16x40xf32>
    %cst = arith.constant dense<0.000000e+00> : vector<256x40xf32>
    %3 = tpu.matmul %1, %2, %cst {dimension_numbers = #tpu.dot_dimension_numbers<[1], [0], [0], [1], [0, 0, 1, 1], [], []>} : vector<256x16xf32>, vector<16x40xf32>, vector<256x40xf32> -> vector<256x40xf32>
    %c0_4 = arith.constant 0 : index
    %c0_5 = arith.constant 0 : index
    %4 = vector.load %arg3[%c0_4, %c0_5] : memref<1x40xf32, #tpu.memory_space<vmem>>, vector<1x40xf32>
    %5 = vector.broadcast %4 : vector<1x40xf32> to vector<256x40xf32>
    %6 = arith.addf %3, %5 : vector<256x40xf32>
    %c0_6 = arith.constant 0 : index
    %c0_7 = arith.constant 0 : index
    %c0_8 = arith.constant 0 : index
    %7 = vector.load %arg4[%c0_6, %c0_7, %c0_8] : memref<1x256x40xf32, #tpu.memory_space<vmem>>, vector<1x256x40xf32>
    %8 = vector.shape_cast %7 : vector<1x256x40xf32> to vector<256x40xf32>
    %9 = vector.shape_cast %6 : vector<256x40xf32> to vector<1x256x40xf32>
    tpu.vector_store %arg4[%c0_6, %c0_7, %c0_8], %9 {strides = array<i32>} : memref<1x256x40xf32, #tpu.memory_space<vmem>>, vector<1x256x40xf32>,
    return
  }
  func.func @transform_0(%arg0: i32) -> (i32, i32, i32) {
    %c0_i32 = arith.constant 0 : i32
    %c0_i32_0 = arith.constant 0 : i32
    %c0_i32_1 = arith.constant 0 : i32
    return %arg0, %c0_i32, %c0_i32_0 : i32, i32, i32
  }
  func.func @transform_1(%arg0: i32) -> (i32, i32) {
    %c0_i32 = arith.constant 0 : i32
    %c0_i32_0 = arith.constant 0 : i32
    %c0_i32_1 = arith.constant 0 : i32
    return %c0_i32, %c0_i32_0 : i32, i32
  }
  func.func @transform_2(%arg0: i32) -> (i32, i32) {
    %c0_i32 = arith.constant 0 : i32
    %c0_i32_0 = arith.constant 0 : i32
    %c0_i32_1 = arith.constant 0 : i32
    return %c0_i32, %c0_i32_0 : i32, i32
  }
  func.func @transform_3(%arg0: i32) -> (i32, i32, i32) {
    %c0_i32 = arith.constant 0 : i32
    %c0_i32_0 = arith.constant 0 : i32
    %c0_i32_1 = arith.constant 0 : i32
    return %arg0, %c0_i32, %c0_i32_0 : i32, i32, i32
  }
}

module attributes {stable_mosaic.version = 11 : i64} {
  func.func @_fused_mm_kernel(%arg0: i32, %arg1: memref<1x147x16xf32, #tpu.memory_space<vmem>>, %arg2: memref<16x32xf32, #tpu.memory_space<vmem>>, %arg3: memref<1x147x8xf32, #tpu.memory_space<vmem>>, %arg4: memref<8x32xf32, #tpu.memory_space<vmem>>, %arg5: memref<1x147x8xf32, #tpu.memory_space<vmem>>, %arg6: memref<1x147x1xf32, #tpu.memory_space<vmem>>, %arg7: memref<8x32xf32, #tpu.memory_space<vmem>>, %arg8: memref<1x32xf32, #tpu.memory_space<vmem>>, %arg9: memref<1x147x32xf32, #tpu.memory_space<vmem>>) attributes {dimension_semantics = [#tpu.dimension_semantics<parallel>], iteration_bounds = array<i64: 2>, scalar_prefetch = 0 : i64, scratch_operands = 0 : i64, tpu.core_type = #tpu.core_type<tc>, window_params = [{transform_indices = @transform_0, window_bounds = array<i64: 1, 147, 16>}, {pipeline_mode = #tpu.pipeline_mode<synchronous>, transform_indices = @transform_1, window_bounds = array<i64: 16, 32>}, {transform_indices = @transform_2, window_bounds = array<i64: 1, 147, 8>}, {pipeline_mode = #tpu.pipeline_mode<synchronous>, transform_indices = @transform_3, window_bounds = array<i64: 8, 32>}, {transform_indices = @transform_4, window_bounds = array<i64: 1, 147, 8>}, {transform_indices = @transform_5, window_bounds = array<i64: 1, 147, 1>}, {pipeline_mode = #tpu.pipeline_mode<synchronous>, transform_indices = @transform_6, window_bounds = array<i64: 8, 32>}, {pipeline_mode = #tpu.pipeline_mode<synchronous>, transform_indices = @transform_7, window_bounds = array<i64: 1, 32>}, {transform_indices = @transform_8, window_bounds = array<i64: 1, 147, 32>}]} {
    %c0 = arith.constant 0 : index
    %c0_0 = arith.constant 0 : index
    %c0_1 = arith.constant 0 : index
    %0 = vector.load %arg1[%c0, %c0_0, %c0_1] : memref<1x147x16xf32, #tpu.memory_space<vmem>>, vector<1x147x16xf32>
    %1 = vector.shape_cast %0 : vector<1x147x16xf32> to vector<147x16xf32>
    %c0_2 = arith.constant 0 : index
    %c0_3 = arith.constant 0 : index
    %2 = vector.load %arg2[%c0_2, %c0_3] : memref<16x32xf32, #tpu.memory_space<vmem>>, vector<16x32xf32>
    %cst = arith.constant dense<0.000000e+00> : vector<147x32xf32>
    %3 = tpu.matmul %1, %2, %cst {dimension_numbers = #tpu.dot_dimension_numbers<[1], [0], [0], [1], [0, 0, 1, 1], [], []>} : vector<147x16xf32>, vector<16x32xf32>, vector<147x32xf32> -> vector<147x32xf32>
    %c0_4 = arith.constant 0 : index
    %c0_5 = arith.constant 0 : index
    %c0_6 = arith.constant 0 : index
    %4 = vector.load %arg3[%c0_4, %c0_5, %c0_6] : memref<1x147x8xf32, #tpu.memory_space<vmem>>, vector<1x147x8xf32>
    %5 = vector.shape_cast %4 : vector<1x147x8xf32> to vector<147x8xf32>
    %c0_7 = arith.constant 0 : index
    %c0_8 = arith.constant 0 : index
    %6 = vector.load %arg4[%c0_7, %c0_8] : memref<8x32xf32, #tpu.memory_space<vmem>>, vector<8x32xf32>
    %cst_9 = arith.constant dense<0.000000e+00> : vector<147x32xf32>
    %7 = tpu.matmul %5, %6, %cst_9 {dimension_numbers = #tpu.dot_dimension_numbers<[1], [0], [0], [1], [0, 0, 1, 1], [], []>} : vector<147x8xf32>, vector<8x32xf32>, vector<147x32xf32> -> vector<147x32xf32>
    %8 = arith.addf %3, %7 : vector<147x32xf32>
    %c0_10 = arith.constant 0 : index
    %c0_11 = arith.constant 0 : index
    %c0_12 = arith.constant 0 : index
    %9 = vector.load %arg5[%c0_10, %c0_11, %c0_12] : memref<1x147x8xf32, #tpu.memory_space<vmem>>, vector<1x147x8xf32>
    %10 = vector.shape_cast %9 : vector<1x147x8xf32> to vector<147x8xf32>
    %c0_13 = arith.constant 0 : index
    %c0_14 = arith.constant 0 : index
    %c0_15 = arith.constant 0 : index
    %11 = vector.load %arg6[%c0_13, %c0_14, %c0_15] : memref<1x147x1xf32, #tpu.memory_space<vmem>>, vector<1x147x1xf32>
    %12 = vector.shape_cast %11 : vector<1x147x1xf32> to vector<147x1xf32>
    %13 = vector.broadcast %12 : vector<147x1xf32> to vector<147x8xf32>
    %14 = arith.mulf %10, %13 : vector<147x8xf32>
    %c0_16 = arith.constant 0 : index
    %c0_17 = arith.constant 0 : index
    %15 = vector.load %arg7[%c0_16, %c0_17] : memref<8x32xf32, #tpu.memory_space<vmem>>, vector<8x32xf32>
    %cst_18 = arith.constant dense<0.000000e+00> : vector<147x32xf32>
    %16 = tpu.matmul %14, %15, %cst_18 {dimension_numbers = #tpu.dot_dimension_numbers<[1], [0], [0], [1], [0, 0, 1, 1], [], []>} : vector<147x8xf32>, vector<8x32xf32>, vector<147x32xf32> -> vector<147x32xf32>
    %17 = arith.addf %8, %16 : vector<147x32xf32>
    %c0_19 = arith.constant 0 : index
    %c0_20 = arith.constant 0 : index
    %18 = vector.load %arg8[%c0_19, %c0_20] : memref<1x32xf32, #tpu.memory_space<vmem>>, vector<1x32xf32>
    %19 = vector.broadcast %18 : vector<1x32xf32> to vector<147x32xf32>
    %20 = arith.addf %17, %19 : vector<147x32xf32>
    %c0_21 = arith.constant 0 : index
    %c0_22 = arith.constant 0 : index
    %c0_23 = arith.constant 0 : index
    %21 = vector.load %arg9[%c0_21, %c0_22, %c0_23] : memref<1x147x32xf32, #tpu.memory_space<vmem>>, vector<1x147x32xf32>
    %22 = vector.shape_cast %21 : vector<1x147x32xf32> to vector<147x32xf32>
    %23 = vector.shape_cast %20 : vector<147x32xf32> to vector<1x147x32xf32>
    tpu.vector_store %arg9[%c0_21, %c0_22, %c0_23], %23 {strides = array<i32>} : memref<1x147x32xf32, #tpu.memory_space<vmem>>, vector<1x147x32xf32>,
    return
  }
  func.func @transform_0(%arg0: i32) -> (i32, i32, i32) {
    %c0_i32 = arith.constant 0 : i32
    %c0_i32_0 = arith.constant 0 : i32
    %c0_i32_1 = arith.constant 0 : i32
    return %arg0, %c0_i32, %c0_i32_0 : i32, i32, i32
  }
  func.func @transform_1(%arg0: i32) -> (i32, i32) {
    %c0_i32 = arith.constant 0 : i32
    %c0_i32_0 = arith.constant 0 : i32
    %c0_i32_1 = arith.constant 0 : i32
    return %c0_i32, %c0_i32_0 : i32, i32
  }
  func.func @transform_2(%arg0: i32) -> (i32, i32, i32) {
    %c0_i32 = arith.constant 0 : i32
    %c0_i32_0 = arith.constant 0 : i32
    %c0_i32_1 = arith.constant 0 : i32
    return %arg0, %c0_i32, %c0_i32_0 : i32, i32, i32
  }
  func.func @transform_3(%arg0: i32) -> (i32, i32) {
    %c0_i32 = arith.constant 0 : i32
    %c0_i32_0 = arith.constant 0 : i32
    %c0_i32_1 = arith.constant 0 : i32
    return %c0_i32, %c0_i32_0 : i32, i32
  }
  func.func @transform_4(%arg0: i32) -> (i32, i32, i32) {
    %c0_i32 = arith.constant 0 : i32
    %c0_i32_0 = arith.constant 0 : i32
    %c0_i32_1 = arith.constant 0 : i32
    return %arg0, %c0_i32, %c0_i32_0 : i32, i32, i32
  }
  func.func @transform_5(%arg0: i32) -> (i32, i32, i32) {
    %c0_i32 = arith.constant 0 : i32
    %c0_i32_0 = arith.constant 0 : i32
    %c0_i32_1 = arith.constant 0 : i32
    return %arg0, %c0_i32, %c0_i32_0 : i32, i32, i32
  }
  func.func @transform_6(%arg0: i32) -> (i32, i32) {
    %c0_i32 = arith.constant 0 : i32
    %c0_i32_0 = arith.constant 0 : i32
    %c0_i32_1 = arith.constant 0 : i32
    return %c0_i32, %c0_i32_0 : i32, i32
  }
  func.func @transform_7(%arg0: i32) -> (i32, i32) {
    %c0_i32 = arith.constant 0 : i32
    %c0_i32_0 = arith.constant 0 : i32
    %c0_i32_1 = arith.constant 0 : i32
    return %c0_i32, %c0_i32_0 : i32, i32
  }
  func.func @transform_8(%arg0: i32) -> (i32, i32, i32) {
    %c0_i32 = arith.constant 0 : i32
    %c0_i32_0 = arith.constant 0 : i32
    %c0_i32_1 = arith.constant 0 : i32
    return %arg0, %c0_i32, %c0_i32_0 : i32, i32, i32
  }
}

module attributes {stable_mosaic.version = 11 : i64} {
  func.func @_fused_mm_kernel(%arg0: i32, %arg1: memref<1x441x32xf32, #tpu.memory_space<vmem>>, %arg2: memref<32x32xf32, #tpu.memory_space<vmem>>, %arg3: memref<1x441x32xf32, #tpu.memory_space<vmem>>, %arg4: memref<32x32xf32, #tpu.memory_space<vmem>>, %arg5: memref<1x441x8xf32, #tpu.memory_space<vmem>>, %arg6: memref<8x32xf32, #tpu.memory_space<vmem>>, %arg7: memref<1x441x8xf32, #tpu.memory_space<vmem>>, %arg8: memref<1x441x1xf32, #tpu.memory_space<vmem>>, %arg9: memref<8x32xf32, #tpu.memory_space<vmem>>, %arg10: memref<1x441x8xf32, #tpu.memory_space<vmem>>, %arg11: memref<1x441x1xf32, #tpu.memory_space<vmem>>, %arg12: memref<8x32xf32, #tpu.memory_space<vmem>>, %arg13: memref<1x32xf32, #tpu.memory_space<vmem>>, %arg14: memref<1x441x32xf32, #tpu.memory_space<vmem>>) attributes {dimension_semantics = [#tpu.dimension_semantics<parallel>], iteration_bounds = array<i64: 2>, scalar_prefetch = 0 : i64, scratch_operands = 0 : i64, tpu.core_type = #tpu.core_type<tc>, window_params = [{transform_indices = @transform_0, window_bounds = array<i64: 1, 441, 32>}, {pipeline_mode = #tpu.pipeline_mode<synchronous>, transform_indices = @transform_1, window_bounds = array<i64: 32, 32>}, {transform_indices = @transform_2, window_bounds = array<i64: 1, 441, 32>}, {pipeline_mode = #tpu.pipeline_mode<synchronous>, transform_indices = @transform_3, window_bounds = array<i64: 32, 32>}, {transform_indices = @transform_4, window_bounds = array<i64: 1, 441, 8>}, {pipeline_mode = #tpu.pipeline_mode<synchronous>, transform_indices = @transform_5, window_bounds = array<i64: 8, 32>}, {transform_indices = @transform_6, window_bounds = array<i64: 1, 441, 8>}, {transform_indices = @transform_7, window_bounds = array<i64: 1, 441, 1>}, {pipeline_mode = #tpu.pipeline_mode<synchronous>, transform_indices = @transform_8, window_bounds = array<i64: 8, 32>}, {transform_indices = @transform_9, window_bounds = array<i64: 1, 441, 8>}, {transform_indices = @transform_10, window_bounds = array<i64: 1, 441, 1>}, {pipeline_mode = #tpu.pipeline_mode<synchronous>, transform_indices = @transform_11, window_bounds = array<i64: 8, 32>}, {pipeline_mode = #tpu.pipeline_mode<synchronous>, transform_indices = @transform_12, window_bounds = array<i64: 1, 32>}, {transform_indices = @transform_13, window_bounds = array<i64: 1, 441, 32>}]} {
    %c0 = arith.constant 0 : index
    %c0_0 = arith.constant 0 : index
    %c0_1 = arith.constant 0 : index
    %0 = vector.load %arg1[%c0, %c0_0, %c0_1] : memref<1x441x32xf32, #tpu.memory_space<vmem>>, vector<1x441x32xf32>
    %1 = vector.shape_cast %0 : vector<1x441x32xf32> to vector<441x32xf32>
    %c0_2 = arith.constant 0 : index
    %c0_3 = arith.constant 0 : index
    %2 = vector.load %arg2[%c0_2, %c0_3] : memref<32x32xf32, #tpu.memory_space<vmem>>, vector<32x32xf32>
    %cst = arith.constant dense<0.000000e+00> : vector<441x32xf32>
    %3 = tpu.matmul %1, %2, %cst {dimension_numbers = #tpu.dot_dimension_numbers<[1], [0], [0], [1], [0, 0, 1, 1], [], []>} : vector<441x32xf32>, vector<32x32xf32>, vector<441x32xf32> -> vector<441x32xf32>
    %c0_4 = arith.constant 0 : index
    %c0_5 = arith.constant 0 : index
    %c0_6 = arith.constant 0 : index
    %4 = vector.load %arg3[%c0_4, %c0_5, %c0_6] : memref<1x441x32xf32, #tpu.memory_space<vmem>>, vector<1x441x32xf32>
    %5 = vector.shape_cast %4 : vector<1x441x32xf32> to vector<441x32xf32>
    %c0_7 = arith.constant 0 : index
    %c0_8 = arith.constant 0 : index
    %6 = vector.load %arg4[%c0_7, %c0_8] : memref<32x32xf32, #tpu.memory_space<vmem>>, vector<32x32xf32>
    %cst_9 = arith.constant dense<0.000000e+00> : vector<441x32xf32>
    %7 = tpu.matmul %5, %6, %cst_9 {dimension_numbers = #tpu.dot_dimension_numbers<[1], [0], [0], [1], [0, 0, 1, 1], [], []>} : vector<441x32xf32>, vector<32x32xf32>, vector<441x32xf32> -> vector<441x32xf32>
    %8 = arith.addf %3, %7 : vector<441x32xf32>
    %c0_10 = arith.constant 0 : index
    %c0_11 = arith.constant 0 : index
    %c0_12 = arith.constant 0 : index
    %9 = vector.load %arg5[%c0_10, %c0_11, %c0_12] : memref<1x441x8xf32, #tpu.memory_space<vmem>>, vector<1x441x8xf32>
    %10 = vector.shape_cast %9 : vector<1x441x8xf32> to vector<441x8xf32>
    %c0_13 = arith.constant 0 : index
    %c0_14 = arith.constant 0 : index
    %11 = vector.load %arg6[%c0_13, %c0_14] : memref<8x32xf32, #tpu.memory_space<vmem>>, vector<8x32xf32>
    %cst_15 = arith.constant dense<0.000000e+00> : vector<441x32xf32>
    %12 = tpu.matmul %10, %11, %cst_15 {dimension_numbers = #tpu.dot_dimension_numbers<[1], [0], [0], [1], [0, 0, 1, 1], [], []>} : vector<441x8xf32>, vector<8x32xf32>, vector<441x32xf32> -> vector<441x32xf32>
    %13 = arith.addf %8, %12 : vector<441x32xf32>
    %c0_16 = arith.constant 0 : index
    %c0_17 = arith.constant 0 : index
    %c0_18 = arith.constant 0 : index
    %14 = vector.load %arg7[%c0_16, %c0_17, %c0_18] : memref<1x441x8xf32, #tpu.memory_space<vmem>>, vector<1x441x8xf32>
    %15 = vector.shape_cast %14 : vector<1x441x8xf32> to vector<441x8xf32>
    %c0_19 = arith.constant 0 : index
    %c0_20 = arith.constant 0 : index
    %c0_21 = arith.constant 0 : index
    %16 = vector.load %arg8[%c0_19, %c0_20, %c0_21] : memref<1x441x1xf32, #tpu.memory_space<vmem>>, vector<1x441x1xf32>
    %17 = vector.shape_cast %16 : vector<1x441x1xf32> to vector<441x1xf32>
    %18 = vector.broadcast %17 : vector<441x1xf32> to vector<441x8xf32>
    %19 = arith.mulf %15, %18 : vector<441x8xf32>
    %c0_22 = arith.constant 0 : index
    %c0_23 = arith.constant 0 : index
    %20 = vector.load %arg9[%c0_22, %c0_23] : memref<8x32xf32, #tpu.memory_space<vmem>>, vector<8x32xf32>
    %cst_24 = arith.constant dense<0.000000e+00> : vector<441x32xf32>
    %21 = tpu.matmul %19, %20, %cst_24 {dimension_numbers = #tpu.dot_dimension_numbers<[1], [0], [0], [1], [0, 0, 1, 1], [], []>} : vector<441x8xf32>, vector<8x32xf32>, vector<441x32xf32> -> vector<441x32xf32>
    %22 = arith.addf %13, %21 : vector<441x32xf32>
    %c0_25 = arith.constant 0 : index
    %c0_26 = arith.constant 0 : index
    %c0_27 = arith.constant 0 : index
    %23 = vector.load %arg10[%c0_25, %c0_26, %c0_27] : memref<1x441x8xf32, #tpu.memory_space<vmem>>, vector<1x441x8xf32>
    %24 = vector.shape_cast %23 : vector<1x441x8xf32> to vector<441x8xf32>
    %c0_28 = arith.constant 0 : index
    %c0_29 = arith.constant 0 : index
    %c0_30 = arith.constant 0 : index
    %25 = vector.load %arg11[%c0_28, %c0_29, %c0_30] : memref<1x441x1xf32, #tpu.memory_space<vmem>>, vector<1x441x1xf32>
    %26 = vector.shape_cast %25 : vector<1x441x1xf32> to vector<441x1xf32>
    %27 = vector.broadcast %26 : vector<441x1xf32> to vector<441x8xf32>
    %28 = arith.mulf %24, %27 : vector<441x8xf32>
    %c0_31 = arith.constant 0 : index
    %c0_32 = arith.constant 0 : index
    %29 = vector.load %arg12[%c0_31, %c0_32] : memref<8x32xf32, #tpu.memory_space<vmem>>, vector<8x32xf32>
    %cst_33 = arith.constant dense<0.000000e+00> : vector<441x32xf32>
    %30 = tpu.matmul %28, %29, %cst_33 {dimension_numbers = #tpu.dot_dimension_numbers<[1], [0], [0], [1], [0, 0, 1, 1], [], []>} : vector<441x8xf32>, vector<8x32xf32>, vector<441x32xf32> -> vector<441x32xf32>
    %31 = arith.addf %22, %30 : vector<441x32xf32>
    %c0_34 = arith.constant 0 : index
    %c0_35 = arith.constant 0 : index
    %32 = vector.load %arg13[%c0_34, %c0_35] : memref<1x32xf32, #tpu.memory_space<vmem>>, vector<1x32xf32>
    %33 = vector.broadcast %32 : vector<1x32xf32> to vector<441x32xf32>
    %34 = arith.addf %31, %33 : vector<441x32xf32>
    %c0_36 = arith.constant 0 : index
    %c0_37 = arith.constant 0 : index
    %c0_38 = arith.constant 0 : index
    %35 = vector.load %arg14[%c0_36, %c0_37, %c0_38] : memref<1x441x32xf32, #tpu.memory_space<vmem>>, vector<1x441x32xf32>
    %36 = vector.shape_cast %35 : vector<1x441x32xf32> to vector<441x32xf32>
    %37 = vector.shape_cast %34 : vector<441x32xf32> to vector<1x441x32xf32>
    tpu.vector_store %arg14[%c0_36, %c0_37, %c0_38], %37 {strides = array<i32>} : memref<1x441x32xf32, #tpu.memory_space<vmem>>, vector<1x441x32xf32>,
    return
  }
  func.func @transform_0(%arg0: i32) -> (i32, i32, i32) {
    %c0_i32 = arith.constant 0 : i32
    %c0_i32_0 = arith.constant 0 : i32
    %c0_i32_1 = arith.constant 0 : i32
    return %arg0, %c0_i32, %c0_i32_0 : i32, i32, i32
  }
  func.func @transform_1(%arg0: i32) -> (i32, i32) {
    %c0_i32 = arith.constant 0 : i32
    %c0_i32_0 = arith.constant 0 : i32
    %c0_i32_1 = arith.constant 0 : i32
    return %c0_i32, %c0_i32_0 : i32, i32
  }
  func.func @transform_2(%arg0: i32) -> (i32, i32, i32) {
    %c0_i32 = arith.constant 0 : i32
    %c0_i32_0 = arith.constant 0 : i32
    %c0_i32_1 = arith.constant 0 : i32
    return %arg0, %c0_i32, %c0_i32_0 : i32, i32, i32
  }
  func.func @transform_3(%arg0: i32) -> (i32, i32) {
    %c0_i32 = arith.constant 0 : i32
    %c0_i32_0 = arith.constant 0 : i32
    %c0_i32_1 = arith.constant 0 : i32
    return %c0_i32, %c0_i32_0 : i32, i32
  }
  func.func @transform_4(%arg0: i32) -> (i32, i32, i32) {
    %c0_i32 = arith.constant 0 : i32
    %c0_i32_0 = arith.constant 0 : i32
    %c0_i32_1 = arith.constant 0 : i32
    return %arg0, %c0_i32, %c0_i32_0 : i32, i32, i32
  }
  func.func @transform_5(%arg0: i32) -> (i32, i32) {
    %c0_i32 = arith.constant 0 : i32
    %c0_i32_0 = arith.constant 0 : i32
    %c0_i32_1 = arith.constant 0 : i32
    return %c0_i32, %c0_i32_0 : i32, i32
  }
  func.func @transform_6(%arg0: i32) -> (i32, i32, i32) {
    %c0_i32 = arith.constant 0 : i32
    %c0_i32_0 = arith.constant 0 : i32
    %c0_i32_1 = arith.constant 0 : i32
    return %arg0, %c0_i32, %c0_i32_0 : i32, i32, i32
  }
  func.func @transform_7(%arg0: i32) -> (i32, i32, i32) {
    %c0_i32 = arith.constant 0 : i32
    %c0_i32_0 = arith.constant 0 : i32
    %c0_i32_1 = arith.constant 0 : i32
    return %arg0, %c0_i32, %c0_i32_0 : i32, i32, i32
  }
  func.func @transform_8(%arg0: i32) -> (i32, i32) {
    %c0_i32 = arith.constant 0 : i32
    %c0_i32_0 = arith.constant 0 : i32
    %c0_i32_1 = arith.constant 0 : i32
    return %c0_i32, %c0_i32_0 : i32, i32
  }
  func.func @transform_9(%arg0: i32) -> (i32, i32, i32) {
    %c0_i32 = arith.constant 0 : i32
    %c0_i32_0 = arith.constant 0 : i32
    %c0_i32_1 = arith.constant 0 : i32
    return %arg0, %c0_i32, %c0_i32_0 : i32, i32, i32
  }
  func.func @transform_10(%arg0: i32) -> (i32, i32, i32) {
    %c0_i32 = arith.constant 0 : i32
    %c0_i32_0 = arith.constant 0 : i32
    %c0_i32_1 = arith.constant 0 : i32
    return %arg0, %c0_i32, %c0_i32_0 : i32, i32, i32
  }
  func.func @transform_11(%arg0: i32) -> (i32, i32) {
    %c0_i32 = arith.constant 0 : i32
    %c0_i32_0 = arith.constant 0 : i32
    %c0_i32_1 = arith.constant 0 : i32
    return %c0_i32, %c0_i32_0 : i32, i32
  }
  func.func @transform_12(%arg0: i32) -> (i32, i32) {
    %c0_i32 = arith.constant 0 : i32
    %c0_i32_0 = arith.constant 0 : i32
    %c0_i32_1 = arith.constant 0 : i32
    return %c0_i32, %c0_i32_0 : i32, i32
  }
  func.func @transform_13(%arg0: i32) -> (i32, i32, i32) {
    %c0_i32 = arith.constant 0 : i32
    %c0_i32_0 = arith.constant 0 : i32
    %c0_i32_1 = arith.constant 0 : i32
    return %arg0, %c0_i32, %c0_i32_0 : i32, i32, i32
  }
}

module attributes {stable_mosaic.version = 11 : i64} {
  func.func @_fused_mm_kernel(%arg0: i32, %arg1: memref<1x18x1568xf32, #tpu.memory_space<vmem>>, %arg2: memref<1x1568x32xf32, #tpu.memory_space<vmem>>, %arg3: memref<1x1x32xf32, #tpu.memory_space<vmem>>, %arg4: memref<1x18x32xf32, #tpu.memory_space<vmem>>) attributes {dimension_semantics = [#tpu.dimension_semantics<parallel>], iteration_bounds = array<i64: 2>, scalar_prefetch = 0 : i64, scratch_operands = 0 : i64, tpu.core_type = #tpu.core_type<tc>, window_params = [{transform_indices = @transform_0, window_bounds = array<i64: 1, 18, 1568>}, {transform_indices = @transform_1, window_bounds = array<i64: 1, 1568, 32>}, {transform_indices = @transform_2, window_bounds = array<i64: 1, 1, 32>}, {transform_indices = @transform_3, window_bounds = array<i64: 1, 18, 32>}]} {
    %c0 = arith.constant 0 : index
    %c0_0 = arith.constant 0 : index
    %c0_1 = arith.constant 0 : index
    %0 = vector.load %arg1[%c0, %c0_0, %c0_1] : memref<1x18x1568xf32, #tpu.memory_space<vmem>>, vector<1x18x1568xf32>
    %1 = vector.shape_cast %0 : vector<1x18x1568xf32> to vector<18x1568xf32>
    %cst = arith.constant 0.000000e+00 : f32
    %2 = vector.broadcast %cst : f32 to vector<18x1568xf32>
    %3 = arith.maximumf %1, %2 : vector<18x1568xf32>
    %c0_2 = arith.constant 0 : index
    %c0_3 = arith.constant 0 : index
    %c0_4 = arith.constant 0 : index
    %4 = vector.load %arg2[%c0_2, %c0_3, %c0_4] : memref<1x1568x32xf32, #tpu.memory_space<vmem>>, vector<1x1568x32xf32>
    %5 = vector.shape_cast %4 : vector<1x1568x32xf32> to vector<1568x32xf32>
    %cst_5 = arith.constant dense<0.000000e+00> : vector<18x32xf32>
    %6 = tpu.matmul %3, %5, %cst_5 {dimension_numbers = #tpu.dot_dimension_numbers<[1], [0], [0], [1], [0, 0, 1, 1], [], []>} : vector<18x1568xf32>, vector<1568x32xf32>, vector<18x32xf32> -> vector<18x32xf32>
    %c0_6 = arith.constant 0 : index
    %c0_7 = arith.constant 0 : index
    %c0_8 = arith.constant 0 : index
    %7 = vector.load %arg3[%c0_6, %c0_7, %c0_8] : memref<1x1x32xf32, #tpu.memory_space<vmem>>, vector<1x1x32xf32>
    %8 = vector.shape_cast %7 : vector<1x1x32xf32> to vector<1x32xf32>
    %9 = vector.broadcast %8 : vector<1x32xf32> to vector<18x32xf32>
    %10 = arith.addf %6, %9 : vector<18x32xf32>
    %11 = arith.mulf %10, %10 : vector<18x32xf32>
    %cst_9 = arith.constant dense<0.000000e+00> : vector<18xf32>
    %12 = vector.multi_reduction <add>, %11, %cst_9 [1] : vector<18x32xf32> to vector<18xf32>
    %13 = vector.shape_cast %12 : vector<18xf32> to vector<18x1xf32>
    %14 = math.sqrt %13 : vector<18x1xf32>
    %cst_10 = arith.constant 1.000000e-07 : f32
    %15 = vector.broadcast %cst_10 : f32 to vector<18x1xf32>
    %16 = arith.addf %14, %15 : vector<18x1xf32>
    %17 = vector.broadcast %16 : vector<18x1xf32> to vector<18x32xf32>
    %18 = arith.divf %10, %17 : vector<18x32xf32>
    %c0_11 = arith.constant 0 : index
    %c0_12 = arith.constant 0 : index
    %c0_13 = arith.constant 0 : index
    %19 = vector.load %arg4[%c0_11, %c0_12, %c0_13] : memref<1x18x32xf32, #tpu.memory_space<vmem>>, vector<1x18x32xf32>
    %20 = vector.shape_cast %19 : vector<1x18x32xf32> to vector<18x32xf32>
    %21 = vector.shape_cast %18 : vector<18x32xf32> to vector<1x18x32xf32>
    tpu.vector_store %arg4[%c0_11, %c0_12, %c0_13], %21 {strides = array<i32>} : memref<1x18x32xf32, #tpu.memory_space<vmem>>, vector<1x18x32xf32>,
    return
  }
  func.func @transform_0(%arg0: i32) -> (i32, i32, i32) {
    %c0_i32 = arith.constant 0 : i32
    %c0_i32_0 = arith.constant 0 : i32
    %c0_i32_1 = arith.constant 0 : i32
    return %arg0, %c0_i32, %c0_i32_0 : i32, i32, i32
  }
  func.func @transform_1(%arg0: i32) -> (i32, i32, i32) {
    %c0_i32 = arith.constant 0 : i32
    %c0_i32_0 = arith.constant 0 : i32
    %c0_i32_1 = arith.constant 0 : i32
    return %arg0, %c0_i32, %c0_i32_0 : i32, i32, i32
  }
  func.func @transform_2(%arg0: i32) -> (i32, i32, i32) {
    %c0_i32 = arith.constant 0 : i32
    %c0_i32_0 = arith.constant 0 : i32
    %c0_i32_1 = arith.constant 0 : i32
    return %arg0, %c0_i32, %c0_i32_0 : i32, i32, i32
  }
  func.func @transform_3(%arg0: i32) -> (i32, i32, i32) {
    %c0_i32 = arith.constant 0 : i32
    %c0_i32_0 = arith.constant 0 : i32
    %c0_i32_1 = arith.constant 0 : i32
    return %arg0, %c0_i32, %c0_i32_0 : i32, i32, i32
  }
}

</mosaic_0001>

<bundles_post_ra>
// kernel: scene_graph_forward.4
= control target key start
LH: loop header
LB: loop body
LE: loop exit
PB: predicated region body
PF: predicated region fallthrough
CT: control target
= control target key end

     0   :  { %s595_s12 = smov 0   ;;  %s794_s0 = inlined_call_operand.vmem [shape: f32[2,256,16], index: 0, kind: input, shape index: {}]   ;;  %s795_s1 = inlined_call_operand.vmem [shape: f32[16,40], index: 1, kind: input, shape index: {}]   ;;  %s796_s2 = inlined_call_operand.vmem [shape: f32[1,40], index: 2, kind: input, shape index: {}]   ;;  %s797_s3 = inlined_call_operand.vmem [shape: f32[2,256,40], index: 3, kind: output, shape index: {}]  }
   0x1 LB: > { %s507_s13 = sadd.s32 4294967295, %s573_s12   ;;  %p511_p0 = scmp.ge.s32.totalorder %s573_s12, 1  ;;  %s573_s12 = sphi %s595_s12, %s13_s12  }
   0x2   : > { %p137_p1 = scmp.lt.s32.totalorder %s573_s12, 3 }
   0x4   : > { %p138_p2 = pnand %p511_p0, %p137_p1 }
   0x5   : > { %p161_p3 = scmp.lt.s32.totalorder (!%p138_p2), %s507_s13, 1 }
   0x6   : > { %141 = sbr.rel (%p138_p2) target bundleno = 208 (0xd0), region = 32 }
   0xb   : > { %v204_v0 = vld [vmem:[%s795_s1 + $0x8] sm:$0xff]  ;;  %v203_v1 = vld [vmem:[%s795_s1] sm:$0xff]  ;;  %s799_s13 = smov (!%p161_p3, %s507_s13), 1  ;;  %vm209_vm0 = vcmask 130048   ;;  %vm419_vm1 = vcmask 326656  }
   0xc   : > { %553 = vmatpush.msra.mxu2 %v204_v0  ;;  %554 = vmatpush.msra.mxu3 %v204_v0  ;;  %s550_s18 = sshll.u32 %s799_s13, 8  ;;  %v686_v34 = vld [vmem:[%s796_s2] ss:$0 sm:$0xff] }
   0xd   : > { %320 = vmatpush.msra.mxu0 %v204_v0  ;;  %552 = vmatpush.msra.mxu1 %v204_v0  ;;  %s617_s21 = scalar_lea.vmem %s794_s0, %s550_s18  ;;  %s693_s26 = scalar_lea.vmem %s797_s3, %s550_s18 }
   0xe   : > { %556 = vmatpush.msra.mxu2 %v203_v1  ;;  %557 = vmatpush.msra.mxu3 %v203_v1  ;;  %v187_v2 = vld [vmem:[%s617_s21 + $0x80] sm:$0xff]  ;;  %v188_v6 = vld [vmem:[%s617_s21 + $0x88] sm:$0xff]  ;;  %v189_v10 = vld [vmem:[%s617_s21 + $0x90] sm:$0xff] }
   0xf   : > { %321 = vmatpush.msra.mxu0 %v203_v1  ;;  %555 = vmatpush.msra.mxu1 %v203_v1  ;;  %v195_v3 = vld [vmem:[%s617_s21 + $0xc0] sm:$0xff]  ;;  %v196_v7 = vld [vmem:[%s617_s21 + $0xc8] sm:$0xff]  ;;  %v197_v11 = vld [vmem:[%s617_s21 + $0xd0] sm:$0xff] }
  0x10   : > { %v171_v4 = vld [vmem:[%s617_s21] sm:$0xff]  ;;  %532 = vmatmul.msk.f32.vlgmr.msra.gmra.mxu2 %vm209_vm0, %v187_v2  ;;  %540 = vmatmul.msk.f32.vlgmr.msra.gmra.mxu3 %vm209_vm0, %v195_v3  ;;  %v172_v8 = vld [vmem:[%s617_s21 + $0x8] sm:$0xff]  ;;  %v173_v12 = vld [vmem:[%s617_s21 + $0x10] sm:$0xff] }
  0x11   : > { %v179_v5 = vld [vmem:[%s617_s21 + $0x40] sm:$0xff]  ;;  %516 = vmatmul.msk.f32.vlgmr.msra.gmra.mxu0 %vm209_vm0, %v171_v4  ;;  %v180_v9 = vld [vmem:[%s617_s21 + $0x48] sm:$0xff]  ;;  %v181_v13 = vld [vmem:[%s617_s21 + $0x50] sm:$0xff] }
  0x12   : > { %524 = vmatmul.msk.f32.vlgmr.msra.gmra.mxu1 %vm209_vm0, %v179_v5  ;;  %v190_v14 = vld [vmem:[%s617_s21 + $0x98] sm:$0xff]  ;;  %v191_v18 = vld [vmem:[%s617_s21 + $0xa0] sm:$0xff]  ;;  %v192_v22 = vld [vmem:[%s617_s21 + $0xa8] sm:$0xff] }
  0x13   : > { %v198_v15 = vld [vmem:[%s617_s21 + $0xd8] sm:$0xff]  ;;  %v199_v19 = vld [vmem:[%s617_s21 + $0xe0] sm:$0xff]  ;;  %v200_v23 = vld [vmem:[%s617_s21 + $0xe8] sm:$0xff] }
  0x14   : > { %v174_v16 = vld [vmem:[%s617_s21 + $0x18] sm:$0xff]  ;;  %v175_v20 = vld [vmem:[%s617_s21 + $0x20] sm:$0xff]  ;;  %v176_v24 = vld [vmem:[%s617_s21 + $0x28] sm:$0xff] }
  0x15   : > { %v182_v17 = vld [vmem:[%s617_s21 + $0x58] sm:$0xff]  ;;  %v183_v21 = vld [vmem:[%s617_s21 + $0x60] sm:$0xff]  ;;  %v184_v25 = vld [vmem:[%s617_s21 + $0x68] sm:$0xff] }
  0x16   : > { %v193_v26 = vld [vmem:[%s617_s21 + $0xb0] sm:$0xff]  ;;  %v194_v30 = vld [vmem:[%s617_s21 + $0xb8] sm:$0xff] }
  0x17   : > { %v201_v27 = vld [vmem:[%s617_s21 + $0xf0] sm:$0xff]  ;;  %v202_v31 = vld [vmem:[%s617_s21 + $0xf8] sm:$0xff] }
  0x18   : > { %533 = vmatmul.msk.f32.gmra.mxu2 %vm209_vm0, %v188_v6  ;;  %541 = vmatmul.msk.f32.gmra.mxu3 %vm209_vm0, %v196_v7  ;;  %v177_v28 = vld [vmem:[%s617_s21 + $0x30] sm:$0xff]  ;;  %v178_v32 = vld [vmem:[%s617_s21 + $0x38] sm:$0xff] }
  0x19   : > { %517 = vmatmul.msk.f32.gmra.mxu0 %vm209_vm0, %v172_v8  ;;  %v185_v29 = vld [vmem:[%s617_s21 + $0x70] sm:$0xff]  ;;  %v186_v33 = vld [vmem:[%s617_s21 + $0x78] sm:$0xff] }
  0x1a   : > { %525 = vmatmul.msk.f32.gmra.mxu1 %vm209_vm0, %v180_v9 }
  0x20   : > { %534 = vmatmul.msk.f32.gmra.mxu2 %vm209_vm0, %v189_v10  ;;  %542 = vmatmul.msk.f32.gmra.mxu3 %vm209_vm0, %v197_v11 }
  0x21   : > { %518 = vmatmul.msk.f32.gmra.mxu0 %vm209_vm0, %v173_v12 }
  0x22   : > { %526 = vmatmul.msk.f32.gmra.mxu1 %vm209_vm0, %v181_v13 }
  0x28   : > { %535 = vmatmul.msk.f32.gmra.mxu2 %vm209_vm0, %v190_v14  ;;  %543 = vmatmul.msk.f32.gmra.mxu3 %vm209_vm0, %v198_v15 }
  0x29   : > { %519 = vmatmul.msk.f32.gmra.mxu0 %vm209_vm0, %v174_v16 }
  0x2a   : > { %527 = vmatmul.msk.f32.gmra.mxu1 %vm209_vm0, %v182_v17 }
  0x30   : > { %536 = vmatmul.msk.f32.gmra.mxu2 %vm209_vm0, %v191_v18  ;;  %544 = vmatmul.msk.f32.gmra.mxu3 %vm209_vm0, %v199_v19 }
  0x31   : > { %520 = vmatmul.msk.f32.gmra.mxu0 %vm209_vm0, %v175_v20 }
  0x32   : > { %528 = vmatmul.msk.f32.gmra.mxu1 %vm209_vm0, %v183_v21 }
  0x38   : > { %537 = vmatmul.msk.f32.gmra.mxu2 %vm209_vm0, %v192_v22  ;;  %545 = vmatmul.msk.f32.gmra.mxu3 %vm209_vm0, %v200_v23 }
  0x39   : > { %521 = vmatmul.msk.f32.gmra.mxu0 %vm209_vm0, %v176_v24 }
  0x3a   : > { %529 = vmatmul.msk.f32.gmra.mxu1 %vm209_vm0, %v184_v25 }
  0x40   : > { %538 = vmatmul.msk.f32.gmra.mxu2 %vm209_vm0, %v193_v26  ;;  %546 = vmatmul.msk.f32.gmra.mxu3 %vm209_vm0, %v201_v27 }
  0x41   : > { %522 = vmatmul.msk.f32.gmra.mxu0 %vm209_vm0, %v177_v28 }
  0x42   : > { %530 = vmatmul.msk.f32.gmra.mxu1 %vm209_vm0, %v185_v29 }
  0x48   : > { %539 = vmatmul.msk.f32.gmra.mxu2 %vm209_vm0, %v194_v30  ;;  %547 = vmatmul.msk.f32.gmra.mxu3 %vm209_vm0, %v202_v31 }
  0x49   : > { %523 = vmatmul.msk.f32.gmra.mxu0 %vm209_vm0, %v178_v32 }
  0x4a   : > { %531 = vmatmul.msk.f32.gmra.mxu1 %vm209_vm0, %v186_v33 }
  0x8e   : > { %v323_v35 = vpop.f32.mrf.mxu0 }
  0x8f   : > { %v347_v36 = vpop.f32.mrf.mxu1  ;;  %v324_v37 = vadd.f32 %v686_v34, %v323_v35 }
  0x90   : > { %v348_v38 = vadd.f32 %v686_v34, %v347_v36 }
  0x91   : > { %420 = vst.msk [vmem:[%s693_s26] sm:$0xff] %vm419_vm1, %v324_v37 }
  0x92   : > { %428 = vst.msk [vmem:[%s693_s26 + $0x40] sm:$0xff] %vm419_vm1, %v348_v38 }
  0x93   : > { %v371_v39 = vpop.f32.mrf.mxu2  ;;  %v395_v40 = vpop.f32.mrf.mxu3 }
  0x94   : > { %v372_v41 = vadd.f32 %v686_v34, %v371_v39  ;;  %v396_v42 = vadd.f32 %v686_v34, %v395_v40 }
  0x96   : > { %436 = vst.msk [vmem:[%s693_s26 + $0x80] sm:$0xff] %vm419_vm1, %v372_v41  ;;  %v326_v43 = vpop.f32.mrf.mxu0 }
  0x97   : > { %v350_v44 = vpop.f32.mrf.mxu1  ;;  %444 = vst.msk [vmem:[%s693_s26 + $0xc0] sm:$0xff] %vm419_vm1, %v396_v42  ;;  %v327_v45 = vadd.f32 %v686_v34, %v326_v43 }
  0x98   : > { %v351_v46 = vadd.f32 %v686_v34, %v350_v44 }
  0x99   : > { %421 = vst.msk [vmem:[%s693_s26 + $0x8] sm:$0xff] %vm419_vm1, %v327_v45 }
  0x9a   : > { %429 = vst.msk [vmem:[%s693_s26 + $0x48] sm:$0xff] %vm419_vm1, %v351_v46 }
  0x9b   : > { %v374_v47 = vpop.f32.mrf.mxu2  ;;  %v398_v48 = vpop.f32.mrf.mxu3 }
  0x9c   : > { %v375_v49 = vadd.f32 %v686_v34, %v374_v47  ;;  %v399_v50 = vadd.f32 %v686_v34, %v398_v48 }
  0x9e   : > { %437 = vst.msk [vmem:[%s693_s26 + $0x88] sm:$0xff] %vm419_vm1, %v375_v49  ;;  %v329_v51 = vpop.f32.mrf.mxu0 }
  0x9f   : > { %v353_v52 = vpop.f32.mrf.mxu1  ;;  %445 = vst.msk [vmem:[%s693_s26 + $0xc8] sm:$0xff] %vm419_vm1, %v399_v50  ;;  %v330_v53 = vadd.f32 %v686_v34, %v329_v51 }
  0xa0   : > { %v354_v54 = vadd.f32 %v686_v34, %v353_v52 }
  0xa1   : > { %422 = vst.msk [vmem:[%s693_s26 + $0x10] sm:$0xff] %vm419_vm1, %v330_v53 }
  0xa2   : > { %430 = vst.msk [vmem:[%s693_s26 + $0x50] sm:$0xff] %vm419_vm1, %v354_v54 }
  0xa3   : > { %v377_v55 = vpop.f32.mrf.mxu2  ;;  %v401_v56 = vpop.f32.mrf.mxu3 }
  0xa4   : > { %v378_v57 = vadd.f32 %v686_v34, %v377_v55  ;;  %v402_v58 = vadd.f32 %v686_v34, %v401_v56 }
  0xa6   : > { %438 = vst.msk [vmem:[%s693_s26 + $0x90] sm:$0xff] %vm419_vm1, %v378_v57  ;;  %v332_v59 = vpop.f32.mrf.mxu0 }
  0xa7   : > { %v356_v60 = vpop.f32.mrf.mxu1  ;;  %446 = vst.msk [vmem:[%s693_s26 + $0xd0] sm:$0xff] %vm419_vm1, %v402_v58  ;;  %v333_v61 = vadd.f32 %v686_v34, %v332_v59 }
  0xa8   : > { %v357_v62 = vadd.f32 %v686_v34, %v356_v60 }
  0xa9   : > { %423 = vst.msk [vmem:[%s693_s26 + $0x18] sm:$0xff] %vm419_vm1, %v333_v61 }
  0xaa   : > { %431 = vst.msk [vmem:[%s693_s26 + $0x58] sm:$0xff] %vm419_vm1, %v357_v62 }
  0xab   : > { %v380_v63 = vpop.f32.mrf.mxu2  ;;  %v404_v0 = vpop.f32.mrf.mxu3 }
  0xac   : > { %v381_v1 = vadd.f32 %v686_v34, %v380_v63  ;;  %v405_v2 = vadd.f32 %v686_v34, %v404_v0 }
  0xae   : > { %439 = vst.msk [vmem:[%s693_s26 + $0x98] sm:$0xff] %vm419_vm1, %v381_v1  ;;  %v335_v3 = vpop.f32.mrf.mxu0 }
  0xaf   : > { %v359_v4 = vpop.f32.mrf.mxu1  ;;  %447 = vst.msk [vmem:[%s693_s26 + $0xd8] sm:$0xff] %vm419_vm1, %v405_v2  ;;  %v336_v5 = vadd.f32 %v686_v34, %v335_v3 }
  0xb0   : > { %v360_v6 = vadd.f32 %v686_v34, %v359_v4 }
  0xb1   : > { %424 = vst.msk [vmem:[%s693_s26 + $0x20] sm:$0xff] %vm419_vm1, %v336_v5 }
  0xb2   : > { %432 = vst.msk [vmem:[%s693_s26 + $0x60] sm:$0xff] %vm419_vm1, %v360_v6 }
  0xb3   : > { %v383_v7 = vpop.f32.mrf.mxu2  ;;  %v407_v8 = vpop.f32.mrf.mxu3 }
  0xb4   : > { %v384_v9 = vadd.f32 %v686_v34, %v383_v7  ;;  %v408_v10 = vadd.f32 %v686_v34, %v407_v8 }
  0xb6   : > { %440 = vst.msk [vmem:[%s693_s26 + $0xa0] sm:$0xff] %vm419_vm1, %v384_v9  ;;  %v338_v11 = vpop.f32.mrf.mxu0 }
  0xb7   : > { %v362_v12 = vpop.f32.mrf.mxu1  ;;  %448 = vst.msk [vmem:[%s693_s26 + $0xe0] sm:$0xff] %vm419_vm1, %v408_v10  ;;  %v339_v13 = vadd.f32 %v686_v34, %v338_v11 }
  0xb8   : > { %v363_v14 = vadd.f32 %v686_v34, %v362_v12 }
  0xb9   : > { %425 = vst.msk [vmem:[%s693_s26 + $0x28] sm:$0xff] %vm419_vm1, %v339_v13 }
  0xba   : > { %433 = vst.msk [vmem:[%s693_s26 + $0x68] sm:$0xff] %vm419_vm1, %v363_v14 }
  0xbb   : > { %v386_v15 = vpop.f32.mrf.mxu2  ;;  %v410_v16 = vpop.f32.mrf.mxu3 }
  0xbc   : > { %v387_v17 = vadd.f32 %v686_v34, %v386_v15  ;;  %v411_v18 = vadd.f32 %v686_v34, %v410_v16 }
  0xbe   : > { %441 = vst.msk [vmem:[%s693_s26 + $0xa8] sm:$0xff] %vm419_vm1, %v387_v17  ;;  %v341_v19 = vpop.f32.mrf.mxu0 }
  0xbf   : > { %v365_v20 = vpop.f32.mrf.mxu1  ;;  %449 = vst.msk [vmem:[%s693_s26 + $0xe8] sm:$0xff] %vm419_vm1, %v411_v18  ;;  %v342_v21 = vadd.f32 %v686_v34, %v341_v19 }
  0xc0   : > { %v366_v22 = vadd.f32 %v686_v34, %v365_v20 }
  0xc1   : > { %426 = vst.msk [vmem:[%s693_s26 + $0x30] sm:$0xff] %vm419_vm1, %v342_v21 }
  0xc2   : > { %434 = vst.msk [vmem:[%s693_s26 + $0x70] sm:$0xff] %vm419_vm1, %v366_v22 }
  0xc3   : > { %v389_v23 = vpop.f32.mrf.mxu2  ;;  %v413_v24 = vpop.f32.mrf.mxu3 }
  0xc4   : > { %v390_v25 = vadd.f32 %v686_v34, %v389_v23  ;;  %v414_v26 = vadd.f32 %v686_v34, %v413_v24 }
  0xc6   : > { %442 = vst.msk [vmem:[%s693_s26 + $0xb0] sm:$0xff] %vm419_vm1, %v390_v25  ;;  %v344_v27 = vpop.f32.mrf.mxu0 }
  0xc7   : > { %v368_v28 = vpop.f32.mrf.mxu1  ;;  %450 = vst.msk [vmem:[%s693_s26 + $0xf0] sm:$0xff] %vm419_vm1, %v414_v26  ;;  %v345_v29 = vadd.f32 %v686_v34, %v344_v27 }
  0xc8   : > { %v369_v30 = vadd.f32 %v686_v34, %v368_v28 }
  0xc9   : > { %427 = vst.msk [vmem:[%s693_s26 + $0x38] sm:$0xff] %vm419_vm1, %v345_v29 }
  0xca   : > { %435 = vst.msk [vmem:[%s693_s26 + $0x78] sm:$0xff] %vm419_vm1, %v369_v30 }
  0xcb   : > { %v392_v31 = vpop.f32.mrf.mxu2  ;;  %v416_v32 = vpop.f32.mrf.mxu3 }
  0xcc   : > { %v393_v33 = vadd.f32 %v686_v34, %v392_v31  ;;  %v417_v35 = vadd.f32 %v686_v34, %v416_v32 }
  0xce   : > { %443 = vst.msk [vmem:[%s693_s26 + $0xb8] sm:$0xff] %vm419_vm1, %v393_v33 }
  0xcf   : > { %451 = vst.msk [vmem:[%s693_s26 + $0xf8] sm:$0xff] %vm419_vm1, %v417_v35 }
  0xd0 PF: > { %s13_s12 = sadd.s32 1, %s573_s12  }
  0xd1   : > { %p10_p4 = scmp.ge.s32.totalorder %s13_s12, 4  }
  0xd3   :  { %12 = sbr.rel (!%p10_p4) target bundleno = 1 (0x1), region = 62 }

// kernel: scene_graph_forward.5
= control target key start
LH: loop header
LB: loop body
LE: loop exit
PB: predicated region body
PF: predicated region fallthrough
CT: control target
= control target key end

     0   :  { %s1250_s27 = smov 0   ;;  %s1514_s0 = inlined_call_operand.vmem [shape: f32[2,147,16], index: 0, kind: input, shape index: {}]   ;;  %s1515_s1 = inlined_call_operand.vmem [shape: f32[16,32], index: 1, kind: input, shape index: {}]   ;;  %s1516_s2 = inlined_call_operand.vmem [shape: f32[2,147,8], index: 2, kind: input, shape index: {}]   ;;  %s1517_s3 = inlined_call_operand.vmem [shape: f32[8,32], index: 3, kind: input, shape index: {}]   ;;  %s1518_s4 = inlined_call_operand.vmem [shape: f32[2,147,8], index: 4, kind: input, shape index: {}]   ;;  %s1519_s5 = inlined_call_operand.vmem [shape: f32[2,147,1], index: 5, kind: input, shape index: {}]   ;;  %s1520_s6 = inlined_call_operand.vmem [shape: f32[8,32], index: 6, kind: input, shape index: {}]   ;;  %s1521_s7 = inlined_call_operand.vmem [shape: f32[1,32], index: 7, kind: input, shape index: {}]   ;;  %s1522_s8 = inlined_call_operand.vmem [shape: f32[2,147,32], index: 8, kind: output, shape index: {}]  }
   0x1 LB: > { %s1109_s28 = sadd.s32 4294967295, %s1202_s27   ;;  %p1113_p0 = scmp.ge.s32.totalorder %s1202_s27, 1  ;;  %s1202_s27 = sphi %s1250_s27, %s18_s27  }
   0x2   : > { %p292_p1 = scmp.lt.s32.totalorder %s1202_s27, 3 }
   0x4   : > { %p293_p2 = pnand %p1113_p0, %p292_p1 }
   0x5   : > { %p341_p3 = scmp.lt.s32.totalorder (!%p293_p2), %s1109_s28, 1 }
   0x6   : > { %296 = sbr.rel (%p293_p2) target bundleno = 382 (0x17e), region = 52 }
   0xb   : > { %v1204_v0 = vmov 0   ;;  %s1524_s28 = smov (!%p341_p3, %s1109_s28), 1  ;;  %v406_v10 = vld [vmem:[%s1517_s3] sm:$0xff]  ;;  %vm407_vm0 = vcmask 64512   ;;  %v386_v18 = vld [vmem:[%s1515_s1 + $0x8] sm:$0xff]  ;;  %vm539_vm1 = vcmask 130048  }
   0xc   : > { %1193 = vset.pattern.permute.xlu1 %v1204_v0  ;;  %1192 = vset.pattern.permute.xlu0 %v1204_v0  ;;  %s1258_s29 = smul.u32 152, %s1524_s28  ;;  %v385_v32 = vld [vmem:[%s1515_s1] sm:$0xff]  ;;  %vm997_vm2 = vcmask 261120   ;;  %vm1016_vm3 = vcmask 256000  }
   0xd   : > { %1194 = vset.pattern.permute.xlu2 %v1204_v0  ;;  %480 = vmatpush.msra.mxu0 %v406_v10  ;;  %v823_v36 = vld [vmem:[%s1520_s6] sm:$0xff] }
   0xe   : > { %s1264_s10 = scalar_lea.vmem %s1519_s5, %s1258_s29  ;;  %s1278_s13 = scalar_lea.vmem %s1516_s2, %s1258_s29  ;;  %1178 = vmatpush.msra.mxu3 %v406_v10  ;;  %611 = vmatpush.msra.mxu1 %v386_v18 }
   0xf   : > { %v692_v1 = vld [vmem:[%s1264_s10 + $0x10] sm:$0xff]  ;;  %v690_v2 = vld [vmem:[%s1264_s10] sm:$0xff]  ;;  %v693_v4 = vld [vmem:[%s1264_s10 + $0x18] sm:$0xff]  ;;  %s1320_s20 = scalar_lea.vmem %s1514_s0, %s1258_s29  ;;  %896 = vmatpush.msra.mxu2 %v823_v36  ;;  %s1359_s28 = scalar_lea.vmem %s1518_s4, %s1258_s29 }
  0x10   : > { %721 = vperm.xlu1 %1193, %v692_v1   ;;  %711 = vperm.xlu0 %1192, %v690_v2   ;;  %v694_v3 = vld [vmem:[%s1264_s10 + $0x20] sm:$0xff]  ;;  %v691_v5 = vld [vmem:[%s1264_s10 + $0x8] sm:$0xff]  ;;  %v697_v7 = vld [vmem:[%s1264_s10 + $0x38] sm:$0xff]  ;;  %s1448_s12 = scalar_lea.vmem %s1522_s8, %s1258_s29 }
  0x11   : > { %731 = vperm.xlu2 %1194, %v694_v3   ;;  %v695_v6 = vld [vmem:[%s1264_s10 + $0x28] sm:$0xff]  ;;  %v696_v8 = vld [vmem:[%s1264_s10 + $0x30] sm:$0xff]  ;;  %v698_v9 = vld [vmem:[%s1264_s10 + $0x40] sm:$0xff]  ;;  %1179 = vmatpush.msrb.mxu3 %v386_v18 }
  0x12   : > { %v387_v11 = vld [vmem:[%s1278_s13] sm:$0xff]  ;;  %v402_v12 = vld [vmem:[%s1278_s13 + $0x78] sm:$0xff]  ;;  %v700_v13 = vld [vmem:[%s1264_s10 + $0x50] sm:$0xff]  ;;  %612 = vmatpush.msra.mxu1 %v385_v32 }
  0x13   : > { %1119 = vmatmul.msk.f32.vlgmr.msra.gmra.mxu0 %vm407_vm0, %v387_v11  ;;  %1134 = vmatmul.msk.f32.vlgmr.msra.gmra.mxu3 %vm407_vm0, %v402_v12  ;;  %v699_v14 = vld [vmem:[%s1264_s10 + $0x48] sm:$0xff]  ;;  %v701_v15 = vld [vmem:[%s1264_s10 + $0x58] sm:$0xff]  ;;  %v403_v17 = vld [vmem:[%s1278_s13 + $0x80] sm:$0xff] }
  0x14   : > { %v388_v16 = vld [vmem:[%s1278_s13 + $0x8] sm:$0xff]  ;;  %v702_v19 = vld [vmem:[%s1264_s10 + $0x60] sm:$0xff]  ;;  %v705_v20 = vld [vmem:[%s1264_s10 + $0x78] sm:$0xff]  ;;  %1180 = vmatpush.msrb.mxu3 %v385_v32 }
  0x15   : > { %v706_v21 = vld [vmem:[%s1264_s10 + $0x80] sm:$0xff]  ;;  %v389_v22 = vld [vmem:[%s1278_s13 + $0x10] sm:$0xff]  ;;  %v404_v23 = vld [vmem:[%s1278_s13 + $0x88] sm:$0xff] }
  0x16   : > { %v707_v24 = vld [vmem:[%s1264_s10 + $0x88] sm:$0xff]  ;;  %v704_v26 = vld [vmem:[%s1264_s10 + $0x70] sm:$0xff]  ;;  %v390_v27 = vld [vmem:[%s1278_s13 + $0x18] sm:$0xff]  ;;  %1181 = vmatpush.msra.mxu3 %v823_v36 }
  0x17   : > { %v703_v25 = vld [vmem:[%s1264_s10 + $0x68] sm:$0xff]  ;;  %v405_v28 = vld [vmem:[%s1278_s13 + $0x90] sm:$0x7]  ;;  %v391_v30 = vld [vmem:[%s1278_s13 + $0x20] sm:$0xff] }
  0x18   : > { %726 = vperm.xlu1 %1193, %v693_v4   ;;  %716 = vperm.xlu0 %1192, %v691_v5   ;;  %v708_v29 = vld [vmem:[%s1264_s10 + $0x90] sm:$0x7]  ;;  %v392_v31 = vld [vmem:[%s1278_s13 + $0x28] sm:$0xff]  ;;  %v394_v35 = vld [vmem:[%s1278_s13 + $0x38] sm:$0xff] }
  0x19   : > { %736 = vperm.xlu2 %1194, %v695_v6   ;;  %v380_v33 = vld [vmem:[%s1320_s20 + $0x70] sm:$0xff]  ;;  %v381_v37 = vld [vmem:[%s1320_s20 + $0x78] sm:$0xff]  ;;  %v366_v38 = vld [vmem:[%s1320_s20] sm:$0xff] }
  0x1a   : > { %v393_v34 = vld [vmem:[%s1278_s13 + $0x30] sm:$0xff]  ;;  %1138 = vmatmul.msk.f32.vlgmr.msra.gmra.mxu1 %vm539_vm1, %v366_v38  ;;  %v395_v39 = vld [vmem:[%s1278_s13 + $0x40] sm:$0xff]  ;;  %v367_v41 = vld [vmem:[%s1320_s20 + $0x8] sm:$0xff] }
  0x1b   : > { %1120 = vmatmul.msk.f32.gmra.mxu0 %vm407_vm0, %v388_v16  ;;  %1135 = vmatmul.msk.f32.gmra.mxu3 %vm407_vm0, %v403_v17  ;;  %v382_v40 = vld [vmem:[%s1320_s20 + $0x80] sm:$0xff]  ;;  %v396_v42 = vld [vmem:[%s1278_s13 + $0x48] sm:$0xff]  ;;  %v368_v44 = vld [vmem:[%s1320_s20 + $0x10] sm:$0xff] }
  0x1c   : > { %v383_v43 = vld [vmem:[%s1320_s20 + $0x88] sm:$0xff]  ;;  %v397_v45 = vld [vmem:[%s1278_s13 + $0x50] sm:$0xff]  ;;  %v369_v47 = vld [vmem:[%s1320_s20 + $0x18] sm:$0xff] }
  0x1d   : > { %v384_v46 = vld [vmem:[%s1320_s20 + $0x90] sm:$0x7]  ;;  %v671_v48 = vld [vmem:[%s1359_s28] sm:$0xff]  ;;  %v398_v52 = vld [vmem:[%s1278_s13 + $0x58] sm:$0xff] }
  0x1e   : > { %v370_v54 = vld [vmem:[%s1320_s20 + $0x20] sm:$0xff]  ;;  %v672_v55 = vld [vmem:[%s1359_s28 + $0x8] sm:$0xff]  ;;  %v673_v62 = vld [vmem:[%s1359_s28 + $0x10] sm:$0xff] }
  0x1f   : > { %v399_v58 = vld [vmem:[%s1278_s13 + $0x60] sm:$0xff]  ;;  %v371_v61 = vld [vmem:[%s1320_s20 + $0x28] sm:$0xff]  ;;  %v372_v3 = vld [vmem:[%s1320_s20 + $0x30] sm:$0xff] }
  0x20   : > { %746 = vperm.xlu1 %1193, %v697_v7   ;;  %741 = vperm.xlu0 %1192, %v696_v8   ;;  %v400_v2 = vld [vmem:[%s1278_s13 + $0x68] sm:$0xff]  ;;  %v674_v5 = vld [vmem:[%s1359_s28 + $0x18] sm:$0xff]  ;;  %v401_v6 = vld [vmem:[%s1278_s13 + $0x70] sm:$0xff] }
  0x21   : > { %751 = vperm.xlu2 %1194, %v698_v9   ;;  %v373_v10 = vld [vmem:[%s1320_s20 + $0x38] sm:$0xff]  ;;  %v675_v11 = vld [vmem:[%s1359_s28 + $0x20] sm:$0xff] }
  0x22   : > { %1139 = vmatmul.msk.f32.gmra.mxu1 %vm539_vm1, %v367_v41  ;;  %v374_v17 = vld [vmem:[%s1320_s20 + $0x40] sm:$0xff]  ;;  %v678_v32 = vld [vmem:[%s1359_s28 + $0x38] sm:$0xff]  ;;  %v680_v41 = vld [vmem:[%s1359_s28 + $0x48] sm:$0xff] }
  0x23   : > { %1121 = vmatmul.msk.f32.gmra.mxu0 %vm407_vm0, %v389_v22  ;;  %1136 = vmatmul.msk.f32.gmra.mxu3 %vm407_vm0, %v404_v23  ;;  %v679_v38 = vld [vmem:[%s1359_s28 + $0x40] sm:$0xff] }
  0x28   : > { %761 = vperm.xlu1 %1193, %v700_v13   ;;  %756 = vperm.xlu0 %1192, %v699_v14   ;;  %v686_v13 = vld [vmem:[%s1359_s28 + $0x78] sm:$0xff] }
  0x29   : > { %766 = vperm.xlu2 %1194, %v701_v15  }
  0x2a   : > { %1140 = vmatmul.msk.f32.gmra.mxu1 %vm539_vm1, %v368_v44 }
  0x2b   : > { %1122 = vmatmul.msk.f32.gmra.mxu0 %vm407_vm0, %v390_v27  ;;  %1137 = vmatmul.msk.f32.gmra.mxu3 %vm407_vm0, %v405_v28  ;;  %v688_v28 = vld [vmem:[%s1359_s28 + $0x88] sm:$0xff] }
  0x30   : > { %771 = vperm.xlu1 %1193, %v702_v19   ;;  %786 = vperm.xlu0 %1192, %v705_v20   ;;  %v676_v19 = vld [vmem:[%s1359_s28 + $0x28] sm:$0xff]  ;;  %v687_v20 = vld [vmem:[%s1359_s28 + $0x80] sm:$0xff] }
  0x31   : > { %791 = vperm.xlu2 %1194, %v706_v21  }
  0x32   : > { %1141 = vmatmul.msk.f32.gmra.mxu1 %vm539_vm1, %v369_v47  ;;  %v682_v47 = vld [vmem:[%s1359_s28 + $0x58] sm:$0xff] }
  0x33   : > { %1123 = vmatmul.msk.f32.gmra.mxu0 %vm407_vm0, %v391_v30  ;;  %1152 = vmatmul.msk.f32.vlgmr.msrb.gmra.mxu3 %vm539_vm1, %v380_v33 }
  0x38   : > { %796 = vperm.xlu1 %1193, %v707_v24   ;;  %776 = vperm.xlu0 %1192, %v703_v25   ;;  %v375_v24 = vld [vmem:[%s1320_s20 + $0x48] sm:$0xff] }
  0x39   : > { %781 = vperm.xlu2 %1194, %v704_v26   ;;  %v677_v26 = vld [vmem:[%s1359_s28 + $0x30] sm:$0xff] }
  0x3a   : > { %1142 = vmatmul.msk.f32.gmra.mxu1 %vm539_vm1, %v370_v54 }
  0x3b   : > { %1124 = vmatmul.msk.f32.gmra.mxu0 %vm407_vm0, %v392_v31  ;;  %1153 = vmatmul.msk.f32.gmra.mxu3 %vm539_vm1, %v381_v37  ;;  %v376_v31 = vld [vmem:[%s1320_s20 + $0x50] sm:$0xff]  ;;  %v377_v37 = vld [vmem:[%s1320_s20 + $0x58] sm:$0xff] }
  0x40   : > { %801 = vperm.xlu0 %1192, %v708_v29  }
  0x42   : > { %1143 = vmatmul.msk.f32.gmra.mxu1 %vm539_vm1, %v371_v61 }
  0x43   : > { %1125 = vmatmul.msk.f32.gmra.mxu0 %vm407_vm0, %v393_v34  ;;  %1154 = vmatmul.msk.f32.gmra.mxu3 %vm539_vm1, %v382_v40  ;;  %v689_v34 = vld [vmem:[%s1359_s28 + $0x90] sm:$0x7]  ;;  %v378_v40 = vld [vmem:[%s1320_s20 + $0x60] sm:$0xff] }
  0x4a   : > { %1144 = vmatmul.msk.f32.gmra.mxu1 %vm539_vm1, %v372_v3 }
  0x4b   : > { %1126 = vmatmul.msk.f32.gmra.mxu0 %vm407_vm0, %v394_v35  ;;  %1155 = vmatmul.msk.f32.gmra.mxu3 %vm539_vm1, %v383_v43  ;;  %v379_v43 = vld [vmem:[%s1320_s20 + $0x68] sm:$0xff] }
  0x52   : > { %1145 = vmatmul.msk.f32.gmra.mxu1 %vm539_vm1, %v373_v10 }
  0x53   : > { %1127 = vmatmul.msk.f32.gmra.mxu0 %vm407_vm0, %v395_v39  ;;  %1156 = vmatmul.msk.f32.gmra.mxu3 %vm539_vm1, %v384_v46 }
  0x5a   : > { %1146 = vmatmul.msk.f32.gmra.mxu1 %vm539_vm1, %v374_v17 }
  0x5b   : > { %1128 = vmatmul.msk.f32.gmra.mxu0 %vm407_vm0, %v396_v42 }
  0x62   : > { %1147 = vmatmul.msk.f32.gmra.mxu1 %vm539_vm1, %v375_v24 }
  0x63   : > { %1129 = vmatmul.msk.f32.gmra.mxu0 %vm407_vm0, %v397_v45  ;;  %v681_v45 = vld [vmem:[%s1359_s28 + $0x50] sm:$0xff] }
  0x6a   : > { %1148 = vmatmul.msk.f32.gmra.mxu1 %vm539_vm1, %v376_v31 }
  0x6b   : > { %v732_v49 = vpop.permute.xlu2 %731  ;;  %1130 = vmatmul.msk.f32.gmra.mxu0 %vm407_vm0, %v398_v52 }
  0x6c   : > { %v808_v14 = vmul.f32 %v732_v49, %v675_v11 }
  0x72   : > { %1149 = vmatmul.msk.f32.gmra.mxu1 %vm539_vm1, %v377_v37 }
  0x73   : > { %1131 = vmatmul.msk.f32.gmra.mxu0 %vm407_vm0, %v399_v58  ;;  %v737_v60 = vpop.permute.xlu2 %736 }
  0x74   : > { %v809_v22 = vmul.f32 %v737_v60, %v676_v19 }
  0x7a   : > { %1150 = vmatmul.msk.f32.gmra.mxu1 %vm539_vm1, %v378_v40 }
  0x7b   : > { %1132 = vmatmul.msk.f32.gmra.mxu0 %vm407_vm0, %v400_v2  ;;  %v752_v4 = vpop.permute.xlu2 %751 }
  0x7c   : > { %v812_v39 = vmul.f32 %v752_v4, %v679_v38 }
  0x82   : > { %v722_v50 = vpop.permute.xlu1 %721  ;;  %v712_v51 = vpop.permute.xlu0 %711  ;;  %1151 = vmatmul.msk.f32.gmra.mxu1 %vm539_vm1, %v379_v43 }
  0x83   : > { %v804_v53 = vmul.f32 %v712_v51, %v671_v48  ;;  %v806_v63 = vmul.f32 %v722_v50, %v673_v62  ;;  %1133 = vmatmul.msk.f32.gmra.mxu0 %vm407_vm0, %v401_v6  ;;  %v767_v12 = vpop.permute.xlu2 %766  ;;  %v683_v50 = vld [vmem:[%s1359_s28 + $0x60] sm:$0xff] }
  0x84   : > { %v815_v49 = vmul.f32 %v767_v12, %v682_v47  ;;  %v1442_v6 = vld [vmem:[%s1521_s7] ss:$0 sm:$0xff] }
  0x85   : > { %1157 = vmatmul.msk.f32.vlgmr.msra.gmra.mxu2 %vm407_vm0, %v804_v53 }
  0x8a   : > { %v727_v56 = vpop.permute.xlu1 %726  ;;  %v717_v57 = vpop.permute.xlu0 %716 }
  0x8b   : > { %v805_v59 = vmul.f32 %v717_v57, %v672_v55  ;;  %v807_v8 = vmul.f32 %v727_v56, %v674_v5  ;;  %v792_v21 = vpop.permute.xlu2 %791  ;;  %v684_v55 = vld [vmem:[%s1359_s28 + $0x68] sm:$0xff] }
  0x8c   : > { %v820_v23 = vmul.f32 %v792_v21, %v687_v20 }
  0x8d   : > { %1158 = vmatmul.msk.f32.gmra.mxu2 %vm407_vm0, %v805_v59  ;;  %v685_v59 = vld [vmem:[%s1359_s28 + $0x70] sm:$0xff] }
  0x90   : > { %v482_v53 = vpop.f32.mrf.mxu0 }
  0x92   : > { %v747_v0 = vpop.permute.xlu1 %746  ;;  %v742_v1 = vpop.permute.xlu0 %741 }
  0x93   : > { %v810_v29 = vmul.f32 %v742_v1, %v677_v26  ;;  %v811_v35 = vmul.f32 %v747_v0, %v678_v32  ;;  %v782_v58 = vpop.permute.xlu2 %781 }
  0x94   : > { %v818_v62 = vmul.f32 %v782_v58, %v685_v59 }
  0x95   : > { %1159 = vmatmul.msk.f32.gmra.mxu2 %vm407_vm0, %v806_v63 }
  0x96   : > { %v1418_v44 = vpop.f32.mrf.mxu3 }
  0x97   : > { %v614_v54 = vpop.f32.mrf.mxu1 }
  0x98   : > { %v485_v60 = vpop.f32.mrf.mxu0  ;;  %v615_v4 = vadd.f32 %v614_v54, %v482_v53 }
  0x9a   : > { %v757_v7 = vpop.permute.xlu0 %756  ;;  %v762_v9 = vpop.permute.xlu1 %761 }
  0x9b   : > { %v813_v42 = vmul.f32 %v757_v7, %v680_v41  ;;  %v814_v46 = vmul.f32 %v762_v9, %v681_v45 }
  0x9d   : > { %1160 = vmatmul.msk.f32.gmra.mxu2 %vm407_vm0, %v807_v8 }
  0x9e   : > { %v1424_v48 = vpop.f32.mrf.mxu3 }
  0x9f   : > { %v617_v61 = vpop.f32.mrf.mxu1 }
  0xa0   : > { %v488_v0 = vpop.f32.mrf.mxu0  ;;  %v618_v11 = vadd.f32 %v617_v61, %v485_v60 }
  0xa2   : > { %v787_v15 = vpop.permute.xlu0 %786  ;;  %v772_v18 = vpop.permute.xlu1 %771 }
  0xa3   : > { %v819_v16 = vmul.f32 %v787_v15, %v686_v13  ;;  %v816_v52 = vmul.f32 %v772_v18, %v683_v50 }
  0xa5   : > { %1161 = vmatmul.msk.f32.gmra.mxu2 %vm407_vm0, %v808_v14  ;;  %1172 = vmatmul.msk.f32.vlgmr.msra.gmra.mxu3 %vm407_vm0, %v819_v16 }
  0xa6   : > { %v1428_v51 = vpop.f32.mrf.mxu3 }
  0xa7   : > { %v620_v1 = vpop.f32.mrf.mxu1 }
  0xa8   : > { %v491_v3 = vpop.f32.mrf.mxu0  ;;  %v621_v18 = vadd.f32 %v620_v1, %v488_v0 }
  0xaa   : > { %v777_v25 = vpop.permute.xlu0 %776  ;;  %v797_v27 = vpop.permute.xlu1 %796 }
  0xab   : > { %v821_v30 = vmul.f32 %v797_v27, %v688_v28  ;;  %v817_v56 = vmul.f32 %v777_v25, %v684_v55 }
  0xad   : > { %1162 = vmatmul.msk.f32.gmra.mxu2 %vm407_vm0, %v809_v22  ;;  %1173 = vmatmul.msk.f32.gmra.mxu3 %vm407_vm0, %v820_v23 }
  0xae   : > { %v1432_v57 = vpop.f32.mrf.mxu3 }
  0xaf   : > { %v623_v5 = vpop.f32.mrf.mxu1 }
  0xb0   : > { %v494_v12 = vpop.f32.mrf.mxu0  ;;  %v624_v24 = vadd.f32 %v623_v5, %v491_v3 }
  0xb2   : > { %v802_v33 = vpop.permute.xlu0 %801 }
  0xb3   : > { %v822_v36 = vmul.f32 %v802_v33, %v689_v34 }
  0xb5   : > { %1163 = vmatmul.msk.f32.gmra.mxu2 %vm407_vm0, %v810_v29  ;;  %1174 = vmatmul.msk.f32.gmra.mxu3 %vm407_vm0, %v821_v30 }
  0xb6   : > { %v1437_v63 = vpop.f32.mrf.mxu3 }
  0xb7   : > { %v626_v13 = vpop.f32.mrf.mxu1 }
  0xb8   : > { %v497_v20 = vpop.f32.mrf.mxu0  ;;  %v627_v31 = vadd.f32 %v626_v13, %v494_v12 }
  0xbd   : > { %1164 = vmatmul.msk.f32.gmra.mxu2 %vm407_vm0, %v811_v35  ;;  %1175 = vmatmul.msk.f32.gmra.mxu3 %vm407_vm0, %v822_v36 }
  0xbe   : > { %v659_v2 = vpop.f32.mrf.mxu3 }
  0xbf   : > { %v629_v22 = vpop.f32.mrf.mxu1  ;;  %v660_v32 = vadd.f32 %v659_v2, %v1418_v44 }
  0xc0   : > { %v500_v28 = vpop.f32.mrf.mxu0  ;;  %v630_v40 = vadd.f32 %v629_v22, %v497_v20 }
  0xc5   : > { %1165 = vmatmul.msk.f32.gmra.mxu2 %vm407_vm0, %v812_v39 }
  0xc6   : > { %v662_v9 = vpop.f32.mrf.mxu3 }
  0xc7   : > { %v632_v30 = vpop.f32.mrf.mxu1 }
  0xc8   : > { %v503_v39 = vpop.f32.mrf.mxu0  ;;  %v633_v50 = vadd.f32 %v632_v30, %v500_v28 }
  0xcd   : > { %1166 = vmatmul.msk.f32.gmra.mxu2 %vm407_vm0, %v813_v42  ;;  %v663_v42 = vadd.f32 %v662_v9, %v1424_v48 }
  0xce   : > { %v665_v17 = vpop.f32.mrf.mxu3 }
  0xcf   : > { %v635_v41 = vpop.f32.mrf.mxu1  ;;  %v666_v53 = vadd.f32 %v665_v17, %v1428_v51 }
  0xd0   : > { %v636_v61 = vadd.f32 %v635_v41, %v503_v39 }
  0xd5   : > { %1167 = vmatmul.msk.f32.gmra.mxu2 %vm407_vm0, %v814_v46 }
  0xd6   : > { %v668_v25 = vpop.f32.mrf.mxu3 }
  0xd7   : > { %v638_v54 = vpop.f32.mrf.mxu1 }
  0xdd   : > { %1168 = vmatmul.msk.f32.gmra.mxu2 %vm407_vm0, %v815_v49 }
  0xe5   : > { %1169 = vmatmul.msk.f32.gmra.mxu2 %vm407_vm0, %v816_v52  ;;  %v506_v52 = vpop.f32.mrf.mxu0 }
  0xed   : > { %1170 = vmatmul.msk.f32.gmra.mxu2 %vm407_vm0, %v817_v56  ;;  %v509_v1 = vpop.f32.mrf.mxu0 }
  0xf5   : > { %1171 = vmatmul.msk.f32.gmra.mxu2 %vm407_vm0, %v818_v62  ;;  %v669_v62 = vadd.f32 %v668_v25, %v1432_v57  ;;  %v512_v57 = vpop.f32.mrf.mxu0 }
  0xfd   : > { %v515_v17 = vpop.f32.mrf.mxu0 }
 0x108   : > { %v898_v7 = vpop.f32.mrf.mxu2 }
 0x109   : > { %v955_v8 = vadd.f32 %v898_v7, %v615_v4  ;;  %v641_v4 = vpop.f32.mrf.mxu1 }
 0x10a   : > { %v642_v13 = vadd.f32 %v641_v4, %v509_v1 }
 0x10b   : > { %v978_v10 = vadd.f32 %v1442_v6, %v955_v8  ;;  %v639_v8 = vadd.f32 %v638_v54, %v506_v52 }
 0x10d   : > { %998 = vst.msk [vmem:[%s1448_s12] sm:$0xff] %vm997_vm2, %v978_v10 }
 0x110   : > { %v901_v14 = vpop.f32.mrf.mxu2 }
 0x111   : > { %v956_v15 = vadd.f32 %v901_v14, %v618_v11  ;;  %v644_v12 = vpop.f32.mrf.mxu1 }
 0x113   : > { %v979_v16 = vadd.f32 %v1442_v6, %v956_v15 }
 0x115   : > { %999 = vst.msk [vmem:[%s1448_s12 + $0x8] sm:$0xff] %vm997_vm2, %v979_v16 }
 0x118   : > { %v904_v19 = vpop.f32.mrf.mxu2 }
 0x119   : > { %v957_v21 = vadd.f32 %v904_v19, %v621_v18  ;;  %v645_v18 = vadd.f32 %v644_v12, %v512_v57  ;;  %v647_v19 = vpop.f32.mrf.mxu1 }
 0x11b   : > { %v980_v23 = vadd.f32 %v1442_v6, %v957_v21 }
 0x11d   : > { %1000 = vst.msk [vmem:[%s1448_s12 + $0x10] sm:$0xff] %vm997_vm2, %v980_v23  ;;  %v648_v23 = vadd.f32 %v647_v19, %v515_v17 }
 0x120   : > { %v907_v26 = vpop.f32.mrf.mxu2 }
 0x121   : > { %v958_v27 = vadd.f32 %v907_v26, %v624_v24  ;;  %v518_v24 = vpop.f32.mrf.mxu0  ;;  %v650_v26 = vpop.f32.mrf.mxu1 }
 0x123   : > { %v981_v29 = vadd.f32 %v1442_v6, %v958_v27 }
 0x125   : > { %1001 = vst.msk [vmem:[%s1448_s12 + $0x18] sm:$0xff] %vm997_vm2, %v981_v29  ;;  %v651_v29 = vadd.f32 %v650_v26, %v518_v24 }
 0x128   : > { %v910_v33 = vpop.f32.mrf.mxu2  ;;  %v943_v34 = vpop.f32.mrf.mxu3 }
 0x129   : > { %v959_v35 = vadd.f32 %v910_v33, %v627_v31  ;;  %v970_v36 = vadd.f32 %v943_v34, %v660_v32  ;;  %v521_v32 = vpop.f32.mrf.mxu0  ;;  %v653_v33 = vpop.f32.mrf.mxu1 }
 0x12b   : > { %v982_v37 = vadd.f32 %v1442_v6, %v959_v35  ;;  %v993_v38 = vadd.f32 %v1442_v6, %v970_v36  ;;  %v654_v35 = vadd.f32 %v653_v33, %v521_v32 }
 0x12d   : > { %1002 = vst.msk [vmem:[%s1448_s12 + $0x20] sm:$0xff] %vm997_vm2, %v982_v37 }
 0x12e   : > { %1013 = vst.msk [vmem:[%s1448_s12 + $0x78] sm:$0xff] %vm997_vm2, %v993_v38 }
 0x130   : > { %v913_v43 = vpop.f32.mrf.mxu2  ;;  %v946_v44 = vpop.f32.mrf.mxu3 }
 0x131   : > { %v960_v45 = vadd.f32 %v913_v43, %v630_v40  ;;  %v971_v46 = vadd.f32 %v946_v44, %v663_v42  ;;  %v524_v39 = vpop.f32.mrf.mxu0 }
 0x132   : > { %v657_v40 = vadd.f32 %v1437_v63, %v524_v39 }
 0x133   : > { %v983_v47 = vadd.f32 %v1442_v6, %v960_v45  ;;  %v994_v49 = vadd.f32 %v1442_v6, %v971_v46 }
 0x135   : > { %1003 = vst.msk [vmem:[%s1448_s12 + $0x28] sm:$0xff] %vm997_vm2, %v983_v47 }
 0x136   : > { %1014 = vst.msk [vmem:[%s1448_s12 + $0x80] sm:$0xff] %vm997_vm2, %v994_v49 }
 0x138   : > { %v916_v48 = vpop.f32.mrf.mxu2  ;;  %v949_v55 = vpop.f32.mrf.mxu3 }
 0x139   : > { %v961_v56 = vadd.f32 %v916_v48, %v633_v50  ;;  %v972_v58 = vadd.f32 %v949_v55, %v666_v53 }
 0x13b   : > { %v984_v59 = vadd.f32 %v1442_v6, %v961_v56  ;;  %v995_v60 = vadd.f32 %v1442_v6, %v972_v58 }
 0x13d   : > { %1004 = vst.msk [vmem:[%s1448_s12 + $0x30] sm:$0xff] %vm997_vm2, %v984_v59 }
 0x13e   : > { %1015 = vst.msk [vmem:[%s1448_s12 + $0x88] sm:$0xff] %vm997_vm2, %v995_v60 }
 0x140   : > { %v919_v0 = vpop.f32.mrf.mxu2  ;;  %v952_v51 = vpop.f32.mrf.mxu3 }
 0x141   : > { %v962_v2 = vadd.f32 %v919_v0, %v636_v61  ;;  %v973_v3 = vadd.f32 %v952_v51, %v669_v62 }
 0x143   : > { %v985_v5 = vadd.f32 %v1442_v6, %v962_v2  ;;  %v996_v7 = vadd.f32 %v1442_v6, %v973_v3 }
 0x145   : > { %1005 = vst.msk [vmem:[%s1448_s12 + $0x38] sm:$0xff] %vm997_vm2, %v985_v5 }
 0x146   : > { %1017 = vst.msk [vmem:[%s1448_s12 + $0x90] sm:$0x7] %vm1016_vm3, %v996_v7 }
 0x148   : > { %v922_v9 = vpop.f32.mrf.mxu2 }
 0x149   : > { %v963_v10 = vadd.f32 %v922_v9, %v639_v8 }
 0x14b   : > { %v986_v11 = vadd.f32 %v1442_v6, %v963_v10 }
 0x14d   : > { %1006 = vst.msk [vmem:[%s1448_s12 + $0x40] sm:$0xff] %vm997_vm2, %v986_v11 }
 0x150   : > { %v925_v14 = vpop.f32.mrf.mxu2 }
 0x151   : > { %v964_v15 = vadd.f32 %v925_v14, %v642_v13 }
 0x153   : > { %v987_v16 = vadd.f32 %v1442_v6, %v964_v15 }
 0x155   : > { %1007 = vst.msk [vmem:[%s1448_s12 + $0x48] sm:$0xff] %vm997_vm2, %v987_v16 }
 0x158   : > { %v928_v20 = vpop.f32.mrf.mxu2 }
 0x159   : > { %v965_v21 = vadd.f32 %v928_v20, %v645_v18 }
 0x15b   : > { %v988_v22 = vadd.f32 %v1442_v6, %v965_v21 }
 0x15d   : > { %1008 = vst.msk [vmem:[%s1448_s12 + $0x50] sm:$0xff] %vm997_vm2, %v988_v22 }
 0x160   : > { %v931_v25 = vpop.f32.mrf.mxu2 }
 0x161   : > { %v966_v27 = vadd.f32 %v931_v25, %v648_v23 }
 0x163   : > { %v989_v28 = vadd.f32 %v1442_v6, %v966_v27 }
 0x165   : > { %1009 = vst.msk [vmem:[%s1448_s12 + $0x58] sm:$0xff] %vm997_vm2, %v989_v28 }
 0x168   : > { %v934_v30 = vpop.f32.mrf.mxu2 }
 0x169   : > { %v967_v31 = vadd.f32 %v934_v30, %v651_v29 }
 0x16b   : > { %v990_v34 = vadd.f32 %v1442_v6, %v967_v31 }
 0x16d   : > { %1010 = vst.msk [vmem:[%s1448_s12 + $0x60] sm:$0xff] %vm997_vm2, %v990_v34 }
 0x170   : > { %v937_v36 = vpop.f32.mrf.mxu2 }
 0x171   : > { %v968_v37 = vadd.f32 %v937_v36, %v654_v35 }
 0x173   : > { %v991_v38 = vadd.f32 %v1442_v6, %v968_v37 }
 0x175   : > { %1011 = vst.msk [vmem:[%s1448_s12 + $0x68] sm:$0xff] %vm997_vm2, %v991_v38 }
 0x178   : > { %v940_v41 = vpop.f32.mrf.mxu2 }
 0x179   : > { %v969_v42 = vadd.f32 %v940_v41, %v657_v40 }
 0x17b   : > { %v992_v43 = vadd.f32 %v1442_v6, %v969_v42 }
 0x17d   : > { %1012 = vst.msk [vmem:[%s1448_s12 + $0x70] sm:$0xff] %vm997_vm2, %v992_v43 }
 0x17e PF: > { %s18_s27 = sadd.s32 1, %s1202_s27  }
 0x17f   : > { %p15_p4 = scmp.ge.s32.totalorder %s18_s27, 4  }
 0x181   :  { %17 = sbr.rel (!%p15_p4) target bundleno = 1 (0x1), region = 91 }

// kernel: scene_graph_forward.6
= control target key start
LH: loop header
LB: loop body
LE: loop exit
PB: predicated region body
PF: predicated region fallthrough
CT: control target
= control target key end

     0   :  { %s4210_s25 = smov 0   ;;  %s5707_s0 = inlined_call_operand.vmem [shape: f32[2,441,32], index: 0, kind: input, shape index: {}]   ;;  %s5708_s1 = inlined_call_operand.vmem [shape: f32[32,32], index: 1, kind: input, shape index: {}]   ;;  %s5709_s2 = inlined_call_operand.vmem [shape: f32[2,441,32], index: 2, kind: input, shape index: {}]   ;;  %s5710_s3 = inlined_call_operand.vmem [shape: f32[32,32], index: 3, kind: input, shape index: {}]   ;;  %s5711_s4 = inlined_call_operand.vmem [shape: f32[2,441,8], index: 4, kind: input, shape index: {}]   ;;  %s5712_s5 = inlined_call_operand.vmem [shape: f32[8,32], index: 5, kind: input, shape index: {}]   ;;  %s5713_s6 = inlined_call_operand.vmem [shape: f32[2,441,8], index: 6, kind: input, shape index: {}]   ;;  %s5714_s7 = inlined_call_operand.vmem [shape: f32[2,441,1], index: 7, kind: input, shape index: {}]   ;;  %s5715_s8 = inlined_call_operand.vmem [shape: f32[8,32], index: 8, kind: input, shape index: {}]   ;;  %s5716_s9 = inlined_call_operand.vmem [shape: f32[2,441,8], index: 9, kind: input, shape index: {}]   ;;  %s5717_s10 = inlined_call_operand.vmem [shape: f32[2,441,1], index: 10, kind: input, shape index: {}]   ;;  %s5718_s11 = inlined_call_operand.vmem [shape: f32[8,32], index: 11, kind: input, shape index: {}]   ;;  %s5719_s12 = inlined_call_operand.vmem [shape: f32[1,32], index: 12, kind: input, shape index: {}]   ;;  %s5720_s13 = inlined_call_operand.vmem [shape: f32[2,441,32], index: 13, kind: output, shape index: {}]  }
   0x1 LB: > { %s3815_s26 = sadd.s32 4294967295, %s4137_s25   ;;  %p3819_p0 = scmp.ge.s32.totalorder %s4137_s25, 1  ;;  %s4137_s25 = sphi %s4210_s25, %s23_s25  }
   0x2   : > { %p447_p1 = scmp.lt.s32.totalorder %s4137_s25, 3 }
   0x4   : > { %p448_p2 = pnand %p3819_p0, %p447_p1 }
   0x6   : > { %451 = sbr.rel (%p448_p2) target bundleno = 737 (0x2e1), region = 72 }
   0xb   : > { %v680_v0 = vld [vmem:[%s5710_s3 + $0x18] sm:$0xff]  ;;  %v679_v1 = vld [vmem:[%s5710_s3 + $0x10] sm:$0xff]  ;;  %p521_p3 = scmp.lt.s32.totalorder %s3815_s26, 1  ;;  %v1444_v2 = vld [vmem:[%s5712_s5] sm:$0xff]  ;;  %v4139_v4 = vmov 0   ;;  %vm681_vm0 = vcmask 261120  }
   0xc   : > { %862 = vmatpush.msra.mxu0 %v680_v0  ;;  %4110 = vmatpush.msra.mxu1 %v680_v0  ;;  %v678_v3 = vld [vmem:[%s5710_s3 + $0x8] sm:$0xff]  ;;  %v2303_v5 = vld [vmem:[%s5715_s8] sm:$0xff]  ;;  %vm1445_vm1 = vcmask 64512   ;;  %v620_v22 = vld [vmem:[%s5708_s1 + $0x18] sm:$0xff]  ;;  %vm3686_vm2 = vcmask 253952  }
   0xd   : > { %4128 = vset.pattern.permute.xlu2 %v4139_v4  ;;  %4127 = vset.pattern.permute.xlu1 %v4139_v4  ;;  %s5966_s26 = smov (!%p521_p3, %s3815_s26), 1  ;;  %v677_v6 = vld [vmem:[%s5710_s3] sm:$0xff]  ;;  %v619_v43 = vld [vmem:[%s5708_s1 + $0x10] sm:$0xff] }
   0xe   : > { %863 = vmatpush.msra.mxu0 %v679_v1  ;;  %4111 = vmatpush.msra.mxu1 %v679_v1  ;;  %s4236_s22 = smul.u32 448, %s5966_s26  ;;  %v3161_v7 = vld [vmem:[%s5718_s11] sm:$0xff] }
   0xf   : > { %4126 = vset.pattern.permute.xlu0 %v4139_v4  ;;  %4115 = vmatpush.msra.mxu3 %v1444_v2 }
  0x10   : > { %864 = vmatpush.msra.mxu0 %v678_v3  ;;  %4112 = vmatpush.msra.mxu1 %v678_v3  ;;  %s4242_s27 = scalar_lea.vmem %s5714_s7, %s4236_s22  ;;  %s4248_s30 = scalar_lea.vmem %s5709_s2, %s4236_s22  ;;  %v617_v3 = vld [vmem:[%s5708_s1] sm:$0xff] }
  0x11   : > { %2487 = vmatpush.msrb.mxu3 %v2303_v5  ;;  %4114 = vmatpush.msra.mxu2 %v1444_v2  ;;  %v1915_v8 = vld [vmem:[%s4242_s27 + $0x20] sm:$0xff]  ;;  %v1913_v9 = vld [vmem:[%s4242_s27 + $0x10] sm:$0xff]  ;;  %s4260_s17 = scalar_lea.vmem %s5711_s4, %s4236_s22  ;;  %v1916_v14 = vld [vmem:[%s4242_s27 + $0x28] sm:$0xff]  ;;  %s4297_s23 = scalar_lea.vmem %s5717_s10, %s4236_s22 }
  0x12   : > { %865 = vmatpush.msra.mxu0 %v677_v6  ;;  %4113 = vmatpush.msra.mxu1 %v677_v6  ;;  %v1911_v10 = vld [vmem:[%s4242_s27] sm:$0xff]  ;;  %v1429_v13 = vld [vmem:[%s4260_s17 + $0x148] sm:$0xff]  ;;  %v1914_v15 = vld [vmem:[%s4242_s27 + $0x18] sm:$0xff]  ;;  %s4412_s19 = scalar_lea.vmem %s5707_s0, %s4236_s22  ;;  %s4448_s24 = scalar_lea.vmem %s5713_s6, %s4236_s22 }
  0x13   : > { %1989 = vperm.xlu2 %4128, %v1915_v8   ;;  %1979 = vperm.xlu1 %4127, %v1913_v9   ;;  %v621_v11 = vld [vmem:[%s4248_s30] sm:$0xff]  ;;  %v1414_v16 = vld [vmem:[%s4260_s17 + $0xd0] sm:$0xff]  ;;  %v1912_v17 = vld [vmem:[%s4242_s27 + $0x8] sm:$0xff]  ;;  %s4497_s26 = scalar_lea.vmem %s5716_s9, %s4236_s22  ;;  %s5268_s15 = scalar_lea.vmem %s5720_s13, %s4236_s22 }
  0x14   : > { %v665_v12 = vld [vmem:[%s4248_s30 + $0x160] sm:$0xff]  ;;  %1969 = vperm.xlu0 %4126, %v1911_v10   ;;  %3828 = vmatmul.msk.f32.vlgmr.msra.gmra.mxu0 %vm681_vm0, %v621_v11  ;;  %v622_v18 = vld [vmem:[%s4248_s30 + $0x8] sm:$0xff]  ;;  %v1430_v20 = vld [vmem:[%s4260_s17 + $0x150] sm:$0xff] }
  0x15   : > { %3872 = vmatmul.msk.f32.vlgmr.msra.gmra.mxu1 %vm681_vm0, %v665_v12  ;;  %3981 = vmatmul.msk.f32.vlgmr.msra.gmra.mxu3 %vm1445_vm1, %v1429_v13  ;;  %v666_v19 = vld [vmem:[%s4248_s30 + $0x168] sm:$0xff]  ;;  %v1415_v21 = vld [vmem:[%s4260_s17 + $0xd8] sm:$0xff]  ;;  %v1919_v23 = vld [vmem:[%s4242_s27 + $0x40] sm:$0xff] }
  0x16   : > { %3345 = vmatpush.msrb.mxu2 %v3161_v7  ;;  %1629 = vmatpush.msrb.mxu0 %v1444_v2  ;;  %v1918_v24 = vld [vmem:[%s4242_s27 + $0x38] sm:$0xff]  ;;  %v1917_v25 = vld [vmem:[%s4242_s27 + $0x30] sm:$0xff]  ;;  %v1416_v29 = vld [vmem:[%s4260_s17 + $0xe0] sm:$0xff] }
  0x17   : > { %3966 = vmatmul.msk.f32.vlgmr.msra.gmra.mxu2 %vm1445_vm1, %v1414_v16  ;;  %1215 = vmatpush.msrb.mxu1 %v620_v22  ;;  %v623_v26 = vld [vmem:[%s4248_s30 + $0x10] sm:$0xff]  ;;  %v1431_v28 = vld [vmem:[%s4260_s17 + $0x158] sm:$0xff]  ;;  %v2770_v30 = vld [vmem:[%s4297_s23 + $0x8] sm:$0xff] }
  0x18   : > { %v667_v27 = vld [vmem:[%s4248_s30 + $0x170] sm:$0xff]  ;;  %v2769_v31 = vld [vmem:[%s4297_s23] sm:$0xff]  ;;  %v1920_v32 = vld [vmem:[%s4242_s27 + $0x48] sm:$0xff] }
  0x19   : > { %v624_v33 = vld [vmem:[%s4248_s30 + $0x18] sm:$0xff]  ;;  %v1432_v35 = vld [vmem:[%s4260_s17 + $0x160] sm:$0xff]  ;;  %v1417_v36 = vld [vmem:[%s4260_s17 + $0xe8] sm:$0xff]  ;;  %1216 = vmatpush.msrb.mxu1 %v619_v43 }
  0x1a   : > { %v668_v34 = vld [vmem:[%s4248_s30 + $0x178] sm:$0xff]  ;;  %v1921_v38 = vld [vmem:[%s4242_s27 + $0x50] sm:$0xff]  ;;  %v625_v40 = vld [vmem:[%s4248_s30 + $0x20] sm:$0xff] }
  0x1b   : > { %1994 = vperm.xlu2 %4128, %v1916_v14   ;;  %1984 = vperm.xlu1 %4127, %v1914_v15   ;;  %v2772_v37 = vld [vmem:[%s4297_s23 + $0x18] sm:$0xff]  ;;  %v2771_v39 = vld [vmem:[%s4297_s23 + $0x10] sm:$0xff]  ;;  %v669_v41 = vld [vmem:[%s4248_s30 + $0x180] sm:$0xff] }
  0x1c   : > { %1974 = vperm.xlu0 %4126, %v1912_v17   ;;  %3829 = vmatmul.msk.f32.gmra.mxu0 %vm681_vm0, %v622_v18  ;;  %v1433_v42 = vld [vmem:[%s4260_s17 + $0x168] sm:$0xff]  ;;  %v1418_v44 = vld [vmem:[%s4260_s17 + $0xf0] sm:$0xff]  ;;  %v1922_v45 = vld [vmem:[%s4242_s27 + $0x58] sm:$0xff] }
  0x1d   : > { %3873 = vmatmul.msk.f32.gmra.mxu1 %vm681_vm0, %v666_v19  ;;  %3982 = vmatmul.msk.f32.gmra.mxu3 %vm1445_vm1, %v1430_v20  ;;  %v2774_v46 = vld [vmem:[%s4297_s23 + $0x28] sm:$0xff]  ;;  %v2773_v47 = vld [vmem:[%s4297_s23 + $0x20] sm:$0xff]  ;;  %v1434_v50 = vld [vmem:[%s4260_s17 + $0x170] sm:$0xff] }
  0x1e   : > { %v626_v48 = vld [vmem:[%s4248_s30 + $0x28] sm:$0xff]  ;;  %v1419_v51 = vld [vmem:[%s4260_s17 + $0xf8] sm:$0xff]  ;;  %v2777_v52 = vld [vmem:[%s4297_s23 + $0x40] sm:$0xff] }
  0x1f   : > { %3967 = vmatmul.msk.f32.gmra.mxu2 %vm1445_vm1, %v1415_v21  ;;  %v670_v49 = vld [vmem:[%s4248_s30 + $0x188] sm:$0xff]  ;;  %v2776_v53 = vld [vmem:[%s4297_s23 + $0x38] sm:$0xff]  ;;  %v2775_v54 = vld [vmem:[%s4297_s23 + $0x30] sm:$0xff] }
  0x20   : > { %v627_v55 = vld [vmem:[%s4248_s30 + $0x30] sm:$0xff]  ;;  %v1435_v57 = vld [vmem:[%s4260_s17 + $0x178] sm:$0xff]  ;;  %v1420_v58 = vld [vmem:[%s4260_s17 + $0x100] sm:$0xff] }
  0x21   : > { %v671_v56 = vld [vmem:[%s4248_s30 + $0x190] sm:$0xff]  ;;  %v2778_v60 = vld [vmem:[%s4297_s23 + $0x48] sm:$0xff]  ;;  %v1923_v61 = vld [vmem:[%s4242_s27 + $0x60] sm:$0xff] }
  0x22   : > { %v2779_v59 = vld [vmem:[%s4297_s23 + $0x50] sm:$0xff]  ;;  %v628_v62 = vld [vmem:[%s4248_s30 + $0x38] sm:$0xff]  ;;  %v1436_v0 = vld [vmem:[%s4260_s17 + $0x180] sm:$0xff] }
  0x23   : > { %2009 = vperm.xlu2 %4128, %v1919_v23   ;;  %2004 = vperm.xlu1 %4127, %v1918_v24   ;;  %v672_v63 = vld [vmem:[%s4248_s30 + $0x198] sm:$0xff]  ;;  %v1421_v1 = vld [vmem:[%s4260_s17 + $0x108] sm:$0xff]  ;;  %v2781_v4 = vld [vmem:[%s4297_s23 + $0x60] sm:$0xff] }
  0x24   : > { %1999 = vperm.xlu0 %4126, %v1917_v25   ;;  %3830 = vmatmul.msk.f32.gmra.mxu0 %vm681_vm0, %v623_v26  ;;  %v618_v2 = vld [vmem:[%s5708_s1 + $0x8] sm:$0xff]  ;;  %v2780_v6 = vld [vmem:[%s4297_s23 + $0x58] sm:$0xff]  ;;  %v629_v7 = vld [vmem:[%s4248_s30 + $0x40] sm:$0xff] }
  0x25   : > { %3874 = vmatmul.msk.f32.gmra.mxu1 %vm681_vm0, %v667_v27  ;;  %3983 = vmatmul.msk.f32.gmra.mxu3 %vm1445_vm1, %v1431_v28  ;;  %v1924_v5 = vld [vmem:[%s4242_s27 + $0x68] sm:$0xff]  ;;  %v673_v8 = vld [vmem:[%s4248_s30 + $0x1a0] sm:$0xff]  ;;  %v1422_v10 = vld [vmem:[%s4260_s17 + $0x110] sm:$0xff] }
  0x26   : > { %1217 = vmatpush.msrb.mxu1 %v618_v2  ;;  %v1437_v9 = vld [vmem:[%s4260_s17 + $0x188] sm:$0xff]  ;;  %v2783_v11 = vld [vmem:[%s4297_s23 + $0x70] sm:$0xff]  ;;  %v1423_v17 = vld [vmem:[%s4260_s17 + $0x118] sm:$0xff] }
  0x27   : > { %3968 = vmatmul.msk.f32.gmra.mxu2 %vm1445_vm1, %v1416_v29  ;;  %v1925_v12 = vld [vmem:[%s4242_s27 + $0x70] sm:$0xff]  ;;  %v2782_v13 = vld [vmem:[%s4297_s23 + $0x68] sm:$0xff]  ;;  %v1927_v18 = vld [vmem:[%s4242_s27 + $0x80] sm:$0xff] }
  0x28   : > { %1218 = vmatpush.msrb.mxu1 %v617_v3  ;;  %v630_v14 = vld [vmem:[%s4248_s30 + $0x48] sm:$0xff]  ;;  %v1438_v16 = vld [vmem:[%s4260_s17 + $0x190] sm:$0xff]  ;;  %v2784_v19 = vld [vmem:[%s4297_s23 + $0x78] sm:$0xff] }
  0x29   : > { %v674_v15 = vld [vmem:[%s4248_s30 + $0x1a8] sm:$0xff]  ;;  %v1926_v20 = vld [vmem:[%s4242_s27 + $0x78] sm:$0xff]  ;;  %v631_v21 = vld [vmem:[%s4248_s30 + $0x50] sm:$0xff] }
  0x2a   : > { %v675_v22 = vld [vmem:[%s4248_s30 + $0x1b0] sm:$0xff]  ;;  %v1439_v23 = vld [vmem:[%s4260_s17 + $0x198] sm:$0xff]  ;;  %v1424_v24 = vld [vmem:[%s4260_s17 + $0x120] sm:$0xff] }
  0x2b   : > { %2832 = vperm.xlu2 %4128, %v2770_v30   ;;  %2827 = vperm.xlu1 %4127, %v2769_v31   ;;  %v2786_v25 = vld [vmem:[%s4297_s23 + $0x88] sm:$0xff]  ;;  %v2785_v27 = vld [vmem:[%s4297_s23 + $0x80] sm:$0xff]  ;;  %v632_v28 = vld [vmem:[%s4248_s30 + $0x58] sm:$0xff] }
  0x2c   : > { %2014 = vperm.xlu0 %4126, %v1920_v32   ;;  %3831 = vmatmul.msk.f32.gmra.mxu0 %vm681_vm0, %v624_v33  ;;  %v1928_v26 = vld [vmem:[%s4242_s27 + $0x88] sm:$0xff]  ;;  %v676_v29 = vld [vmem:[%s4248_s30 + $0x1b8] sm:$0x1]  ;;  %v1440_v30 = vld [vmem:[%s4260_s17 + $0x1a0] sm:$0xff] }
  0x2d   : > { %3875 = vmatmul.msk.f32.gmra.mxu1 %vm681_vm0, %v668_v34  ;;  %3984 = vmatmul.msk.f32.gmra.mxu3 %vm1445_vm1, %v1432_v35  ;;  %v1425_v31 = vld [vmem:[%s4260_s17 + $0x128] sm:$0xff]  ;;  %v1930_v32 = vld [vmem:[%s4242_s27 + $0x98] sm:$0xff]  ;;  %v2787_v33 = vld [vmem:[%s4297_s23 + $0x90] sm:$0xff] }
  0x2e   : > { %v1929_v34 = vld [vmem:[%s4242_s27 + $0x90] sm:$0xff]  ;;  %v633_v35 = vld [vmem:[%s4248_s30 + $0x60] sm:$0xff]  ;;  %v562_v43 = vld [vmem:[%s4412_s19 + $0x8] sm:$0xff] }
  0x2f   : > { %3969 = vmatmul.msk.f32.gmra.mxu2 %vm1445_vm1, %v1417_v36  ;;  %v561_v36 = vld [vmem:[%s4412_s19] sm:$0xff]  ;;  %v1936_v2 = vld [vmem:[%s4242_s27 + $0xc8] sm:$0xff] }
  0x30   : > { %v2793_v3 = vld [vmem:[%s4297_s23 + $0xc0] sm:$0xff] }
  0x33   : > { %2842 = vperm.xlu2 %4128, %v2772_v37   ;;  %2019 = vperm.xlu1 %4127, %v1921_v38   ;;  %v1441_v37 = vld [vmem:[%s4260_s17 + $0x1a8] sm:$0xff]  ;;  %v1426_v38 = vld [vmem:[%s4260_s17 + $0x130] sm:$0xff] }
  0x34   : > { %2837 = vperm.xlu0 %4126, %v2771_v39   ;;  %3832 = vmatmul.msk.f32.gmra.mxu0 %vm681_vm0, %v625_v40  ;;  %v2789_v39 = vld [vmem:[%s4297_s23 + $0xa0] sm:$0xff] }
  0x35   : > { %3876 = vmatmul.msk.f32.gmra.mxu1 %vm681_vm0, %v669_v41  ;;  %3985 = vmatmul.msk.f32.gmra.mxu3 %vm1445_vm1, %v1433_v42  ;;  %v1931_v40 = vld [vmem:[%s4242_s27 + $0xa0] sm:$0xff]  ;;  %v2788_v41 = vld [vmem:[%s4297_s23 + $0x98] sm:$0xff]  ;;  %v634_v42 = vld [vmem:[%s4248_s30 + $0x68] sm:$0xff] }
  0x37   : > { %3970 = vmatmul.msk.f32.gmra.mxu2 %vm1445_vm1, %v1418_v44  ;;  %v1442_v44 = vld [vmem:[%s4260_s17 + $0x1b0] sm:$0xff] }
  0x3b   : > { %2024 = vperm.xlu2 %4128, %v1922_v45   ;;  %2852 = vperm.xlu1 %4127, %v2774_v46   ;;  %v1427_v45 = vld [vmem:[%s4260_s17 + $0x138] sm:$0xff]  ;;  %v1933_v46 = vld [vmem:[%s4242_s27 + $0xb0] sm:$0xff] }
  0x3c   : > { %2847 = vperm.xlu0 %4126, %v2773_v47   ;;  %3833 = vmatmul.msk.f32.gmra.mxu0 %vm681_vm0, %v626_v48  ;;  %v2790_v47 = vld [vmem:[%s4297_s23 + $0xa8] sm:$0xff] }
  0x3d   : > { %3877 = vmatmul.msk.f32.gmra.mxu1 %vm681_vm0, %v670_v49  ;;  %3986 = vmatmul.msk.f32.gmra.mxu3 %vm1445_vm1, %v1434_v50  ;;  %v1932_v48 = vld [vmem:[%s4242_s27 + $0xa8] sm:$0xff]  ;;  %v635_v49 = vld [vmem:[%s4248_s30 + $0x70] sm:$0xff] }
  0x3e   : > { %v563_v50 = vld [vmem:[%s4412_s19 + $0x10] sm:$0xff] }
  0x3f   : > { %3971 = vmatmul.msk.f32.gmra.mxu2 %vm1445_vm1, %v1419_v51  ;;  %v1443_v51 = vld [vmem:[%s4260_s17 + $0x1b8] sm:$0x1] }
  0x43   : > { %2867 = vperm.xlu2 %4128, %v2777_v52   ;;  %2862 = vperm.xlu1 %4127, %v2776_v53  }
  0x44   : > { %2857 = vperm.xlu0 %4126, %v2775_v54   ;;  %3834 = vmatmul.msk.f32.gmra.mxu0 %vm681_vm0, %v627_v55  ;;  %v1855_v54 = vld [vmem:[%s4448_s24] sm:$0xff] }
  0x45   : > { %3878 = vmatmul.msk.f32.gmra.mxu1 %vm681_vm0, %v671_v56  ;;  %3987 = vmatmul.msk.f32.gmra.mxu3 %vm1445_vm1, %v1435_v57  ;;  %v1428_v55 = vld [vmem:[%s4260_s17 + $0x140] sm:$0xff]  ;;  %v2792_v57 = vld [vmem:[%s4297_s23 + $0xb8] sm:$0xff] }
  0x47   : > { %3972 = vmatmul.msk.f32.gmra.mxu2 %vm1445_vm1, %v1420_v58  ;;  %v1934_v58 = vld [vmem:[%s4242_s27 + $0xb8] sm:$0xff] }
  0x4b   : > { %2877 = vperm.xlu2 %4128, %v2779_v59   ;;  %2872 = vperm.xlu1 %4127, %v2778_v60   ;;  %v2791_v60 = vld [vmem:[%s4297_s23 + $0xb0] sm:$0xff] }
  0x4c   : > { %2029 = vperm.xlu0 %4126, %v1923_v61   ;;  %3835 = vmatmul.msk.f32.gmra.mxu0 %vm681_vm0, %v628_v62  ;;  %v636_v61 = vld [vmem:[%s4248_s30 + $0x78] sm:$0xff] }
  0x4d   : > { %3879 = vmatmul.msk.f32.gmra.mxu1 %vm681_vm0, %v672_v63  ;;  %3988 = vmatmul.msk.f32.gmra.mxu3 %vm1445_vm1, %v1436_v0  ;;  %v564_v62 = vld [vmem:[%s4412_s19 + $0x18] sm:$0xff] }
  0x4f   : > { %3973 = vmatmul.msk.f32.gmra.mxu2 %vm1445_vm1, %v1421_v1  ;;  %v1856_v1 = vld [vmem:[%s4448_s24 + $0x8] sm:$0xff] }
  0x53   : > { %2887 = vperm.xlu2 %4128, %v2781_v4   ;;  %2034 = vperm.xlu1 %4127, %v1924_v5  }
  0x54   : > { %2882 = vperm.xlu0 %4126, %v2780_v6   ;;  %3836 = vmatmul.msk.f32.gmra.mxu0 %vm681_vm0, %v629_v7  ;;  %v1935_v6 = vld [vmem:[%s4242_s27 + $0xc0] sm:$0xff] }
  0x55   : > { %3880 = vmatmul.msk.f32.gmra.mxu1 %vm681_vm0, %v673_v8  ;;  %3989 = vmatmul.msk.f32.gmra.mxu3 %vm1445_vm1, %v1437_v9  ;;  %v637_v7 = vld [vmem:[%s4248_s30 + $0x80] sm:$0xff] }
  0x56   : > { %v565_v9 = vld [vmem:[%s4412_s19 + $0x20] sm:$0xff] }
  0x57   : > { %3974 = vmatmul.msk.f32.gmra.mxu2 %vm1445_vm1, %v1422_v10 }
  0x5b   : > { %2897 = vperm.xlu2 %4128, %v2783_v11   ;;  %2039 = vperm.xlu1 %4127, %v1925_v12  }
  0x5c   : > { %2892 = vperm.xlu0 %4126, %v2782_v13   ;;  %3837 = vmatmul.msk.f32.gmra.mxu0 %vm681_vm0, %v630_v14  ;;  %v1857_v13 = vld [vmem:[%s4448_s24 + $0x10] sm:$0xff] }
  0x5d   : > { %3881 = vmatmul.msk.f32.gmra.mxu1 %vm681_vm0, %v674_v15  ;;  %3990 = vmatmul.msk.f32.gmra.mxu3 %vm1445_vm1, %v1438_v16  ;;  %v2795_v15 = vld [vmem:[%s4297_s23 + $0xd0] sm:$0xff] }
  0x5e   : > { %v1937_v16 = vld [vmem:[%s4242_s27 + $0xd0] sm:$0xff] }
  0x5f   : > { %3975 = vmatmul.msk.f32.gmra.mxu2 %vm1445_vm1, %v1423_v17 }
  0x63   : > { %2049 = vperm.xlu2 %4128, %v1927_v18   ;;  %2902 = vperm.xlu1 %4127, %v2784_v19   ;;  %v2794_v18 = vld [vmem:[%s4297_s23 + $0xc8] sm:$0xff] }
  0x64   : > { %2044 = vperm.xlu0 %4126, %v1926_v20   ;;  %3838 = vmatmul.msk.f32.gmra.mxu0 %vm681_vm0, %v631_v21  ;;  %v638_v19 = vld [vmem:[%s4248_s30 + $0x88] sm:$0xff] }
  0x65   : > { %3882 = vmatmul.msk.f32.gmra.mxu1 %vm681_vm0, %v675_v22  ;;  %3991 = vmatmul.msk.f32.gmra.mxu3 %vm1445_vm1, %v1439_v23  ;;  %v566_v21 = vld [vmem:[%s4412_s19 + $0x28] sm:$0xff] }
  0x67   : > { %3976 = vmatmul.msk.f32.gmra.mxu2 %vm1445_vm1, %v1424_v24  ;;  %v2713_v24 = vld [vmem:[%s4497_s26] sm:$0xff] }
  0x6b   : > { %2912 = vperm.xlu2 %4128, %v2786_v25   ;;  %2054 = vperm.xlu1 %4127, %v1928_v26  }
  0x6c   : > { %2907 = vperm.xlu0 %4126, %v2785_v27   ;;  %3839 = vmatmul.msk.f32.gmra.mxu0 %vm681_vm0, %v632_v28  ;;  %v1858_v28 = vld [vmem:[%s4448_s24 + $0x18] sm:$0xff] }
  0x6d   : > { %3883 = vmatmul.msk.f32.gmra.mxu1 %vm681_vm0, %v676_v29  ;;  %3992 = vmatmul.msk.f32.gmra.mxu3 %vm1445_vm1, %v1440_v30  ;;  %v4454_v56 = vpop.permute.xlu2 %1989  ;;  %v1939_v30 = vld [vmem:[%s4242_s27 + $0xe0] sm:$0xff] }
  0x6f   : > { %3977 = vmatmul.msk.f32.gmra.mxu2 %vm1445_vm1, %v1425_v31  ;;  %v2796_v31 = vld [vmem:[%s4297_s23 + $0xd8] sm:$0xff] }
  0x73   : > { %2064 = vperm.xlu2 %4128, %v1930_v32   ;;  %2917 = vperm.xlu1 %4127, %v2787_v33  }
  0x74   : > { %2059 = vperm.xlu0 %4126, %v1929_v34   ;;  %3840 = vmatmul.msk.f32.gmra.mxu0 %vm681_vm0, %v633_v35  ;;  %v1938_v34 = vld [vmem:[%s4242_s27 + $0xd8] sm:$0xff]  ;;  %v639_v35 = vld [vmem:[%s4248_s30 + $0x90] sm:$0xff] }
  0x75   : > { %3884 = vmatmul.msk.f32.vlgmr.msrb.gmra.mxu1 %vm681_vm0, %v561_v36  ;;  %3993 = vmatmul.msk.f32.gmra.mxu3 %vm1445_vm1, %v1441_v37  ;;  %v4468_v4 = vpop.permute.xlu2 %1994  ;;  %v567_v37 = vld [vmem:[%s4412_s19 + $0x30] sm:$0xff] }
  0x77   : > { %3978 = vmatmul.msk.f32.gmra.mxu2 %vm1445_vm1, %v1426_v38  ;;  %v2714_v38 = vld [vmem:[%s4497_s26 + $0x8] sm:$0xff] }
  0x7b   : > { %2927 = vperm.xlu2 %4128, %v2789_v39   ;;  %2069 = vperm.xlu1 %4127, %v1931_v40  }
  0x7c   : > { %2922 = vperm.xlu0 %4126, %v2788_v41   ;;  %3841 = vmatmul.msk.f32.gmra.mxu0 %vm681_vm0, %v634_v42 }
  0x7d   : > { %3885 = vmatmul.msk.f32.gmra.mxu1 %vm681_vm0, %v562_v43  ;;  %3994 = vmatmul.msk.f32.gmra.mxu3 %vm1445_vm1, %v1442_v44  ;;  %v4502_v22 = vpop.permute.xlu2 %2009  ;;  %v1859_v43 = vld [vmem:[%s4448_s24 + $0x20] sm:$0xff] }
  0x7f   : > { %3979 = vmatmul.msk.f32.gmra.mxu2 %vm1445_vm1, %v1427_v45  ;;  %v2798_v45 = vld [vmem:[%s4297_s23 + $0xe8] sm:$0xff] }
  0x83   : > { %2079 = vperm.xlu2 %4128, %v1933_v46   ;;  %2932 = vperm.xlu1 %4127, %v2790_v47   ;;  %v1940_v46 = vld [vmem:[%s4242_s27 + $0xe8] sm:$0xff] }
  0x84   : > { %2074 = vperm.xlu0 %4126, %v1932_v48   ;;  %3842 = vmatmul.msk.f32.gmra.mxu0 %vm681_vm0, %v635_v49  ;;  %v2797_v48 = vld [vmem:[%s4297_s23 + $0xe0] sm:$0xff]  ;;  %v640_v49 = vld [vmem:[%s4248_s30 + $0x98] sm:$0xff] }
  0x85   : > { %3886 = vmatmul.msk.f32.gmra.mxu1 %vm681_vm0, %v563_v50  ;;  %3995 = vmatmul.msk.f32.gmra.mxu3 %vm1445_vm1, %v1443_v51  ;;  %v1980_v52 = vpop.permute.xlu1 %1979  ;;  %v2833_v41 = vpop.permute.xlu2 %2832  ;;  %v568_v51 = vld [vmem:[%s4412_s19 + $0x38] sm:$0xff] }
  0x86   : > { %v1970_v53 = vpop.permute.xlu0 %1969  ;;  %v2249_v23 = vmul.f32 %v1980_v52, %v1857_v13  ;;  %v3106_v42 = vmul.f32 %v2833_v41, %v2714_v38  ;;  %v2251_v52 = vmul.f32 %v4454_v56, %v1859_v43  ;;  %v2801_v13 = vld [vmem:[%s4297_s23 + $0x100] sm:$0xff]  ;;  %v643_v41 = vld [vmem:[%s4248_s30 + $0xb0] sm:$0xff] }
  0x87   : > { %v2247_v59 = vmul.f32 %v1970_v53, %v1855_v54  ;;  %3980 = vmatmul.msk.f32.gmra.mxu2 %vm1445_vm1, %v1428_v55  ;;  %v2715_v53 = vld [vmem:[%s4497_s26 + $0x10] sm:$0xff] }
  0x88   : > { %v571_v43 = vld [vmem:[%s4412_s19 + $0x50] sm:$0xff] }
  0x8b   : > { %2942 = vperm.xlu2 %4128, %v2792_v57   ;;  %2084 = vperm.xlu1 %4127, %v1934_v58   ;;  %v1860_v58 = vld [vmem:[%s4448_s24 + $0x28] sm:$0xff] }
  0x8c   : > { %2937 = vperm.xlu0 %4126, %v2791_v60   ;;  %3843 = vmatmul.msk.f32.gmra.mxu0 %vm681_vm0, %v636_v61  ;;  %v2799_v60 = vld [vmem:[%s4297_s23 + $0xf0] sm:$0xff] }
  0x8d   : > { %3887 = vmatmul.msk.f32.gmra.mxu1 %vm681_vm0, %v564_v62  ;;  %3996 = vmatmul.msk.f32.vlgmr.msrb.gmra.mxu3 %vm1445_vm1, %v2247_v59  ;;  %v1985_v63 = vpop.permute.xlu1 %1984  ;;  %v1942_v59 = vld [vmem:[%s4242_s27 + $0xf8] sm:$0xff]  ;;  %v1941_v62 = vld [vmem:[%s4242_s27 + $0xf0] sm:$0xff] }
  0x8e   : > { %v1975_v0 = vpop.permute.xlu0 %1974  ;;  %v2250_v39 = vmul.f32 %v1985_v63, %v1858_v28  ;;  %v641_v63 = vld [vmem:[%s4248_s30 + $0xa0] sm:$0xff] }
  0x8f   : > { %v2248_v10 = vmul.f32 %v1975_v0, %v1856_v1  ;;  %v569_v1 = vld [vmem:[%s4412_s19 + $0x40] sm:$0xff] }
  0x91   : > { %v4470_v5 = vpop.f32.mrf.mxu0 }
  0x92   : > { %v4474_v8 = vpop.f32.mrf.mxu1 }
  0x93   : > { %5721 = vst [vmem:[#allocation2_spill] sm:$0xff] %v4474_v8  ;;  %2094 = vperm.xlu2 %4128, %v1936_v2   ;;  %2947 = vperm.xlu1 %4127, %v2793_v3   ;;  %v2252_v2 = vmul.f32 %v4468_v4, %v1860_v58  ;;  %v2716_v3 = vld [vmem:[%s4497_s26 + $0x18] sm:$0xff]  ;;  %v2803_v58 = vld [vmem:[%s4297_s23 + $0x110] sm:$0xff] }
  0x94   : > { %2089 = vperm.xlu0 %4126, %v1935_v6   ;;  %3844 = vmatmul.msk.f32.gmra.mxu0 %vm681_vm0, %v637_v7  ;;  %v2843_v6 = vpop.permute.xlu2 %2842 }
  0x95   : > { %3888 = vmatmul.msk.f32.gmra.mxu1 %vm681_vm0, %v565_v9  ;;  %3997 = vmatmul.msk.f32.gmra.mxu3 %vm1445_vm1, %v2248_v10  ;;  %v4480_v11 = vpop.permute.xlu1 %2004  ;;  %v3108_v9 = vmul.f32 %v2843_v6, %v2716_v3  ;;  %v1861_v10 = vld [vmem:[%s4448_s24 + $0x30] sm:$0xff] }
  0x96   : > { %v4482_v12 = vpop.permute.xlu0 %1999 }
  0x98   : > { %v4485_v14 = vpop.f32.mrf.mxu3 }
  0x99   : > { %5722 = vst [vmem:[#allocation3_spill] sm:$0xff] %v4485_v14  ;;  %v4489_v17 = vpop.f32.mrf.mxu0 }
  0x9a   : > { %v4499_v20 = vpop.f32.mrf.mxu1  ;;  %v4506_v25 = vpop.f32.mrf.mxu2 }
  0x9b   : > { %5723 = vst [vmem:[#allocation4_spill] sm:$0xff] %v4499_v20  ;;  %2957 = vperm.xlu2 %4128, %v2795_v15   ;;  %2099 = vperm.xlu1 %4127, %v1937_v16   ;;  %v1943_v15 = vld [vmem:[%s4242_s27 + $0x100] sm:$0xff] }
  0x9c   : > { %2952 = vperm.xlu0 %4126, %v2794_v18   ;;  %3845 = vmatmul.msk.f32.gmra.mxu0 %vm681_vm0, %v638_v19  ;;  %v2800_v19 = vld [vmem:[%s4297_s23 + $0xf8] sm:$0xff] }
  0x9d   : > { %3889 = vmatmul.msk.f32.gmra.mxu1 %vm681_vm0, %v566_v21  ;;  %3998 = vmatmul.msk.f32.gmra.mxu3 %vm1445_vm1, %v2249_v23  ;;  %v2828_v26 = vpop.permute.xlu1 %2827  ;;  %v642_v21 = vld [vmem:[%s4248_s30 + $0xa8] sm:$0xff] }
  0x9e   : > { %v3105_v27 = vmul.f32 %v2828_v26, %v2713_v24  ;;  %v4516_v32 = vpop.permute.xlu0 %2014  ;;  %v570_v24 = vld [vmem:[%s4412_s19 + $0x48] sm:$0xff]  ;;  %v2253_v26 = vmul.f32 %v4482_v12, %v1861_v10 }
  0x9f   : > { %v1948_v10 = vld [vmem:[%s4242_s27 + $0x128] sm:$0xff] }
  0xa0   : > { %v4511_v29 = vpop.f32.mrf.mxu3  ;;  %4052 = vmatmul.msk.f32.vlgmr.msrb.gmra.mxu2 %vm1445_vm1, %v3105_v27  ;;  %v2717_v27 = vld [vmem:[%s4497_s26 + $0x20] sm:$0xff] }
  0xa1   : > { %5724 = vst [vmem:[#allocation5_spill] sm:$0xff] %v4511_v29  ;;  %v4518_v33 = vpop.f32.mrf.mxu0  ;;  %v2732_v29 = vld [vmem:[%s4497_s26 + $0x98] sm:$0xff] }
  0xa2   : > { %v4522_v36 = vpop.f32.mrf.mxu1  ;;  %v4527_v40 = vpop.f32.mrf.mxu2 }
  0xa3   : > { %5725 = vst [vmem:[#allocation6_spill] sm:$0xff] %v4522_v36  ;;  %2109 = vperm.xlu2 %4128, %v1939_v30   ;;  %2962 = vperm.xlu1 %4127, %v2796_v31  }
  0xa4   : > { %2104 = vperm.xlu0 %4126, %v1938_v34   ;;  %3846 = vmatmul.msk.f32.gmra.mxu0 %vm681_vm0, %v639_v35  ;;  %v1862_v34 = vld [vmem:[%s4448_s24 + $0x38] sm:$0xff]  ;;  %v1945_v35 = vld [vmem:[%s4242_s27 + $0x110] sm:$0xff] }
  0xa5   : > { %3890 = vmatmul.msk.f32.gmra.mxu1 %vm681_vm0, %v567_v37  ;;  %3999 = vmatmul.msk.f32.gmra.mxu3 %vm1445_vm1, %v2250_v39  ;;  %v4577_v16 = vpop.permute.xlu1 %2019  ;;  %v2802_v37 = vld [vmem:[%s4297_s23 + $0x108] sm:$0xff] }
  0xa6   : > { %v2838_v54 = vpop.permute.xlu0 %2837  ;;  %v1944_v39 = vld [vmem:[%s4242_s27 + $0x108] sm:$0xff] }
  0xa7   : > { %v3107_v57 = vmul.f32 %v2838_v54, %v2715_v53  ;;  %v2804_v53 = vld [vmem:[%s4297_s23 + $0x118] sm:$0xff] }
  0xa8   : > { %v4532_v44 = vpop.f32.mrf.mxu3  ;;  %4053 = vmatmul.msk.f32.gmra.mxu2 %vm1445_vm1, %v3106_v42  ;;  %v1946_v54 = vld [vmem:[%s4242_s27 + $0x118] sm:$0xff] }
  0xa9   : > { %5726 = vst [vmem:[#allocation7_spill] sm:$0xff] %v4532_v44  ;;  %v4537_v47 = vpop.f32.mrf.mxu0  ;;  %v1876_v44 = vld [vmem:[%s4448_s24 + $0xa8] sm:$0xff] }
  0xaa   : > { %v4541_v50 = vpop.f32.mrf.mxu1  ;;  %v4547_v55 = vpop.f32.mrf.mxu2 }
  0xab   : > { %5727 = vst [vmem:[#allocation8_spill] sm:$0xff] %v4541_v50  ;;  %2972 = vperm.xlu2 %4128, %v2798_v45   ;;  %2114 = vperm.xlu1 %4127, %v1940_v46   ;;  %v2254_v45 = vmul.f32 %v4480_v11, %v1862_v34  ;;  %v2718_v46 = vld [vmem:[%s4497_s26 + $0x28] sm:$0xff] }
  0xac   : > { %2967 = vperm.xlu0 %4126, %v2797_v48   ;;  %3847 = vmatmul.msk.f32.gmra.mxu0 %vm681_vm0, %v640_v49 }
  0xad   : > { %3891 = vmatmul.msk.f32.gmra.mxu1 %vm681_vm0, %v568_v51  ;;  %4000 = vmatmul.msk.f32.gmra.mxu3 %vm1445_vm1, %v2251_v52  ;;  %v2853_v48 = vpop.permute.xlu1 %2852  ;;  %v1863_v52 = vld [vmem:[%s4448_s24 + $0x40] sm:$0xff] }
  0xae   : > { %v2848_v28 = vpop.permute.xlu0 %2847  ;;  %v3110_v51 = vmul.f32 %v2853_v48, %v2718_v46  ;;  %v2806_v46 = vld [vmem:[%s4297_s23 + $0x128] sm:$0xff] }
  0xaf   : > { %v3109_v31 = vmul.f32 %v2848_v28, %v2717_v27  ;;  %v573_v27 = vld [vmem:[%s4412_s19 + $0x60] sm:$0xff]  ;;  %v646_v48 = vld [vmem:[%s4248_s30 + $0xc8] sm:$0xff] }
  0xb0   : > { %v4552_v56 = vpop.f32.mrf.mxu3  ;;  %4054 = vmatmul.msk.f32.gmra.mxu2 %vm1445_vm1, %v3107_v57 }
  0xb1   : > { %5728 = vst [vmem:[#allocation9_spill] sm:$0xff] %v4552_v56  ;;  %v4557_v61 = vpop.f32.mrf.mxu0  ;;  %v1875_v56 = vld [vmem:[%s4448_s24 + $0xa0] sm:$0xff] }
  0xb2   : > { %v4561_v0 = vpop.f32.mrf.mxu1  ;;  %v4567_v7 = vpop.f32.mrf.mxu2 }
  0xb3   : > { %5729 = vst [vmem:[#allocation10_spill] sm:$0xff] %v4561_v0  ;;  %2124 = vperm.xlu2 %4128, %v1942_v59   ;;  %2977 = vperm.xlu1 %4127, %v2799_v60   ;;  %v644_v59 = vld [vmem:[%s4248_s30 + $0xb8] sm:$0xff] }
  0xb4   : > { %2119 = vperm.xlu0 %4126, %v1941_v62   ;;  %3848 = vmatmul.msk.f32.gmra.mxu0 %vm681_vm0, %v641_v63  ;;  %v572_v62 = vld [vmem:[%s4412_s19 + $0x58] sm:$0xff]  ;;  %v2255_v63 = vmul.f32 %v4502_v22, %v1863_v52  ;;  %v574_v52 = vld [vmem:[%s4412_s19 + $0x68] sm:$0xff] }
  0xb5   : > { %3892 = vmatmul.msk.f32.gmra.mxu1 %vm681_vm0, %v569_v1  ;;  %4001 = vmatmul.msk.f32.gmra.mxu3 %vm1445_vm1, %v2252_v2  ;;  %v2719_v1 = vld [vmem:[%s4497_s26 + $0x30] sm:$0xff]  ;;  %v2863_v34 = vpop.permute.xlu1 %2862 }
  0xb6   : > { %v2858_v2 = vpop.permute.xlu0 %2857 }
  0xb7   : > { %v3111_v6 = vmul.f32 %v2858_v2, %v2719_v1  ;;  %v2808_v2 = vld [vmem:[%s4297_s23 + $0x138] sm:$0xff] }
  0xb8   : > { %v4572_v4 = vpop.f32.mrf.mxu3  ;;  %4055 = vmatmul.msk.f32.gmra.mxu2 %vm1445_vm1, %v3108_v9  ;;  %v1864_v9 = vld [vmem:[%s4448_s24 + $0x48] sm:$0xff] }
  0xb9   : > { %5730 = vst [vmem:[#allocation11_spill] sm:$0xff] %v4572_v4  ;;  %v4579_v18 = vpop.f32.mrf.mxu0  ;;  %v2256_v28 = vmul.f32 %v4516_v32, %v1864_v9  ;;  %v1950_v9 = vld [vmem:[%s4242_s27 + $0x138] sm:$0xff] }
  0xba   : > { %v4583_v23 = vpop.f32.mrf.mxu1  ;;  %v4589_v30 = vpop.f32.mrf.mxu2 }
  0xbb   : > { %5731 = vst [vmem:[#allocation12_spill] sm:$0xff] %v4583_v23  ;;  %2987 = vperm.xlu2 %4128, %v2801_v13   ;;  %2129 = vperm.xlu1 %4127, %v1943_v15   ;;  %v2805_v13 = vld [vmem:[%s4297_s23 + $0x120] sm:$0xff]  ;;  %v2025_v15 = vpop.permute.xlu2 %2024 }
  0xbc   : > { %2982 = vperm.xlu0 %4126, %v2800_v19   ;;  %3849 = vmatmul.msk.f32.gmra.mxu0 %vm681_vm0, %v642_v21  ;;  %v1947_v21 = vld [vmem:[%s4242_s27 + $0x120] sm:$0xff] }
  0xbd   : > { %3893 = vmatmul.msk.f32.gmra.mxu1 %vm681_vm0, %v570_v24  ;;  %4002 = vmatmul.msk.f32.gmra.mxu3 %vm1445_vm1, %v2253_v26  ;;  %v645_v24 = vld [vmem:[%s4248_s30 + $0xc0] sm:$0xff] }
  0xc0   : > { %v4594_v12 = vpop.f32.mrf.mxu3  ;;  %4056 = vmatmul.msk.f32.gmra.mxu2 %vm1445_vm1, %v3109_v31  ;;  %v2720_v31 = vld [vmem:[%s4497_s26 + $0x38] sm:$0xff] }
  0xc1   : > { %5732 = vst [vmem:[#allocation13_spill] sm:$0xff] %v4594_v12  ;;  %v4599_v38 = vpop.f32.mrf.mxu0  ;;  %v1874_v12 = vld [vmem:[%s4448_s24 + $0x98] sm:$0xff] }
  0xc2   : > { %v4603_v42 = vpop.f32.mrf.mxu1  ;;  %v4609_v49 = vpop.f32.mrf.mxu2 }
  0xc3   : > { %5733 = vst [vmem:[#allocation14_spill] sm:$0xff] %v4603_v42  ;;  %2139 = vperm.xlu2 %4128, %v1945_v35   ;;  %2992 = vperm.xlu1 %4127, %v2802_v37   ;;  %v3112_v37 = vmul.f32 %v2863_v34, %v2720_v31  ;;  %v2873_v31 = vpop.permute.xlu1 %2872  ;;  %v1872_v42 = vld [vmem:[%s4448_s24 + $0x88] sm:$0xff] }
  0xc4   : > { %2134 = vperm.xlu0 %4126, %v1944_v39   ;;  %3850 = vmatmul.msk.f32.gmra.mxu0 %vm681_vm0, %v643_v41  ;;  %v1865_v39 = vld [vmem:[%s4448_s24 + $0x50] sm:$0xff] }
  0xc5   : > { %3894 = vmatmul.msk.f32.gmra.mxu1 %vm681_vm0, %v571_v43  ;;  %4003 = vmatmul.msk.f32.gmra.mxu3 %vm1445_vm1, %v2254_v45  ;;  %v2807_v41 = vld [vmem:[%s4297_s23 + $0x130] sm:$0xff] }
  0xc6   : > { %v1949_v43 = vld [vmem:[%s4242_s27 + $0x130] sm:$0xff] }
  0xc8   : > { %v4614_v11 = vpop.f32.mrf.mxu3  ;;  %4057 = vmatmul.msk.f32.gmra.mxu2 %vm1445_vm1, %v3110_v51 }
  0xc9   : > { %5734 = vst [vmem:[#allocation15_spill] sm:$0xff] %v4614_v11  ;;  %v4619_v57 = vpop.f32.mrf.mxu0 }
  0xca   : > { %5735 = vst [vmem:[#allocation16_spill] sm:$0xff] %v4619_v57  ;;  %v4623_v60 = vpop.f32.mrf.mxu1  ;;  %v4629_v3 = vpop.f32.mrf.mxu2 }
  0xcb   : > { %5736 = vst [vmem:[#allocation17_spill] sm:$0xff] %v4623_v60  ;;  %3002 = vperm.xlu2 %4128, %v2804_v53   ;;  %2144 = vperm.xlu1 %4127, %v1946_v54   ;;  %v2721_v53 = vld [vmem:[%s4497_s26 + $0x40] sm:$0xff]  ;;  %v2868_v54 = vpop.permute.xlu2 %2867  ;;  %v2727_v60 = vld [vmem:[%s4497_s26 + $0x70] sm:$0xff] }
  0xcc   : > { %2997 = vperm.xlu0 %4126, %v2803_v58   ;;  %3851 = vmatmul.msk.f32.gmra.mxu0 %vm681_vm0, %v644_v59  ;;  %v2257_v58 = vmul.f32 %v4577_v16, %v1865_v39  ;;  %v1951_v16 = vld [vmem:[%s4242_s27 + $0x140] sm:$0xff] }
  0xcd   : > { %3895 = vmatmul.msk.f32.gmra.mxu1 %vm681_vm0, %v572_v62  ;;  %4004 = vmatmul.msk.f32.gmra.mxu3 %vm1445_vm1, %v2255_v63  ;;  %v3113_v62 = vmul.f32 %v2868_v54, %v2721_v53  ;;  %v1866_v63 = vld [vmem:[%s4448_s24 + $0x58] sm:$0xff]  ;;  %v1867_v39 = vld [vmem:[%s4448_s24 + $0x60] sm:$0xff] }
  0xd0   : > { %v4634_v22 = vpop.f32.mrf.mxu3  ;;  %4058 = vmatmul.msk.f32.gmra.mxu2 %vm1445_vm1, %v3111_v6 }
  0xd1   : > { %5737 = vst [vmem:[#allocation18_spill] sm:$0xff] %v4634_v22  ;;  %v4639_v19 = vpop.f32.mrf.mxu0  ;;  %v1873_v22 = vld [vmem:[%s4448_s24 + $0x90] sm:$0xff] }
  0xd2   : > { %5738 = vst [vmem:[#allocation19_spill] sm:$0xff] %v4639_v19  ;;  %v4643_v26 = vpop.f32.mrf.mxu1  ;;  %v4649_v35 = vpop.f32.mrf.mxu2 }
  0xd3   : > { %5739 = vst [vmem:[#allocation20_spill] sm:$0xff] %v4643_v26  ;;  %2154 = vperm.xlu2 %4128, %v1948_v10   ;;  %3007 = vperm.xlu1 %4127, %v2805_v13   ;;  %v647_v10 = vld [vmem:[%s4248_s30 + $0xd0] sm:$0xff]  ;;  %v2030_v13 = vpop.permute.xlu0 %2029  ;;  %v2878_v53 = vpop.permute.xlu2 %2877 }
  0xd4   : > { %2149 = vperm.xlu0 %4126, %v1947_v21   ;;  %3852 = vmatmul.msk.f32.gmra.mxu0 %vm681_vm0, %v645_v24  ;;  %5740 = vst [vmem:[#allocation21_spill] sm:$0xff] %v4649_v35  ;;  %v575_v24 = vld [vmem:[%s4412_s19 + $0x70] sm:$0xff] }
  0xd5   : > { %3896 = vmatmul.msk.f32.gmra.mxu1 %vm681_vm0, %v573_v27  ;;  %4005 = vmatmul.msk.f32.gmra.mxu3 %vm1445_vm1, %v2256_v28  ;;  %v2258_v27 = vmul.f32 %v2025_v15, %v1866_v63  ;;  %v2722_v28 = vld [vmem:[%s4497_s26 + $0x48] sm:$0xff]  ;;  %v2259_v63 = vmul.f32 %v2030_v13, %v1867_v39  ;;  %v1954_v13 = vld [vmem:[%s4242_s27 + $0x158] sm:$0xff] }
  0xd6   : > { %v3114_v34 = vmul.f32 %v2873_v31, %v2722_v28  ;;  %v1953_v31 = vld [vmem:[%s4242_s27 + $0x150] sm:$0xff] }
  0xd8   : > { %v4654_v32 = vpop.f32.mrf.mxu3  ;;  %4059 = vmatmul.msk.f32.gmra.mxu2 %vm1445_vm1, %v3112_v37 }
  0xd9   : > { %5741 = vst [vmem:[#allocation22_spill] sm:$0xff] %v4654_v32  ;;  %v4659_v45 = vpop.f32.mrf.mxu0 }
  0xda   : > { %5742 = vst [vmem:[#allocation23_spill] sm:$0xff] %v4659_v45  ;;  %v4663_v51 = vpop.f32.mrf.mxu1  ;;  %v4671_v59 = vpop.f32.mrf.mxu2 }
  0xdb   : > { %5743 = vst [vmem:[#allocation24_spill] sm:$0xff] %v4663_v51  ;;  %3017 = vperm.xlu2 %4128, %v2807_v41   ;;  %2159 = vperm.xlu1 %4127, %v1949_v43   ;;  %v2810_v41 = vld [vmem:[%s4297_s23 + $0x148] sm:$0xff]  ;;  %v1870_v51 = vld [vmem:[%s4448_s24 + $0x78] sm:$0xff] }
  0xdc   : > { %3012 = vperm.xlu0 %4126, %v2806_v46   ;;  %3853 = vmatmul.msk.f32.gmra.mxu0 %vm681_vm0, %v646_v48  ;;  %5744 = vst [vmem:[#allocation25_spill] sm:$0xff] %v4671_v59  ;;  %v1952_v43 = vld [vmem:[%s4242_s27 + $0x148] sm:$0xff]  ;;  %v2809_v48 = vld [vmem:[%s4297_s23 + $0x140] sm:$0xff] }
  0xdd   : > { %3897 = vmatmul.msk.f32.gmra.mxu1 %vm681_vm0, %v574_v52  ;;  %4006 = vmatmul.msk.f32.gmra.mxu3 %vm1445_vm1, %v2257_v58  ;;  %v648_v52 = vld [vmem:[%s4248_s30 + $0xd8] sm:$0xff] }
  0xde   : > { %v576_v58 = vld [vmem:[%s4412_s19 + $0x78] sm:$0xff] }
  0xe0   : > { %v4674_v1 = vpop.f32.mrf.mxu3  ;;  %4060 = vmatmul.msk.f32.gmra.mxu2 %vm1445_vm1, %v3113_v62  ;;  %v2723_v62 = vld [vmem:[%s4497_s26 + $0x50] sm:$0xff] }
  0xe1   : > { %5745 = vst [vmem:[#allocation26_spill] sm:$0xff] %v4674_v1  ;;  %v4679_v6 = vpop.f32.mrf.mxu0 }
  0xe2   : > { %5746 = vst [vmem:[#allocation27_spill] sm:$0xff] %v4679_v6  ;;  %v4683_v21 = vpop.f32.mrf.mxu1  ;;  %v4690_v37 = vpop.f32.mrf.mxu2 }
  0xe3   : > { %5747 = vst [vmem:[#allocation28_spill] sm:$0xff] %v4683_v21  ;;  %2169 = vperm.xlu2 %4128, %v1951_v16   ;;  %3022 = vperm.xlu1 %4127, %v2808_v2   ;;  %v2883_v16 = vpop.permute.xlu0 %2882  ;;  %v3115_v2 = vmul.f32 %v2878_v53, %v2723_v62  ;;  %v2888_v53 = vpop.permute.xlu2 %2887 }
  0xe4   : > { %2164 = vperm.xlu0 %4126, %v1950_v9   ;;  %3854 = vmatmul.msk.f32.gmra.mxu0 %vm681_vm0, %v647_v10  ;;  %5748 = vst [vmem:[#allocation29_spill] sm:$0xff] %v4690_v37  ;;  %v2035_v9 = vpop.permute.xlu1 %2034  ;;  %v1868_v10 = vld [vmem:[%s4448_s24 + $0x68] sm:$0xff] }
  0xe5   : > { %3898 = vmatmul.msk.f32.gmra.mxu1 %vm681_vm0, %v575_v24  ;;  %4007 = vmatmul.msk.f32.gmra.mxu3 %vm1445_vm1, %v2258_v27  ;;  %v2811_v27 = vld [vmem:[%s4297_s23 + $0x150] sm:$0xff] }
  0xe8   : > { %v4693_v15 = vpop.f32.mrf.mxu3  ;;  %4061 = vmatmul.msk.f32.gmra.mxu2 %vm1445_vm1, %v3114_v34  ;;  %v649_v34 = vld [vmem:[%s4248_s30 + $0xe0] sm:$0xff] }
  0xe9   : > { %5749 = vst [vmem:[#allocation30_spill] sm:$0xff] %v4693_v15  ;;  %v4698_v46 = vpop.f32.mrf.mxu0  ;;  %v1871_v15 = vld [vmem:[%s4448_s24 + $0x80] sm:$0xff] }
  0xea   : > { %5750 = vst [vmem:[#allocation31_spill] sm:$0xff] %v4698_v46  ;;  %v4702_v54 = vpop.f32.mrf.mxu1  ;;  %v4719_v39 = vpop.f32.mrf.mxu2  ;;  %v1882_v46 = vld [vmem:[%s4448_s24 + $0xd8] sm:$0xff] }
  0xeb   : > { %5751 = vst [vmem:[#allocation32_spill] sm:$0xff] %v4702_v54  ;;  %3032 = vperm.xlu2 %4128, %v2810_v41   ;;  %2174 = vperm.xlu1 %4127, %v1952_v43   ;;  %v577_v43 = vld [vmem:[%s4412_s19 + $0x80] sm:$0xff]  ;;  %v2893_v62 = vpop.permute.xlu0 %2892  ;;  %v2898_v21 = vpop.permute.xlu2 %2897 }
  0xec   : > { %3027 = vperm.xlu0 %4126, %v2809_v48   ;;  %3855 = vmatmul.msk.f32.gmra.mxu0 %vm681_vm0, %v648_v52  ;;  %5754 = vst [vmem:[#allocation35_spill] sm:$0xff] %v4719_v39  ;;  %v2260_v48 = vmul.f32 %v2035_v9, %v1868_v10  ;;  %v2724_v52 = vld [vmem:[%s4497_s26 + $0x58] sm:$0xff]  ;;  %v2813_v10 = vld [vmem:[%s4297_s23 + $0x160] sm:$0xff] }
  0xed   : > { %3899 = vmatmul.msk.f32.gmra.mxu1 %vm681_vm0, %v576_v58  ;;  %4008 = vmatmul.msk.f32.gmra.mxu3 %vm1445_vm1, %v2259_v63  ;;  %v3116_v58 = vmul.f32 %v2883_v16, %v2724_v52  ;;  %v2040_v63 = vpop.permute.xlu1 %2039 }
  0xf0   : > { %v4710_v24 = vpop.f32.mrf.mxu3  ;;  %4062 = vmatmul.msk.f32.gmra.mxu2 %vm1445_vm1, %v3115_v2  ;;  %v1869_v2 = vld [vmem:[%s4448_s24 + $0x70] sm:$0xff] }
  0xf1   : > { %5752 = vst [vmem:[#allocation33_spill] sm:$0xff] %v4710_v24  ;;  %v4715_v28 = vpop.f32.mrf.mxu0  ;;  %v2261_v16 = vmul.f32 %v2040_v63, %v1869_v2  ;;  %v1957_v2 = vld [vmem:[%s4242_s27 + $0x170] sm:$0xff] }
  0xf2   : > { %5753 = vst [vmem:[#allocation34_spill] sm:$0xff] %v4715_v28  ;;  %v4721_v41 = vpop.f32.mrf.mxu1  ;;  %v4742_v52 = vpop.f32.mrf.mxu2 }
  0xf3   : > { %2184 = vperm.xlu2 %4128, %v1954_v13   ;;  %3037 = vperm.xlu1 %4127, %v2811_v27   ;;  %v1955_v13 = vld [vmem:[%s4242_s27 + $0x160] sm:$0xff]  ;;  %5757 = vst [vmem:[#allocation38_spill] sm:$0xff] %v4742_v52  ;;  %v2050_v26 = vpop.permute.xlu2 %2049  ;;  %v1881_v52 = vld [vmem:[%s4448_s24 + $0xd0] sm:$0xff] }
  0xf4   : > { %2179 = vperm.xlu0 %4126, %v1953_v31   ;;  %3856 = vmatmul.msk.f32.gmra.mxu0 %vm681_vm0, %v649_v34  ;;  %v2812_v31 = vld [vmem:[%s4297_s23 + $0x158] sm:$0xff]  ;;  %v650_v34 = vld [vmem:[%s4248_s30 + $0xe8] sm:$0xff] }
  0xf5   : > { %3900 = vmatmul.msk.f32.gmra.mxu1 %vm681_vm0, %v577_v43  ;;  %4009 = vmatmul.msk.f32.gmra.mxu3 %vm1445_vm1, %v2260_v48  ;;  %v578_v43 = vld [vmem:[%s4412_s19 + $0x88] sm:$0xff]  ;;  %v2725_v48 = vld [vmem:[%s4497_s26 + $0x60] sm:$0xff] }
  0xf8   : > { %v4729_v9 = vpop.f32.mrf.mxu3  ;;  %4063 = vmatmul.msk.f32.gmra.mxu2 %vm1445_vm1, %v3116_v58  ;;  %v3117_v58 = vmul.f32 %v2888_v53, %v2725_v48 }
  0xf9   : > { %5755 = vst [vmem:[#allocation36_spill] sm:$0xff] %v4729_v9  ;;  %v4734_v27 = vpop.f32.mrf.mxu0  ;;  %v2045_v9 = vpop.permute.xlu0 %2044 }
  0xfa   : > { %5756 = vst [vmem:[#allocation37_spill] sm:$0xff] %v4734_v27  ;;  %v4738_v54 = vpop.f32.mrf.mxu1  ;;  %v2262_v53 = vmul.f32 %v2045_v9, %v1870_v51  ;;  %v4764_v48 = vpop.f32.mrf.mxu2  ;;  %v2816_v9 = vld [vmem:[%s4297_s23 + $0x178] sm:$0xff] }
  0xfb   : > { %3047 = vperm.xlu2 %4128, %v2813_v10   ;;  %2189 = vperm.xlu1 %4127, %v1955_v13   ;;  %v2814_v10 = vld [vmem:[%s4297_s23 + $0x168] sm:$0xff]  ;;  %5760 = vst [vmem:[#allocation41_spill] sm:$0xff] %v4764_v48 }
  0xfc   : > { %3042 = vperm.xlu0 %4126, %v2812_v31   ;;  %3857 = vmatmul.msk.f32.gmra.mxu0 %vm681_vm0, %v650_v34  ;;  %v1956_v31 = vld [vmem:[%s4242_s27 + $0x168] sm:$0xff]  ;;  %v651_v34 = vld [vmem:[%s4248_s30 + $0xf0] sm:$0xff] }
  0xfd   : > { %3901 = vmatmul.msk.f32.gmra.mxu1 %vm681_vm0, %v578_v43  ;;  %4010 = vmatmul.msk.f32.gmra.mxu3 %vm1445_vm1, %v2261_v16  ;;  %v579_v43 = vld [vmem:[%s4412_s19 + $0x90] sm:$0xff]  ;;  %v2726_v16 = vld [vmem:[%s4497_s26 + $0x68] sm:$0xff] }
 0x100   : > { %v4748_v63 = vpop.f32.mrf.mxu3  ;;  %4064 = vmatmul.msk.f32.gmra.mxu2 %vm1445_vm1, %v3117_v58  ;;  %v3118_v58 = vmul.f32 %v2893_v62, %v2726_v16  ;;  %v2263_v62 = vmul.f32 %v2050_v26, %v1871_v15  ;;  %v3119_v16 = vmul.f32 %v2898_v21, %v2727_v60  ;;  %v1960_v15 = vld [vmem:[%s4242_s27 + $0x188] sm:$0xff]  ;;  %v581_v60 = vld [vmem:[%s4412_s19 + $0xa0] sm:$0xff]  ;;  %v2728_v21 = vld [vmem:[%s4497_s26 + $0x78] sm:$0xff] }
 0x101   : > { %5758 = vst [vmem:[#allocation39_spill] sm:$0xff] %v4748_v63  ;;  %v4753_v13 = vpop.f32.mrf.mxu0  ;;  %v2903_v63 = vpop.permute.xlu1 %2902 }
 0x102   : > { %5759 = vst [vmem:[#allocation40_spill] sm:$0xff] %v4753_v13  ;;  %v4757_v24 = vpop.f32.mrf.mxu1  ;;  %v3120_v32 = vmul.f32 %v2903_v63, %v2728_v21  ;;  %v2729_v63 = vld [vmem:[%s4497_s26 + $0x80] sm:$0xff] }
 0x103   : > { %2199 = vperm.xlu2 %4128, %v1957_v2   ;;  %3052 = vperm.xlu1 %4127, %v2814_v10   ;;  %v1958_v2 = vld [vmem:[%s4242_s27 + $0x178] sm:$0xff] }
 0x104   : > { %2194 = vperm.xlu0 %4126, %v1956_v31   ;;  %3858 = vmatmul.msk.f32.gmra.mxu0 %vm681_vm0, %v651_v34  ;;  %v2815_v31 = vld [vmem:[%s4297_s23 + $0x170] sm:$0xff]  ;;  %v652_v34 = vld [vmem:[%s4248_s30 + $0xf8] sm:$0xff] }
 0x105   : > { %3902 = vmatmul.msk.f32.gmra.mxu1 %vm681_vm0, %v579_v43  ;;  %4011 = vmatmul.msk.f32.gmra.mxu3 %vm1445_vm1, %v2262_v53  ;;  %v580_v53 = vld [vmem:[%s4412_s19 + $0x98] sm:$0xff] }
 0x108   : > { %v4767_v51 = vpop.f32.mrf.mxu3  ;;  %4065 = vmatmul.msk.f32.gmra.mxu2 %vm1445_vm1, %v3118_v58  ;;  %v2908_v58 = vpop.permute.xlu0 %2907 }
 0x109   : > { %5761 = vst [vmem:[#allocation42_spill] sm:$0xff] %v4767_v51  ;;  %v4772_v10 = vpop.f32.mrf.mxu0  ;;  %v4783_v51 = vpop.f32.mrf.mxu2 }
 0x10a   : > { %5762 = vst [vmem:[#allocation43_spill] sm:$0xff] %v4772_v10  ;;  %v4776_v43 = vpop.f32.mrf.mxu1  ;;  %v2055_v1 = vpop.permute.xlu1 %2054 }
 0x10b   : > { %3062 = vperm.xlu2 %4128, %v2816_v9   ;;  %2204 = vperm.xlu1 %4127, %v1958_v2   ;;  %5763 = vst [vmem:[#allocation44_spill] sm:$0xff] %v4783_v51  ;;  %v2817_v9 = vld [vmem:[%s4297_s23 + $0x180] sm:$0xff] }
 0x10c   : > { %3057 = vperm.xlu0 %4126, %v2815_v31   ;;  %3859 = vmatmul.msk.f32.gmra.mxu0 %vm681_vm0, %v652_v34  ;;  %v1959_v31 = vld [vmem:[%s4242_s27 + $0x180] sm:$0xff] }
 0x10d   : > { %3903 = vmatmul.msk.f32.gmra.mxu1 %vm681_vm0, %v580_v53  ;;  %4012 = vmatmul.msk.f32.gmra.mxu3 %vm1445_vm1, %v2263_v62  ;;  %v653_v34 = vld [vmem:[%s4248_s30 + $0x100] sm:$0xff]  ;;  %v2264_v62 = vmul.f32 %v2055_v1, %v1872_v42  ;;  %v2819_v42 = vld [vmem:[%s4297_s23 + $0x190] sm:$0xff] }
 0x10e   : > { %v1961_v1 = vld [vmem:[%s4242_s27 + $0x190] sm:$0xff] }
 0x110   : > { %v4786_v26 = vpop.f32.mrf.mxu3  ;;  %4066 = vmatmul.msk.f32.gmra.mxu2 %vm1445_vm1, %v3119_v16  ;;  %v2913_v16 = vpop.permute.xlu2 %2912 }
 0x111   : > { %v4791_v2 = vpop.f32.mrf.mxu0  ;;  %v2060_v23 = vpop.permute.xlu0 %2059 }
 0x112   : > { %5764 = vst [vmem:[#allocation45_spill] sm:$0xff] %v4791_v2  ;;  %v4795_v53 = vpop.f32.mrf.mxu1  ;;  %v2265_v21 = vmul.f32 %v2060_v23, %v1873_v22  ;;  %v2918_v11 = vpop.permute.xlu1 %2917  ;;  %v1963_v23 = vld [vmem:[%s4242_s27 + $0x1a0] sm:$0xff]  ;;  %v2820_v22 = vld [vmem:[%s4297_s23 + $0x198] sm:$0xff]  ;;  %v1877_v2 = vld [vmem:[%s4448_s24 + $0xb0] sm:$0xff] }
 0x113   : > { %2214 = vperm.xlu2 %4128, %v1960_v15   ;;  %3067 = vperm.xlu1 %4127, %v2817_v9   ;;  %v2818_v9 = vld [vmem:[%s4297_s23 + $0x188] sm:$0xff] }
 0x114   : > { %2209 = vperm.xlu0 %4126, %v1959_v31   ;;  %3860 = vmatmul.msk.f32.gmra.mxu0 %vm681_vm0, %v653_v34  ;;  %v654_v31 = vld [vmem:[%s4248_s30 + $0x108] sm:$0xff]  ;;  %v4812_v34 = vpop.f32.mrf.mxu2 }
 0x115   : > { %3904 = vmatmul.msk.f32.gmra.mxu1 %vm681_vm0, %v581_v60  ;;  %4013 = vmatmul.msk.f32.gmra.mxu3 %vm1445_vm1, %v2264_v62  ;;  %5766 = vst [vmem:[#allocation47_spill] sm:$0xff] %v4812_v34  ;;  %v582_v62 = vld [vmem:[%s4412_s19 + $0xa8] sm:$0xff]  ;;  %v1879_v34 = vld [vmem:[%s4448_s24 + $0xc0] sm:$0xff] }
 0x118   : > { %v4803_v0 = vpop.f32.mrf.mxu3  ;;  %4067 = vmatmul.msk.f32.gmra.mxu2 %vm1445_vm1, %v3120_v32  ;;  %v3121_v32 = vmul.f32 %v2908_v58, %v2729_v63  ;;  %v2065_v50 = vpop.permute.xlu2 %2064 }
 0x119   : > { %v4808_v15 = vpop.f32.mrf.mxu0  ;;  %v2266_v58 = vmul.f32 %v2065_v50, %v1874_v12  ;;  %v2923_v4 = vpop.permute.xlu0 %2922  ;;  %v2822_v12 = vld [vmem:[%s4297_s23 + $0x1a8] sm:$0xff] }
 0x11a   : > { %5765 = vst [vmem:[#allocation46_spill] sm:$0xff] %v4808_v15  ;;  %v4814_v60 = vpop.f32.mrf.mxu1  ;;  %v2070_v20 = vpop.permute.xlu1 %2069 }
 0x11b   : > { %3077 = vperm.xlu2 %4128, %v2819_v42   ;;  %2219 = vperm.xlu1 %4127, %v1961_v1   ;;  %v1962_v1 = vld [vmem:[%s4242_s27 + $0x198] sm:$0xff] }
 0x11c   : > { %3072 = vperm.xlu0 %4126, %v2818_v9   ;;  %3861 = vmatmul.msk.f32.gmra.mxu0 %vm681_vm0, %v654_v31  ;;  %v655_v9 = vld [vmem:[%s4248_s30 + $0x110] sm:$0xff] }
 0x11d   : > { %3905 = vmatmul.msk.f32.gmra.mxu1 %vm681_vm0, %v582_v62  ;;  %4014 = vmatmul.msk.f32.gmra.mxu3 %vm1445_vm1, %v2265_v21  ;;  %v583_v62 = vld [vmem:[%s4412_s19 + $0xb0] sm:$0xff]  ;;  %v2730_v21 = vld [vmem:[%s4497_s26 + $0x88] sm:$0xff] }
 0x120   : > { %v4822_v36 = vpop.f32.mrf.mxu3  ;;  %4068 = vmatmul.msk.f32.gmra.mxu2 %vm1445_vm1, %v3121_v32  ;;  %v3122_v32 = vmul.f32 %v2913_v16, %v2730_v21  ;;  %v2267_v16 = vmul.f32 %v2070_v20, %v1875_v56  ;;  %v1966_v56 = vld [vmem:[%s4242_s27 + $0x1b8] sm:$0x1] }
 0x121   : > { %v4827_v42 = vpop.f32.mrf.mxu0  ;;  %v2075_v8 = vpop.permute.xlu0 %2074 }
 0x122   : > { %5767 = vst [vmem:[#allocation48_spill] sm:$0xff] %v4827_v42  ;;  %v4831_v31 = vpop.f32.mrf.mxu1 }
 0x123   : > { %2229 = vperm.xlu2 %4128, %v1963_v23   ;;  %3082 = vperm.xlu1 %4127, %v2820_v22   ;;  %v4835_v63 = vpop.f32.mrf.mxu2  ;;  %v1964_v23 = vld [vmem:[%s4242_s27 + $0x1a8] sm:$0xff] }
 0x124   : > { %2224 = vperm.xlu0 %4126, %v1962_v1   ;;  %3862 = vmatmul.msk.f32.gmra.mxu0 %vm681_vm0, %v655_v9  ;;  %v2821_v1 = vld [vmem:[%s4297_s23 + $0x1a0] sm:$0xff]  ;;  %v656_v9 = vld [vmem:[%s4248_s30 + $0x118] sm:$0xff] }
 0x125   : > { %3906 = vmatmul.msk.f32.gmra.mxu1 %vm681_vm0, %v583_v62  ;;  %4015 = vmatmul.msk.f32.gmra.mxu3 %vm1445_vm1, %v2266_v58  ;;  %v584_v62 = vld [vmem:[%s4412_s19 + $0xb8] sm:$0xff]  ;;  %v2731_v58 = vld [vmem:[%s4497_s26 + $0x90] sm:$0xff] }
 0x128   : > { %v4841_v50 = vpop.f32.mrf.mxu3  ;;  %4069 = vmatmul.msk.f32.gmra.mxu2 %vm1445_vm1, %v3122_v32  ;;  %v2928_v32 = vpop.permute.xlu2 %2927 }
 0x129   : > { %v4846_v22 = vpop.f32.mrf.mxu0 }
 0x12a   : > { %5768 = vst [vmem:[#allocation49_spill] sm:$0xff] %v4846_v22  ;;  %v4850_v42 = vpop.f32.mrf.mxu1  ;;  %v3123_v22 = vmul.f32 %v2918_v11, %v2731_v58  ;;  %v2933_v58 = vpop.permute.xlu1 %2932 }
 0x12b   : > { %5769 = vst [vmem:[#allocation50_spill] sm:$0xff] %v4850_v42  ;;  %3092 = vperm.xlu2 %4128, %v2822_v12   ;;  %2234 = vperm.xlu1 %4127, %v1964_v23   ;;  %v4854_v21 = vpop.f32.mrf.mxu2  ;;  %v2823_v12 = vld [vmem:[%s4297_s23 + $0x1b0] sm:$0xff] }
 0x12c   : > { %3087 = vperm.xlu0 %4126, %v2821_v1   ;;  %3863 = vmatmul.msk.f32.gmra.mxu0 %vm681_vm0, %v656_v9  ;;  %v1965_v1 = vld [vmem:[%s4242_s27 + $0x1b0] sm:$0xff]  ;;  %v657_v9 = vld [vmem:[%s4248_s30 + $0x120] sm:$0xff] }
 0x12d   : > { %3907 = vmatmul.msk.f32.gmra.mxu1 %vm681_vm0, %v584_v62  ;;  %4016 = vmatmul.msk.f32.gmra.mxu3 %vm1445_vm1, %v2267_v16  ;;  %v585_v62 = vld [vmem:[%s4412_s19 + $0xc0] sm:$0xff]  ;;  %v2268_v16 = vmul.f32 %v2075_v8, %v1876_v44  ;;  %v2824_v44 = vld [vmem:[%s4297_s23 + $0x1b8] sm:$0x1]  ;;  %v1402_v42 = vld [vmem:[%s4260_s17 + $0x70] sm:$0xff] }
 0x130   : > { %v4860_v20 = vpop.f32.mrf.mxu3  ;;  %4070 = vmatmul.msk.f32.gmra.mxu2 %vm1445_vm1, %v3123_v22  ;;  %v3124_v22 = vmul.f32 %v2923_v4, %v2732_v29 }
 0x131   : > { %v4865_v23 = vpop.f32.mrf.mxu0 }
 0x132   : > { %5770 = vst [vmem:[#allocation51_spill] sm:$0xff] %v4865_v23  ;;  %v4869_v15 = vpop.f32.mrf.mxu1  ;;  %v2080_v23 = vpop.permute.xlu2 %2079 }
 0x133   : > { %5771 = vst [vmem:[#allocation52_spill] sm:$0xff] %v4869_v15  ;;  %2244 = vperm.xlu2 %4128, %v1966_v56   ;;  %3097 = vperm.xlu1 %4127, %v2823_v12   ;;  %v4873_v11 = vpop.f32.mrf.mxu2  ;;  %v658_v56 = vld [vmem:[%s4248_s30 + $0x128] sm:$0xff] }
 0x134   : > { %2239 = vperm.xlu0 %4126, %v1965_v1   ;;  %3864 = vmatmul.msk.f32.gmra.mxu0 %vm681_vm0, %v657_v9  ;;  %v586_v1 = vld [vmem:[%s4412_s19 + $0xc8] sm:$0xff]  ;;  %v2733_v9 = vld [vmem:[%s4497_s26 + $0xa0] sm:$0xff] }
 0x135   : > { %3908 = vmatmul.msk.f32.gmra.mxu1 %vm681_vm0, %v585_v62  ;;  %4017 = vmatmul.msk.f32.gmra.mxu3 %vm1445_vm1, %v2268_v16  ;;  %v2269_v62 = vmul.f32 %v2080_v23, %v1877_v2  ;;  %v3125_v4 = vmul.f32 %v2928_v32, %v2733_v9  ;;  %v2938_v16 = vpop.permute.xlu0 %2937  ;;  %v659_v23 = vld [vmem:[%s4248_s30 + $0x130] sm:$0xff] }
 0x138   : > { %v4879_v14 = vpop.f32.mrf.mxu3  ;;  %4071 = vmatmul.msk.f32.gmra.mxu2 %vm1445_vm1, %v3124_v22  ;;  %v2085_v22 = vpop.permute.xlu1 %2084 }
 0x139   : > { %v4882_v8 = vpop.f32.mrf.mxu0 }
 0x13a   : > { %5772 = vst [vmem:[#allocation53_spill] sm:$0xff] %v4882_v8  ;;  %v4886_v12 = vpop.f32.mrf.mxu1  ;;  %v1878_v8 = vld [vmem:[%s4448_s24 + $0xb8] sm:$0xff]  ;;  %v2943_v9 = vpop.permute.xlu2 %2942 }
 0x13b   : > { %5773 = vst [vmem:[#allocation54_spill] sm:$0xff] %v4886_v12  ;;  %v4890_v29 = vpop.f32.mrf.mxu2 }
 0x13c   : > { %3102 = vperm.xlu0 %4126, %v2824_v44   ;;  %3865 = vmatmul.msk.f32.gmra.mxu0 %vm681_vm0, %v658_v56  ;;  %v587_v56 = vld [vmem:[%s4412_s19 + $0xd0] sm:$0xff] }
 0x13d   : > { %3909 = vmatmul.msk.f32.gmra.mxu1 %vm681_vm0, %v586_v1  ;;  %4018 = vmatmul.msk.f32.gmra.mxu3 %vm1445_vm1, %v2269_v62  ;;  %v2734_v1 = vld [vmem:[%s4497_s26 + $0xa8] sm:$0xff]  ;;  %v2270_v62 = vmul.f32 %v2085_v22, %v1878_v8  ;;  %v660_v8 = vld [vmem:[%s4248_s30 + $0x138] sm:$0xff] }
 0x140   : > { %v4896_v10 = vpop.f32.mrf.mxu3  ;;  %4072 = vmatmul.msk.f32.gmra.mxu2 %vm1445_vm1, %v3125_v4  ;;  %v3126_v4 = vmul.f32 %v2933_v58, %v2734_v1  ;;  %v2948_v1 = vpop.permute.xlu1 %2947 }
 0x141   : > { %v4899_v2 = vpop.f32.mrf.mxu0 }
 0x142   : > { %5774 = vst [vmem:[#allocation55_spill] sm:$0xff] %v4899_v2  ;;  %v4902_v44 = vpop.f32.mrf.mxu1  ;;  %v2090_v2 = vpop.permute.xlu0 %2089 }
 0x143   : > { %5775 = vst [vmem:[#allocation56_spill] sm:$0xff] %v4902_v44  ;;  %v4906_v32 = vpop.f32.mrf.mxu2 }
 0x144   : > { %3866 = vmatmul.msk.f32.gmra.mxu0 %vm681_vm0, %v659_v23  ;;  %v588_v23 = vld [vmem:[%s4412_s19 + $0xd8] sm:$0xff] }
 0x145   : > { %3910 = vmatmul.msk.f32.gmra.mxu1 %vm681_vm0, %v587_v56  ;;  %4019 = vmatmul.msk.f32.gmra.mxu3 %vm1445_vm1, %v2270_v62  ;;  %v2735_v56 = vld [vmem:[%s4497_s26 + $0xb0] sm:$0xff]  ;;  %v2271_v62 = vmul.f32 %v2090_v2, %v1879_v34  ;;  %v661_v34 = vld [vmem:[%s4248_s30 + $0x140] sm:$0xff] }
 0x146   : > { %v3127_v58 = vmul.f32 %v2938_v16, %v2735_v56 }
 0x148   : > { %v4912_v13 = vpop.f32.mrf.mxu3  ;;  %4073 = vmatmul.msk.f32.gmra.mxu2 %vm1445_vm1, %v3126_v4  ;;  %v2095_v4 = vpop.permute.xlu2 %2094 }
 0x149   : > { %5776 = vst [vmem:[#allocation57_spill] sm:$0xff] %v4912_v13  ;;  %v4915_v51 = vpop.f32.mrf.mxu0 }
 0x14a   : > { %5777 = vst [vmem:[#allocation58_spill] sm:$0xff] %v4915_v51  ;;  %v4918_v22 = vpop.f32.mrf.mxu1  ;;  %v1880_v51 = vld [vmem:[%s4448_s24 + $0xc8] sm:$0xff] }
 0x14b   : > { %5778 = vst [vmem:[#allocation59_spill] sm:$0xff] %v4918_v22  ;;  %v4922_v27 = vpop.f32.mrf.mxu2 }
 0x14c   : > { %3867 = vmatmul.msk.f32.gmra.mxu0 %vm681_vm0, %v660_v8  ;;  %v589_v8 = vld [vmem:[%s4412_s19 + $0xe0] sm:$0xff] }
 0x14d   : > { %3911 = vmatmul.msk.f32.gmra.mxu1 %vm681_vm0, %v588_v23  ;;  %4020 = vmatmul.msk.f32.gmra.mxu3 %vm1445_vm1, %v2271_v62  ;;  %v2736_v23 = vld [vmem:[%s4497_s26 + $0xb8] sm:$0xff]  ;;  %v2272_v62 = vmul.f32 %v2095_v4, %v1880_v51  ;;  %v662_v51 = vld [vmem:[%s4248_s30 + $0x148] sm:$0xff] }
 0x14e   : > { %v3128_v56 = vmul.f32 %v2943_v9, %v2736_v23 }
 0x150   : > { %v4928_v48 = vpop.f32.mrf.mxu3  ;;  %4074 = vmatmul.msk.f32.gmra.mxu2 %vm1445_vm1, %v3127_v58  ;;  %v2953_v58 = vpop.permute.xlu0 %2952 }
 0x151   : > { %5779 = vst [vmem:[#allocation60_spill] sm:$0xff] %v4928_v48  ;;  %v4931_v28 = vpop.f32.mrf.mxu0  ;;  %v2958_v23 = vpop.permute.xlu2 %2957 }
 0x152   : > { %5780 = vst [vmem:[#allocation61_spill] sm:$0xff] %v4931_v28  ;;  %v4934_v2 = vpop.f32.mrf.mxu1  ;;  %v2100_v28 = vpop.permute.xlu1 %2099 }
 0x153   : > { %5781 = vst [vmem:[#allocation62_spill] sm:$0xff] %v4934_v2  ;;  %v4938_v16 = vpop.f32.mrf.mxu2 }
 0x154   : > { %5782 = vst [vmem:[#allocation63_spill] sm:$0xff] %v4938_v16  ;;  %3868 = vmatmul.msk.f32.gmra.mxu0 %vm681_vm0, %v661_v34  ;;  %v590_v34 = vld [vmem:[%s4412_s19 + $0xe8] sm:$0xff]  ;;  %v1403_v16 = vld [vmem:[%s4260_s17 + $0x78] sm:$0xff] }
 0x155   : > { %3912 = vmatmul.msk.f32.gmra.mxu1 %vm681_vm0, %v589_v8  ;;  %4021 = vmatmul.msk.f32.gmra.mxu3 %vm1445_vm1, %v2272_v62  ;;  %v2737_v8 = vld [vmem:[%s4497_s26 + $0xc0] sm:$0xff]  ;;  %v2273_v62 = vmul.f32 %v2100_v28, %v1881_v52  ;;  %v663_v28 = vld [vmem:[%s4248_s30 + $0x150] sm:$0xff] }
 0x158   : > { %v4944_v22 = vpop.f32.mrf.mxu3  ;;  %4075 = vmatmul.msk.f32.gmra.mxu2 %vm1445_vm1, %v3128_v56  ;;  %v3129_v56 = vmul.f32 %v2948_v1, %v2737_v8 }
 0x159   : > { %5783 = vst [vmem:[#allocation64_spill] sm:$0xff] %v4944_v22  ;;  %v4947_v2 = vpop.f32.mrf.mxu0  ;;  %v1884_v22 = vld [vmem:[%s4448_s24 + $0xe8] sm:$0xff] }
 0x15a   : > { %5784 = vst [vmem:[#allocation65_spill] sm:$0xff] %v4947_v2  ;;  %v4950_v4 = vpop.f32.mrf.mxu1  ;;  %v2105_v2 = vpop.permute.xlu0 %2104 }
 0x15b   : > { %5785 = vst [vmem:[#allocation66_spill] sm:$0xff] %v4950_v4  ;;  %v4954_v9 = vpop.f32.mrf.mxu2  ;;  %v2963_v8 = vpop.permute.xlu1 %2962 }
 0x15c   : > { %5786 = vst [vmem:[#allocation67_spill] sm:$0xff] %v4954_v9  ;;  %3869 = vmatmul.msk.f32.gmra.mxu0 %vm681_vm0, %v662_v51  ;;  %v591_v51 = vld [vmem:[%s4412_s19 + $0xf0] sm:$0xff] }
 0x15d   : > { %3913 = vmatmul.msk.f32.gmra.mxu1 %vm681_vm0, %v590_v34  ;;  %4022 = vmatmul.msk.f32.gmra.mxu3 %vm1445_vm1, %v2273_v62  ;;  %v2738_v34 = vld [vmem:[%s4497_s26 + $0xc8] sm:$0xff]  ;;  %v2274_v62 = vmul.f32 %v2105_v2, %v1882_v46  ;;  %v664_v46 = vld [vmem:[%s4248_s30 + $0x158] sm:$0xff] }
 0x15e   : > { %v3130_v1 = vmul.f32 %v2953_v58, %v2738_v34 }
 0x160   : > { %v4960_v39 = vpop.f32.mrf.mxu3  ;;  %4076 = vmatmul.msk.f32.gmra.mxu2 %vm1445_vm1, %v3129_v56  ;;  %v2110_v56 = vpop.permute.xlu2 %2109 }
 0x161   : > { %5787 = vst [vmem:[#allocation68_spill] sm:$0xff] %v4960_v39  ;;  %v4963_v4 = vpop.f32.mrf.mxu0  ;;  %v1883_v39 = vld [vmem:[%s4448_s24 + $0xe0] sm:$0xff] }
 0x162   : > { %v4966_v52 = vpop.f32.mrf.mxu1 }
 0x163   : > { %5788 = vst [vmem:[#allocation69_spill] sm:$0xff] %v4966_v52  ;;  %v4970_v44 = vpop.f32.mrf.mxu2 }
 0x164   : > { %5789 = vst [vmem:[#allocation70_spill] sm:$0xff] %v4970_v44  ;;  %3870 = vmatmul.msk.f32.gmra.mxu0 %vm681_vm0, %v663_v28  ;;  %v592_v28 = vld [vmem:[%s4412_s19 + $0xf8] sm:$0xff] }
 0x165   : > { %3914 = vmatmul.msk.f32.gmra.mxu1 %vm681_vm0, %v591_v51  ;;  %4023 = vmatmul.msk.f32.gmra.mxu3 %vm1445_vm1, %v2274_v62  ;;  %v2739_v51 = vld [vmem:[%s4497_s26 + $0xd0] sm:$0xff]  ;;  %v2275_v62 = vmul.f32 %v2110_v56, %v1883_v39  ;;  %v1388_v39 = vld [vmem:[%s4260_s17] sm:$0xff] }
 0x166   : > { %v3131_v34 = vmul.f32 %v2958_v23, %v2739_v51 }
 0x168   : > { %v4976_v6 = vpop.f32.mrf.mxu3  ;;  %4077 = vmatmul.msk.f32.gmra.mxu2 %vm1445_vm1, %v3130_v1  ;;  %v2968_v1 = vpop.permute.xlu0 %2967 }
 0x169   : > { %5790 = vst [vmem:[#allocation71_spill] sm:$0xff] %v4976_v6  ;;  %v4979_v52 = vpop.f32.mrf.mxu0  ;;  %v2115_v6 = vpop.permute.xlu1 %2114 }
 0x16a   : > { %v4982_v2 = vpop.f32.mrf.mxu1  ;;  %v2973_v51 = vpop.permute.xlu2 %2972 }
 0x16b   : > { %5791 = vst [vmem:[#allocation72_spill] sm:$0xff] %v4982_v2  ;;  %v4986_v58 = vpop.f32.mrf.mxu2 }
 0x16c   : > { %5792 = vst [vmem:[#allocation73_spill] sm:$0xff] %v4986_v58  ;;  %3871 = vmatmul.msk.f32.gmra.mxu0 %vm681_vm0, %v664_v46  ;;  %v593_v46 = vld [vmem:[%s4412_s19 + $0x100] sm:$0xff]  ;;  %v1885_v58 = vld [vmem:[%s4448_s24 + $0xf0] sm:$0xff] }
 0x16d   : > { %3915 = vmatmul.msk.f32.gmra.mxu1 %vm681_vm0, %v592_v28  ;;  %4024 = vmatmul.msk.f32.gmra.mxu3 %vm1445_vm1, %v2275_v62  ;;  %v2740_v28 = vld [vmem:[%s4497_s26 + $0xd8] sm:$0xff]  ;;  %v2276_v62 = vmul.f32 %v2115_v6, %v1884_v22  ;;  %v1389_v6 = vld [vmem:[%s4260_s17 + $0x8] sm:$0xff] }
 0x170   : > { %v4992_v37 = vpop.f32.mrf.mxu3  ;;  %4078 = vmatmul.msk.f32.gmra.mxu2 %vm1445_vm1, %v3131_v34  ;;  %v3132_v34 = vmul.f32 %v2963_v8, %v2740_v28 }
 0x171   : > { %5793 = vst [vmem:[#allocation74_spill] sm:$0xff] %v4992_v37  ;;  %v4995_v2 = vpop.f32.mrf.mxu0  ;;  %v2120_v37 = vpop.permute.xlu0 %2119 }
 0x172   : > { %v4998_v56 = vpop.f32.mrf.mxu1  ;;  %v2978_v28 = vpop.permute.xlu1 %2977 }
 0x173   : > { %5794 = vst [vmem:[#allocation75_spill] sm:$0xff] %v4998_v56  ;;  %v5002_v23 = vpop.f32.mrf.mxu2 }
 0x174   : > { %5795 = vst [vmem:[#allocation76_spill] sm:$0xff] %v5002_v23  ;;  %3940 = vmatmul.msk.f32.vlgmr.msrb.gmra.mxu0 %vm1445_vm1, %v1388_v39  ;;  %v594_v39 = vld [vmem:[%s4412_s19 + $0x108] sm:$0xff] }
 0x175   : > { %3916 = vmatmul.msk.f32.gmra.mxu1 %vm681_vm0, %v593_v46  ;;  %4025 = vmatmul.msk.f32.gmra.mxu3 %vm1445_vm1, %v2276_v62  ;;  %v2741_v46 = vld [vmem:[%s4497_s26 + $0xe0] sm:$0xff]  ;;  %v2277_v62 = vmul.f32 %v2120_v37, %v1885_v58  ;;  %v1390_v37 = vld [vmem:[%s4260_s17 + $0x10] sm:$0xff] }
 0x176   : > { %v3133_v8 = vmul.f32 %v2968_v1, %v2741_v46 }
 0x178   : > { %v5008_v12 = vpop.f32.mrf.mxu3  ;;  %4079 = vmatmul.msk.f32.gmra.mxu2 %vm1445_vm1, %v3132_v34  ;;  %v2125_v34 = vpop.permute.xlu2 %2124 }
 0x179   : > { %5796 = vst [vmem:[#allocation77_spill] sm:$0xff] %v5008_v12  ;;  %v5011_v56 = vpop.f32.mrf.mxu0  ;;  %v1886_v12 = vld [vmem:[%s4448_s24 + $0xf8] sm:$0xff] }
 0x17a   : > { %v5014_v22 = vpop.f32.mrf.mxu1 }
 0x17b   : > { %5797 = vst [vmem:[#allocation78_spill] sm:$0xff] %v5014_v22  ;;  %v5018_v23 = vpop.f32.mrf.mxu2 }
 0x17c   : > { %5798 = vst [vmem:[#allocation79_spill] sm:$0xff] %v5018_v23  ;;  %3941 = vmatmul.msk.f32.gmra.mxu0 %vm1445_vm1, %v1389_v6  ;;  %v595_v6 = vld [vmem:[%s4412_s19 + $0x110] sm:$0xff]  ;;  %v1887_v23 = vld [vmem:[%s4448_s24 + $0x100] sm:$0xff] }
 0x17d   : > { %3917 = vmatmul.msk.f32.gmra.mxu1 %vm681_vm0, %v594_v39  ;;  %4026 = vmatmul.msk.f32.gmra.mxu3 %vm1445_vm1, %v2277_v62  ;;  %v2742_v39 = vld [vmem:[%s4497_s26 + $0xe8] sm:$0xff]  ;;  %v2278_v62 = vmul.f32 %v2125_v34, %v1886_v12  ;;  %v1391_v12 = vld [vmem:[%s4260_s17 + $0x18] sm:$0xff] }
 0x17e   : > { %v3134_v46 = vmul.f32 %v2973_v51, %v2742_v39 }
 0x180   : > { %v5024_v45 = vpop.f32.mrf.mxu3  ;;  %4080 = vmatmul.msk.f32.gmra.mxu2 %vm1445_vm1, %v3133_v8  ;;  %v2983_v8 = vpop.permute.xlu0 %2982 }
 0x181   : > { %5799 = vst [vmem:[#allocation80_spill] sm:$0xff] %v5024_v45  ;;  %v5027_v22 = vpop.f32.mrf.mxu0  ;;  %v2130_v45 = vpop.permute.xlu1 %2129 }
 0x182   : > { %v5030_v58 = vpop.f32.mrf.mxu1  ;;  %v2988_v39 = vpop.permute.xlu2 %2987 }
 0x183   : > { %5800 = vst [vmem:[#allocation81_spill] sm:$0xff] %v5030_v58  ;;  %v5034_v1 = vpop.f32.mrf.mxu2 }
 0x184   : > { %5801 = vst [vmem:[#allocation82_spill] sm:$0xff] %v5034_v1  ;;  %3942 = vmatmul.msk.f32.gmra.mxu0 %vm1445_vm1, %v1390_v37  ;;  %v596_v37 = vld [vmem:[%s4412_s19 + $0x118] sm:$0xff]  ;;  %v1888_v1 = vld [vmem:[%s4448_s24 + $0x108] sm:$0xff] }
 0x185   : > { %3918 = vmatmul.msk.f32.gmra.mxu1 %vm681_vm0, %v595_v6  ;;  %4027 = vmatmul.msk.f32.gmra.mxu3 %vm1445_vm1, %v2278_v62  ;;  %v2743_v6 = vld [vmem:[%s4497_s26 + $0xf0] sm:$0xff]  ;;  %v2279_v62 = vmul.f32 %v2130_v45, %v1887_v23  ;;  %v1392_v45 = vld [vmem:[%s4260_s17 + $0x20] sm:$0xff] }
 0x188   : > { %v5040_v44 = vpop.f32.mrf.mxu3  ;;  %4081 = vmatmul.msk.f32.gmra.mxu2 %vm1445_vm1, %v3134_v46  ;;  %v3135_v46 = vmul.f32 %v2978_v28, %v2743_v6 }
 0x189   : > { %5802 = vst [vmem:[#allocation83_spill] sm:$0xff] %v5040_v44  ;;  %v5043_v58 = vpop.f32.mrf.mxu0  ;;  %v2135_v44 = vpop.permute.xlu0 %2134 }
 0x18a   : > { %v5046_v34 = vpop.f32.mrf.mxu1  ;;  %v2993_v6 = vpop.permute.xlu1 %2992 }
 0x18b   : > { %5803 = vst [vmem:[#allocation84_spill] sm:$0xff] %v5046_v34  ;;  %v5050_v51 = vpop.f32.mrf.mxu2 }
 0x18c   : > { %5804 = vst [vmem:[#allocation85_spill] sm:$0xff] %v5050_v51  ;;  %3943 = vmatmul.msk.f32.gmra.mxu0 %vm1445_vm1, %v1391_v12  ;;  %v597_v12 = vld [vmem:[%s4412_s19 + $0x120] sm:$0xff] }
 0x18d   : > { %3919 = vmatmul.msk.f32.gmra.mxu1 %vm681_vm0, %v596_v37  ;;  %4028 = vmatmul.msk.f32.gmra.mxu3 %vm1445_vm1, %v2279_v62  ;;  %v2744_v37 = vld [vmem:[%s4497_s26 + $0xf8] sm:$0xff]  ;;  %v2280_v62 = vmul.f32 %v2135_v44, %v1888_v1  ;;  %v1393_v44 = vld [vmem:[%s4260_s17 + $0x28] sm:$0xff] }
 0x18e   : > { %v3136_v28 = vmul.f32 %v2983_v8, %v2744_v37 }
 0x190   : > { %v5056_v48 = vpop.f32.mrf.mxu3  ;;  %4082 = vmatmul.msk.f32.gmra.mxu2 %vm1445_vm1, %v3135_v46  ;;  %v2140_v46 = vpop.permute.xlu2 %2139 }
 0x191   : > { %5805 = vst [vmem:[#allocation86_spill] sm:$0xff] %v5056_v48  ;;  %v5059_v34 = vpop.f32.mrf.mxu0  ;;  %v1889_v48 = vld [vmem:[%s4448_s24 + $0x110] sm:$0xff] }
 0x192   : > { %v5062_v23 = vpop.f32.mrf.mxu1 }
 0x193   : > { %5806 = vst [vmem:[#allocation87_spill] sm:$0xff] %v5062_v23  ;;  %v5066_v51 = vpop.f32.mrf.mxu2 }
 0x194   : > { %5807 = vst [vmem:[#allocation88_spill] sm:$0xff] %v5066_v51  ;;  %3944 = vmatmul.msk.f32.gmra.mxu0 %vm1445_vm1, %v1392_v45  ;;  %v598_v45 = vld [vmem:[%s4412_s19 + $0x128] sm:$0xff]  ;;  %v1890_v51 = vld [vmem:[%s4448_s24 + $0x118] sm:$0xff] }
 0x195   : > { %3920 = vmatmul.msk.f32.gmra.mxu1 %vm681_vm0, %v597_v12  ;;  %4029 = vmatmul.msk.f32.gmra.mxu3 %vm1445_vm1, %v2280_v62  ;;  %v2745_v12 = vld [vmem:[%s4497_s26 + $0x100] sm:$0xff]  ;;  %v2281_v62 = vmul.f32 %v2140_v46, %v1889_v48  ;;  %v1394_v48 = vld [vmem:[%s4260_s17 + $0x30] sm:$0xff] }
 0x196   : > { %v3137_v37 = vmul.f32 %v2988_v39, %v2745_v12 }
 0x198   : > { %v5072_v59 = vpop.f32.mrf.mxu3  ;;  %4083 = vmatmul.msk.f32.gmra.mxu2 %vm1445_vm1, %v3136_v28  ;;  %v2998_v28 = vpop.permute.xlu0 %2997 }
 0x199   : > { %5808 = vst [vmem:[#allocation89_spill] sm:$0xff] %v5072_v59  ;;  %v5075_v23 = vpop.f32.mrf.mxu0  ;;  %v2145_v59 = vpop.permute.xlu1 %2144 }
 0x19a   : > { %v5078_v1 = vpop.f32.mrf.mxu1  ;;  %v3003_v12 = vpop.permute.xlu2 %3002 }
 0x19b   : > { %5809 = vst [vmem:[#allocation90_spill] sm:$0xff] %v5078_v1  ;;  %v5082_v8 = vpop.f32.mrf.mxu2 }
 0x19c   : > { %5810 = vst [vmem:[#allocation91_spill] sm:$0xff] %v5082_v8  ;;  %3945 = vmatmul.msk.f32.gmra.mxu0 %vm1445_vm1, %v1393_v44  ;;  %v599_v44 = vld [vmem:[%s4412_s19 + $0x130] sm:$0xff]  ;;  %v1891_v8 = vld [vmem:[%s4448_s24 + $0x120] sm:$0xff] }
 0x19d   : > { %3921 = vmatmul.msk.f32.gmra.mxu1 %vm681_vm0, %v598_v45  ;;  %4030 = vmatmul.msk.f32.gmra.mxu3 %vm1445_vm1, %v2281_v62  ;;  %v2746_v45 = vld [vmem:[%s4497_s26 + $0x108] sm:$0xff]  ;;  %v2282_v62 = vmul.f32 %v2145_v59, %v1890_v51  ;;  %v1395_v59 = vld [vmem:[%s4260_s17 + $0x38] sm:$0xff] }
 0x1a0   : > { %v5088_v15 = vpop.f32.mrf.mxu3  ;;  %4084 = vmatmul.msk.f32.gmra.mxu2 %vm1445_vm1, %v3137_v37  ;;  %v3138_v37 = vmul.f32 %v2993_v6, %v2746_v45 }
 0x1a1   : > { %5811 = vst [vmem:[#allocation92_spill] sm:$0xff] %v5088_v15  ;;  %v5091_v1 = vpop.f32.mrf.mxu0  ;;  %v2150_v15 = vpop.permute.xlu0 %2149 }
 0x1a2   : > { %5812 = vst [vmem:[#allocation93_spill] sm:$0xff] %v5091_v1  ;;  %v5094_v46 = vpop.f32.mrf.mxu1  ;;  %v3008_v45 = vpop.permute.xlu1 %3007 }
 0x1a3   : > { %5813 = vst [vmem:[#allocation94_spill] sm:$0xff] %v5094_v46  ;;  %v5098_v39 = vpop.f32.mrf.mxu2 }
 0x1a4   : > { %5814 = vst [vmem:[#allocation95_spill] sm:$0xff] %v5098_v39  ;;  %3946 = vmatmul.msk.f32.gmra.mxu0 %vm1445_vm1, %v1394_v48  ;;  %v600_v48 = vld [vmem:[%s4412_s19 + $0x138] sm:$0xff] }
 0x1a5   : > { %3922 = vmatmul.msk.f32.gmra.mxu1 %vm681_vm0, %v599_v44  ;;  %4031 = vmatmul.msk.f32.gmra.mxu3 %vm1445_vm1, %v2282_v62  ;;  %v2747_v44 = vld [vmem:[%s4497_s26 + $0x110] sm:$0xff]  ;;  %v2283_v62 = vmul.f32 %v2150_v15, %v1891_v8  ;;  %v1396_v15 = vld [vmem:[%s4260_s17 + $0x40] sm:$0xff] }
 0x1a6   : > { %v3139_v6 = vmul.f32 %v2998_v28, %v2747_v44 }
 0x1a8   : > { %v5104_v19 = vpop.f32.mrf.mxu3  ;;  %4085 = vmatmul.msk.f32.gmra.mxu2 %vm1445_vm1, %v3138_v37  ;;  %v2155_v37 = vpop.permute.xlu2 %2154 }
 0x1a9   : > { %5815 = vst [vmem:[#allocation96_spill] sm:$0xff] %v5104_v19  ;;  %v5107_v46 = vpop.f32.mrf.mxu0  ;;  %v1892_v19 = vld [vmem:[%s4448_s24 + $0x128] sm:$0xff] }
 0x1aa   : > { %5816 = vst [vmem:[#allocation97_spill] sm:$0xff] %v5107_v46  ;;  %v5110_v51 = vpop.f32.mrf.mxu1 }
 0x1ab   : > { %5817 = vst [vmem:[#allocation98_spill] sm:$0xff] %v5110_v51  ;;  %v5114_v39 = vpop.f32.mrf.mxu2 }
 0x1ac   : > { %5818 = vst [vmem:[#allocation99_spill] sm:$0xff] %v5114_v39  ;;  %3947 = vmatmul.msk.f32.gmra.mxu0 %vm1445_vm1, %v1395_v59  ;;  %v601_v59 = vld [vmem:[%s4412_s19 + $0x140] sm:$0xff]  ;;  %v1893_v39 = vld [vmem:[%s4448_s24 + $0x130] sm:$0xff] }
 0x1ad   : > { %3923 = vmatmul.msk.f32.gmra.mxu1 %vm681_vm0, %v600_v48  ;;  %4032 = vmatmul.msk.f32.gmra.mxu3 %vm1445_vm1, %v2283_v62  ;;  %v2748_v48 = vld [vmem:[%s4497_s26 + $0x118] sm:$0xff]  ;;  %v2284_v62 = vmul.f32 %v2155_v37, %v1892_v19  ;;  %v1397_v19 = vld [vmem:[%s4260_s17 + $0x48] sm:$0xff] }
 0x1ae   : > { %v3140_v44 = vmul.f32 %v3003_v12, %v2748_v48 }
 0x1b0   : > { %v5120_v46 = vpop.f32.mrf.mxu3  ;;  %4086 = vmatmul.msk.f32.gmra.mxu2 %vm1445_vm1, %v3139_v6  ;;  %v3013_v6 = vpop.permute.xlu0 %3012 }
 0x1b1   : > { %5819 = vst [vmem:[#allocation100_spill] sm:$0xff] %v5120_v46  ;;  %v5123_v51 = vpop.f32.mrf.mxu0  ;;  %v2160_v46 = vpop.permute.xlu1 %2159 }
 0x1b2   : > { %5820 = vst [vmem:[#allocation101_spill] sm:$0xff] %v5123_v51  ;;  %v5126_v8 = vpop.f32.mrf.mxu1  ;;  %v3018_v48 = vpop.permute.xlu2 %3017 }
 0x1b3   : > { %5821 = vst [vmem:[#allocation102_spill] sm:$0xff] %v5126_v8  ;;  %v5130_v28 = vpop.f32.mrf.mxu2 }
 0x1b4   : > { %5822 = vst [vmem:[#allocation103_spill] sm:$0xff] %v5130_v28  ;;  %3948 = vmatmul.msk.f32.gmra.mxu0 %vm1445_vm1, %v1396_v15  ;;  %v602_v15 = vld [vmem:[%s4412_s19 + $0x148] sm:$0xff]  ;;  %v1894_v28 = vld [vmem:[%s4448_s24 + $0x138] sm:$0xff] }
 0x1b5   : > { %3924 = vmatmul.msk.f32.gmra.mxu1 %vm681_vm0, %v601_v59  ;;  %4033 = vmatmul.msk.f32.gmra.mxu3 %vm1445_vm1, %v2284_v62  ;;  %v2749_v59 = vld [vmem:[%s4497_s26 + $0x120] sm:$0xff]  ;;  %v2285_v62 = vmul.f32 %v2160_v46, %v1893_v39  ;;  %v1398_v46 = vld [vmem:[%s4260_s17 + $0x50] sm:$0xff] }
 0x1b8   : > { %v5136_v51 = vpop.f32.mrf.mxu3  ;;  %4087 = vmatmul.msk.f32.gmra.mxu2 %vm1445_vm1, %v3140_v44  ;;  %v3141_v44 = vmul.f32 %v3008_v45, %v2749_v59 }
 0x1b9   : > { %5823 = vst [vmem:[#allocation104_spill] sm:$0xff] %v5136_v51  ;;  %v5139_v8 = vpop.f32.mrf.mxu0  ;;  %v2165_v51 = vpop.permute.xlu0 %2164 }
 0x1ba   : > { %5824 = vst [vmem:[#allocation105_spill] sm:$0xff] %v5139_v8  ;;  %v5142_v37 = vpop.f32.mrf.mxu1  ;;  %v3023_v59 = vpop.permute.xlu1 %3022 }
 0x1bb   : > { %5825 = vst [vmem:[#allocation106_spill] sm:$0xff] %v5142_v37  ;;  %v5146_v12 = vpop.f32.mrf.mxu2 }
 0x1bc   : > { %5826 = vst [vmem:[#allocation107_spill] sm:$0xff] %v5146_v12  ;;  %3949 = vmatmul.msk.f32.gmra.mxu0 %vm1445_vm1, %v1397_v19  ;;  %v603_v19 = vld [vmem:[%s4412_s19 + $0x150] sm:$0xff] }
 0x1bd   : > { %3925 = vmatmul.msk.f32.gmra.mxu1 %vm681_vm0, %v602_v15  ;;  %4034 = vmatmul.msk.f32.gmra.mxu3 %vm1445_vm1, %v2285_v62  ;;  %v2750_v15 = vld [vmem:[%s4497_s26 + $0x128] sm:$0xff]  ;;  %v2286_v62 = vmul.f32 %v2165_v51, %v1894_v28  ;;  %v1399_v51 = vld [vmem:[%s4260_s17 + $0x58] sm:$0xff] }
 0x1be   : > { %v3142_v45 = vmul.f32 %v3013_v6, %v2750_v15 }
 0x1c0   : > { %v5152_v8 = vpop.f32.mrf.mxu3  ;;  %4088 = vmatmul.msk.f32.gmra.mxu2 %vm1445_vm1, %v3141_v44  ;;  %v2170_v44 = vpop.permute.xlu2 %2169 }
 0x1c1   : > { %5827 = vst [vmem:[#allocation108_spill] sm:$0xff] %v5152_v8  ;;  %v5155_v37 = vpop.f32.mrf.mxu0  ;;  %v1895_v8 = vld [vmem:[%s4448_s24 + $0x140] sm:$0xff] }
 0x1c2   : > { %5828 = vst [vmem:[#allocation109_spill] sm:$0xff] %v5155_v37  ;;  %v5158_v39 = vpop.f32.mrf.mxu1 }
 0x1c3   : > { %v5162_v12 = vpop.f32.mrf.mxu2 }
 0x1c4   : > { %5829 = vst [vmem:[#allocation110_spill] sm:$0xff] %v5162_v12  ;;  %3950 = vmatmul.msk.f32.gmra.mxu0 %vm1445_vm1, %v1398_v46  ;;  %v604_v46 = vld [vmem:[%s4412_s19 + $0x158] sm:$0xff]  ;;  %v1896_v12 = vld [vmem:[%s4448_s24 + $0x148] sm:$0xff] }
 0x1c5   : > { %3926 = vmatmul.msk.f32.gmra.mxu1 %vm681_vm0, %v603_v19  ;;  %4035 = vmatmul.msk.f32.gmra.mxu3 %vm1445_vm1, %v2286_v62  ;;  %v2751_v19 = vld [vmem:[%s4497_s26 + $0x130] sm:$0xff]  ;;  %v2287_v62 = vmul.f32 %v2170_v44, %v1895_v8  ;;  %v1400_v8 = vld [vmem:[%s4260_s17 + $0x60] sm:$0xff] }
 0x1c6   : > { %v3143_v15 = vmul.f32 %v3018_v48, %v2751_v19 }
 0x1c8   : > { %v5168_v37 = vpop.f32.mrf.mxu3  ;;  %4089 = vmatmul.msk.f32.gmra.mxu2 %vm1445_vm1, %v3142_v45  ;;  %v3028_v45 = vpop.permute.xlu0 %3027 }
 0x1c9   : > { %5830 = vst [vmem:[#allocation111_spill] sm:$0xff] %v5168_v37  ;;  %v5171_v9 = vpop.f32.mrf.mxu0  ;;  %v2175_v37 = vpop.permute.xlu1 %2174 }
 0x1ca   : > { %5831 = vst [vmem:[#allocation112_spill] sm:$0xff] %v5171_v9  ;;  %v5174_v28 = vpop.f32.mrf.mxu1  ;;  %v3033_v19 = vpop.permute.xlu2 %3032 }
 0x1cb   : > { %v5178_v6 = vpop.f32.mrf.mxu2 }
 0x1cc   : > { %5832 = vst [vmem:[#allocation113_spill] sm:$0xff] %v5178_v6  ;;  %3951 = vmatmul.msk.f32.gmra.mxu0 %vm1445_vm1, %v1399_v51  ;;  %v605_v51 = vld [vmem:[%s4412_s19 + $0x160] sm:$0xff]  ;;  %v1897_v6 = vld [vmem:[%s4448_s24 + $0x150] sm:$0xff] }
 0x1cd   : > { %3927 = vmatmul.msk.f32.gmra.mxu1 %vm681_vm0, %v604_v46  ;;  %4036 = vmatmul.msk.f32.gmra.mxu3 %vm1445_vm1, %v2287_v62  ;;  %v2752_v46 = vld [vmem:[%s4497_s26 + $0x138] sm:$0xff]  ;;  %v2288_v62 = vmul.f32 %v2175_v37, %v1896_v12  ;;  %v1401_v37 = vld [vmem:[%s4260_s17 + $0x68] sm:$0xff] }
 0x1d0   : > { %v5184_v9 = vpop.f32.mrf.mxu3  ;;  %4090 = vmatmul.msk.f32.gmra.mxu2 %vm1445_vm1, %v3143_v15  ;;  %v3144_v15 = vmul.f32 %v3023_v59, %v2752_v46 }
 0x1d1   : > { %5833 = vst [vmem:[#allocation114_spill] sm:$0xff] %v5184_v9  ;;  %v5187_v13 = vpop.f32.mrf.mxu0  ;;  %v2180_v9 = vpop.permute.xlu0 %2179 }
 0x1d2   : > { %5834 = vst [vmem:[#allocation115_spill] sm:$0xff] %v5187_v13  ;;  %v5190_v44 = vpop.f32.mrf.mxu1  ;;  %v3038_v46 = vpop.permute.xlu1 %3037 }
 0x1d3   : > { %v5194_v48 = vpop.f32.mrf.mxu2 }
 0x1d4   : > { %5835 = vst [vmem:[#allocation116_spill] sm:$0xff] %v5194_v48  ;;  %3952 = vmatmul.msk.f32.gmra.mxu0 %vm1445_vm1, %v1400_v8  ;;  %v606_v8 = vld [vmem:[%s4412_s19 + $0x168] sm:$0xff] }
 0x1d5   : > { %3928 = vmatmul.msk.f32.gmra.mxu1 %vm681_vm0, %v605_v51  ;;  %4037 = vmatmul.msk.f32.gmra.mxu3 %vm1445_vm1, %v2288_v62  ;;  %v2753_v51 = vld [vmem:[%s4497_s26 + $0x140] sm:$0xff]  ;;  %v2289_v62 = vmul.f32 %v2180_v9, %v1897_v6  ;;  %v607_v6 = vld [vmem:[%s4412_s19 + $0x170] sm:$0xff] }
 0x1d6   : > { %v3145_v59 = vmul.f32 %v3028_v45, %v2753_v51 }
 0x1d8   : > { %v5200_v13 = vpop.f32.mrf.mxu3  ;;  %4091 = vmatmul.msk.f32.gmra.mxu2 %vm1445_vm1, %v3144_v15  ;;  %v2185_v15 = vpop.permute.xlu2 %2184 }
 0x1d9   : > { %5836 = vst [vmem:[#allocation117_spill] sm:$0xff] %v5200_v13  ;;  %v5203_v1 = vpop.f32.mrf.mxu0  ;;  %v1898_v13 = vld [vmem:[%s4448_s24 + $0x158] sm:$0xff]  ;;  %v3043_v51 = vpop.permute.xlu0 %3042 }
 0x1da   : > { %5837 = vst [vmem:[#allocation118_spill] sm:$0xff] %v5203_v1  ;;  %v5206_v12 = vpop.f32.mrf.mxu1 }
 0x1db   : > { %v5210_v48 = vpop.f32.mrf.mxu2 }
 0x1dc   : > { %5838 = vst [vmem:[#allocation119_spill] sm:$0xff] %v5210_v48  ;;  %3953 = vmatmul.msk.f32.gmra.mxu0 %vm1445_vm1, %v1401_v37  ;;  %v2754_v37 = vld [vmem:[%s4497_s26 + $0x148] sm:$0xff]  ;;  %v1899_v48 = vld [vmem:[%s4448_s24 + $0x160] sm:$0xff] }
 0x1dd   : > { %3929 = vmatmul.msk.f32.gmra.mxu1 %vm681_vm0, %v606_v8  ;;  %4038 = vmatmul.msk.f32.gmra.mxu3 %vm1445_vm1, %v2289_v62  ;;  %v2290_v8 = vmul.f32 %v2185_v15, %v1898_v13  ;;  %v3146_v45 = vmul.f32 %v3033_v19, %v2754_v37  ;;  %v608_v15 = vld [vmem:[%s4412_s19 + $0x178] sm:$0xff]  ;;  %v1299_v19 = vadd.f32 %v5158_v39, %v4963_v4  ;;  %v1404_v4 = vld [vmem:[%s4260_s17 + $0x80] sm:$0xff] }
 0x1e0   : > { %v2567_v1 = vpop.f32.mrf.mxu3  ;;  %4092 = vmatmul.msk.f32.gmra.mxu2 %vm1445_vm1, %v3145_v59  ;;  %v2190_v59 = vpop.permute.xlu1 %2189 }
 0x1e1   : > { %v5217_v35 = vpop.f32.mrf.mxu0  ;;  %v3048_v37 = vpop.permute.xlu2 %3047 }
 0x1e2   : > { %5839 = vst [vmem:[#allocation120_spill] sm:$0xff] %v5217_v35  ;;  %v5220_v9 = vpop.f32.mrf.mxu1 }
 0x1e3   : > { %v5224_v62 = vpop.f32.mrf.mxu2 }
 0x1e4   : > { %5840 = vst [vmem:[#allocation121_spill] sm:$0xff] %v5224_v62  ;;  %3954 = vmatmul.msk.f32.gmra.mxu0 %vm1445_vm1, %v1402_v42  ;;  %v2755_v62 = vld [vmem:[%s4497_s26 + $0x150] sm:$0xff]  ;;  %v2291_v42 = vmul.f32 %v2190_v59, %v1899_v48  ;;  %v1900_v48 = vld [vmem:[%s4448_s24 + $0x168] sm:$0xff]  ;;  %v1825_v59 = vadd.f32 %v4506_v25, %v1299_v19  ;;  %v1302_v19 = vadd.f32 %v5174_v28, %v4979_v52 }
 0x1e5   : > { %3930 = vmatmul.msk.f32.gmra.mxu1 %vm681_vm0, %v607_v6  ;;  %4039 = vmatmul.msk.f32.gmra.mxu3 %vm1445_vm1, %v2290_v8  ;;  %v3147_v8 = vmul.f32 %v3038_v46, %v2755_v62  ;;  %v5256_v46 = vld [vmem:[%s5719_s12] ss:$0 sm:$0xff]  ;;  %v1224_v28 = vadd.f32 %v4738_v54, %v4489_v17  ;;  %v610_v17 = vld [vmem:[%s4412_s19 + $0x188] sm:$0xff] }
 0x1e6   : > { %v2683_v39 = vadd.f32 %v2567_v1, %v1825_v59  ;;  %v1901_v59 = vld [vmem:[%s4448_s24 + $0x170] sm:$0xff]  ;;  %v2757_v54 = vld [vmem:[%s4497_s26 + $0x160] sm:$0xff] }
 0x1e8   : > { %v2570_v35 = vpop.f32.mrf.mxu3  ;;  %4093 = vmatmul.msk.f32.gmra.mxu2 %vm1445_vm1, %v3146_v45  ;;  %v1221_v45 = vadd.f32 %v4721_v41, %v4470_v5  ;;  %v609_v5 = vld [vmem:[%s4412_s19 + $0x180] sm:$0xff]  ;;  %v2756_v41 = vld [vmem:[%s4497_s26 + $0x158] sm:$0xff] }
 0x1e9   : > { %v5231_v57 = vpop.f32.mrf.mxu0 }
 0x1ea   : > { %5841 = vst [vmem:[#allocation122_spill] sm:$0xff] %v5231_v57  ;;  %v5234_v13 = vpop.f32.mrf.mxu1  ;;  %v2195_v57 = vpop.permute.xlu0 %2194 }
 0x1eb   : > { %v5238_v6 = vpop.f32.mrf.mxu2  ;;  %v2292_v62 = vmul.f32 %v2195_v57, %v1900_v48  ;;  %v3148_v57 = vmul.f32 %v3043_v51, %v2756_v41  ;;  %v2200_v48 = vpop.permute.xlu2 %2199 }
 0x1ec   : > { %5842 = vst [vmem:[#allocation123_spill] sm:$0xff] %v5238_v6  ;;  %3955 = vmatmul.msk.f32.gmra.mxu0 %vm1445_vm1, %v1403_v16 }
 0x1ed   : > { %3931 = vmatmul.msk.f32.gmra.mxu1 %vm681_vm0, %v608_v15  ;;  %4040 = vmatmul.msk.f32.gmra.mxu3 %vm1445_vm1, %v2291_v42 }
 0x1f0   : > { %v2573_v6 = vpop.f32.mrf.mxu3  ;;  %4094 = vmatmul.msk.f32.gmra.mxu2 %vm1445_vm1, %v3147_v8 }
 0x1f1   : > { %v1631_v16 = vpop.f32.mrf.mxu0 }
 0x1f2   : > { %v5251_v15 = vpop.f32.mrf.mxu1  ;;  %v1799_v42 = vadd.f32 %v1631_v16, %v1221_v45  ;;  %v3053_v45 = vpop.permute.xlu1 %3052  ;;  %v1826_v16 = vadd.f32 %v4527_v40, %v1302_v19 }
 0x1f3   : > { %v3425_v25 = vpop.f32.mrf.mxu2 }
 0x1f4   : > { %v2657_v8 = vadd.f32 %v4786_v26, %v1799_v42  ;;  %3956 = vmatmul.msk.f32.gmra.mxu0 %vm1445_vm1, %v1404_v4  ;;  %v3541_v1 = vadd.f32 %v3425_v25, %v2683_v39  ;;  %v2684_v42 = vadd.f32 %v2570_v35, %v1826_v16  ;;  %v1305_v25 = vadd.f32 %v5190_v44, %v4995_v2  ;;  %v1902_v44 = vld [vmem:[%s4448_s24 + $0x178] sm:$0xff] }
 0x1f5   : > { %3932 = vmatmul.msk.f32.gmra.mxu1 %vm681_vm0, %v609_v5  ;;  %4041 = vmatmul.msk.f32.gmra.mxu3 %vm1445_vm1, %v2292_v62  ;;  %v2293_v62 = vmul.f32 %v2200_v48, %v1901_v59  ;;  %v3149_v35 = vmul.f32 %v3048_v37, %v2757_v54 }
 0x1f6   : > { %v3515_v52 = vadd.f32 %v4835_v63, %v2657_v8  ;;  %v3601_v26 = vadd.f32 %v5256_v46, %v3541_v1  ;;  %v1405_v63 = vld [vmem:[%s4260_s17 + $0x88] sm:$0xff]  ;;  %v3058_v1 = vpop.permute.xlu0 %3057 }
 0x1f8   : > { %v3575_v4 = vadd.f32 %v5256_v46, %v3515_v52  ;;  %3657 = vst.msk [vmem:[%s5268_s15 + $0xd0] sm:$0xff] %vm681_vm0, %v3601_v26  ;;  %v2576_v39 = vpop.f32.mrf.mxu3  ;;  %4095 = vmatmul.msk.f32.gmra.mxu2 %vm1445_vm1, %v3148_v57  ;;  %v1827_v26 = vadd.f32 %v4547_v55, %v1305_v25 }
 0x1f9   : > { %v1634_v51 = vpop.f32.mrf.mxu0 }
 0x1fa   : > { %3631 = vst.msk [vmem:[%s5268_s15] sm:$0xff] %vm681_vm0, %v3575_v4  ;;  %v5285_v5 = vpop.f32.mrf.mxu1  ;;  %v1800_v41 = vadd.f32 %v1634_v51, %v1224_v28  ;;  %v2205_v2 = vpop.permute.xlu1 %2204  ;;  %v2685_v59 = vadd.f32 %v2573_v6, %v1827_v26 }
 0x1fb   : > { %v3428_v40 = vpop.f32.mrf.mxu2  ;;  %v2294_v51 = vmul.f32 %v2205_v2, %v1902_v44  ;;  %v3063_v6 = vpop.permute.xlu2 %3062 }
 0x1fc   : > { %v2658_v19 = vadd.f32 %v4803_v0, %v1800_v41  ;;  %3957 = vmatmul.msk.f32.gmra.mxu0 %vm1445_vm1, %v1405_v63  ;;  %v3542_v8 = vadd.f32 %v3428_v40, %v2684_v42  ;;  %v1227_v0 = vadd.f32 %v4757_v24, %v4518_v33  ;;  %v611_v33 = vld [vmem:[%s4412_s19 + $0x190] sm:$0xff]  ;;  %v2758_v24 = vld [vmem:[%s4497_s26 + $0x168] sm:$0xff]  ;;  %v1308_v63 = vadd.f32 %v5206_v12, %v5011_v56  ;;  %v1903_v12 = vld [vmem:[%s4448_s24 + $0x180] sm:$0xff] }
 0x1fd   : > { %3933 = vmatmul.msk.f32.gmra.mxu1 %vm681_vm0, %v610_v17  ;;  %4042 = vmatmul.msk.f32.gmra.mxu3 %vm1445_vm1, %v2293_v62  ;;  %v3150_v17 = vmul.f32 %v3053_v45, %v2758_v24 }
 0x1fe   : > { %v3516_v57 = vadd.f32 %v4854_v21, %v2658_v19  ;;  %v3602_v52 = vadd.f32 %v5256_v46, %v3542_v8  ;;  %v1406_v21 = vld [vmem:[%s4260_s17 + $0x90] sm:$0xff]  ;;  %v2210_v56 = vpop.permute.xlu0 %2209  ;;  %v1828_v40 = vadd.f32 %v4567_v7, %v1308_v63  ;;  %v1314_v63 = vadd.f32 %v5234_v13, %v5043_v58 }
 0x1ff   : > { %v1905_v13 = vld [vmem:[%s4448_s24 + $0x190] sm:$0xff] }
 0x200   : > { %v3576_v28 = vadd.f32 %v5256_v46, %v3516_v57  ;;  %3658 = vst.msk [vmem:[%s5268_s15 + $0xd8] sm:$0xff] %vm681_vm0, %v3602_v52  ;;  %v2579_v48 = vpop.f32.mrf.mxu3  ;;  %4096 = vmatmul.msk.f32.gmra.mxu2 %vm1445_vm1, %v3149_v35  ;;  %v2686_v8 = vadd.f32 %v2576_v39, %v1828_v40  ;;  %v2295_v52 = vmul.f32 %v2210_v56, %v1903_v12  ;;  %v1409_v40 = vld [vmem:[%s4260_s17 + $0xa8] sm:$0xff] }
 0x201   : > { %v1637_v37 = vpop.f32.mrf.mxu0 }
 0x202   : > { %3632 = vst.msk [vmem:[%s5268_s15 + $0x8] sm:$0xff] %vm681_vm0, %v3576_v28  ;;  %v5308_v16 = vpop.f32.mrf.mxu1  ;;  %v1801_v4 = vadd.f32 %v1637_v37, %v1227_v0  ;;  %v1311_v0 = vadd.f32 %v5220_v9, %v5027_v22  ;;  %v3068_v26 = vpop.permute.xlu1 %3067  ;;  %v1904_v9 = vld [vmem:[%s4448_s24 + $0x188] sm:$0xff] }
 0x203   : > { %v3431_v55 = vpop.f32.mrf.mxu2  ;;  %v2215_v22 = vpop.permute.xlu2 %2214 }
 0x204   : > { %v2659_v42 = vadd.f32 %v4822_v36, %v1801_v4  ;;  %3958 = vmatmul.msk.f32.gmra.mxu0 %vm1445_vm1, %v1406_v21  ;;  %v3543_v41 = vadd.f32 %v3431_v55, %v2685_v59  ;;  %v1230_v36 = vadd.f32 %v4776_v43, %v4537_v47  ;;  %v612_v47 = vld [vmem:[%s4412_s19 + $0x198] sm:$0xff]  ;;  %v2759_v43 = vld [vmem:[%s4497_s26 + $0x170] sm:$0xff]  ;;  %v1829_v21 = vadd.f32 %v4589_v30, %v1311_v0 }
 0x205   : > { %3934 = vmatmul.msk.f32.gmra.mxu1 %vm681_vm0, %v611_v33  ;;  %4043 = vmatmul.msk.f32.gmra.mxu3 %vm1445_vm1, %v2294_v51  ;;  %v3151_v39 = vmul.f32 %v3058_v1, %v2759_v43  ;;  %v1408_v33 = vld [vmem:[%s4260_s17 + $0xa0] sm:$0xff]  ;;  %v2760_v55 = vld [vmem:[%s4497_s26 + $0x178] sm:$0xff] }
 0x206   : > { %v3517_v54 = vadd.f32 %v4873_v11, %v2659_v42  ;;  %v3603_v62 = vadd.f32 %v5256_v46, %v3543_v41  ;;  %v1407_v11 = vld [vmem:[%s4260_s17 + $0x98] sm:$0xff]  ;;  %v613_v51 = vld [vmem:[%s4412_s19 + $0x1a0] sm:$0xff] }
 0x208   : > { %v3577_v25 = vadd.f32 %v5256_v46, %v3517_v54  ;;  %3659 = vst.msk [vmem:[%s5268_s15 + $0xe0] sm:$0xff] %vm681_vm0, %v3603_v62  ;;  %v2582_v19 = vpop.f32.mrf.mxu3  ;;  %4097 = vmatmul.msk.f32.gmra.mxu2 %vm1445_vm1, %v3150_v17  ;;  %v3073_v17 = vpop.permute.xlu0 %3072 }
 0x209   : > { %v1640_v45 = vpop.f32.mrf.mxu0 }
 0x20a   : > { %3633 = vst.msk [vmem:[%s5268_s15 + $0x10] sm:$0xff] %vm681_vm0, %v3577_v25  ;;  %v5331_v35 = vpop.f32.mrf.mxu1  ;;  %v1802_v57 = vadd.f32 %v1640_v45, %v1230_v36  ;;  %v2220_v58 = vpop.permute.xlu1 %2219  ;;  %v1830_v36 = vadd.f32 %v4609_v49, %v1314_v63  ;;  %v614_v45 = vld [vmem:[%s4412_s19 + $0x1a8] sm:$0xff]  ;;  %v1317_v49 = vadd.f32 %v5251_v15, %v5059_v34 }
 0x20b   : > { %v3434_v7 = vpop.f32.mrf.mxu2 }
 0x20c   : > { %v2660_v2 = vadd.f32 %v4841_v50, %v1802_v57  ;;  %3959 = vmatmul.msk.f32.gmra.mxu0 %vm1445_vm1, %v1407_v11  ;;  %v3544_v44 = vadd.f32 %v3434_v7, %v2686_v8  ;;  %v1233_v50 = vadd.f32 %v4795_v53, %v4557_v61  ;;  %v2296_v61 = vmul.f32 %v2215_v22, %v1904_v9  ;;  %v2761_v11 = vld [vmem:[%s4497_s26 + $0x180] sm:$0xff]  ;;  %v1906_v7 = vld [vmem:[%s4448_s24 + $0x198] sm:$0xff] }
 0x20d   : > { %3935 = vmatmul.msk.f32.gmra.mxu1 %vm681_vm0, %v612_v47  ;;  %4044 = vmatmul.msk.f32.gmra.mxu3 %vm1445_vm1, %v2295_v52  ;;  %v3153_v43 = vmul.f32 %v3068_v26, %v2761_v11  ;;  %v1831_v0 = vadd.f32 %v4629_v3, %v1317_v49  ;;  %v1410_v26 = vld [vmem:[%s4260_s17 + $0xb0] sm:$0xff]  ;;  %v1320_v3 = vadd.f32 %v5285_v5, %v5075_v23  ;;  %v5845_v5 = vld [vmem:[#allocation50_spill] sm:$0xff] }
 0x20e   : > { %v3518_v28 = vadd.f32 %v4890_v29, %v2660_v2  ;;  %v3604_v37 = vadd.f32 %v5256_v46, %v3544_v44  ;;  %v2687_v29 = vadd.f32 %v2579_v48, %v1829_v21  ;;  %v3152_v48 = vmul.f32 %v3063_v6, %v2760_v55  ;;  %v5846_v55 = vld [vmem:[#allocation21_spill] sm:$0xff] }
 0x210   : > { %v3578_v59 = vadd.f32 %v5256_v46, %v3518_v28  ;;  %3660 = vst.msk [vmem:[%s5268_s15 + $0xe8] sm:$0xff] %vm681_vm0, %v3604_v37  ;;  %v2585_v4 = vpop.f32.mrf.mxu3  ;;  %4098 = vmatmul.msk.f32.gmra.mxu2 %vm1445_vm1, %v3151_v39  ;;  %v2225_v15 = vpop.permute.xlu0 %2224  ;;  %v615_v37 = vld [vmem:[%s4412_s19 + $0x1b0] sm:$0xff] }
 0x211   : > { %v1643_v1 = vpop.f32.mrf.mxu0 }
 0x212   : > { %3634 = vst.msk [vmem:[%s5268_s15 + $0x18] sm:$0xff] %vm681_vm0, %v3578_v59  ;;  %v1803_v24 = vadd.f32 %v1643_v1, %v1233_v50  ;;  %v5356_v53 = vpop.f32.mrf.mxu1  ;;  %v2762_v50 = vld [vmem:[%s4497_s26 + $0x188] sm:$0xff]  ;;  %v3083_v59 = vpop.permute.xlu1 %3082 }
 0x213   : > { %v3437_v30 = vpop.f32.mrf.mxu2  ;;  %v3154_v21 = vmul.f32 %v3073_v17, %v2762_v50 }
 0x214   : > { %v2661_v42 = vadd.f32 %v4860_v20, %v1803_v24  ;;  %3960 = vmatmul.msk.f32.gmra.mxu0 %vm1445_vm1, %v1408_v33  ;;  %v3545_v41 = vadd.f32 %v3437_v30, %v2687_v29  ;;  %v1236_v20 = vadd.f32 %v4814_v60, %v4579_v18  ;;  %v2297_v18 = vmul.f32 %v2220_v58, %v1905_v13  ;;  %v5847_v13 = vld [vmem:[#allocation93_spill] sm:$0xff] }
 0x215   : > { %3936 = vmatmul.msk.f32.gmra.mxu1 %vm681_vm0, %v613_v51  ;;  %4045 = vmatmul.msk.f32.gmra.mxu3 %vm1445_vm1, %v2296_v61  ;;  %v1907_v51 = vld [vmem:[%s4448_s24 + $0x1a0] sm:$0xff]  ;;  %v1832_v61 = vadd.f32 %v5846_v55, %v1320_v3 }
 0x216   : > { %v3519_v54 = vadd.f32 %v4906_v32, %v2661_v42  ;;  %v3605_v62 = vadd.f32 %v5256_v46, %v3545_v41  ;;  %v2688_v32 = vadd.f32 %v2582_v19, %v1830_v36  ;;  %v3078_v19 = vpop.permute.xlu2 %3077  ;;  %v1411_v41 = vld [vmem:[%s4260_s17 + $0xb8] sm:$0xff]  ;;  %v1323_v36 = vadd.f32 %v5308_v16, %v5847_v13  ;;  %v5851_v16 = vld [vmem:[#allocation52_spill] sm:$0xff]  ;;  %v5855_v3 = vld [vmem:[#allocation70_spill] sm:$0xff] }
 0x217   : > { %v5861_v13 = vld [vmem:[#allocation73_spill] sm:$0xff] }
 0x218   : > { %v3579_v56 = vadd.f32 %v5256_v46, %v3519_v54  ;;  %3661 = vst.msk [vmem:[%s5268_s15 + $0xf0] sm:$0xff] %vm681_vm0, %v3605_v62  ;;  %v2588_v12 = vpop.f32.mrf.mxu3  ;;  %4099 = vmatmul.msk.f32.gmra.mxu2 %vm1445_vm1, %v3152_v48  ;;  %v616_v54 = vld [vmem:[%s4412_s19 + $0x1b8] sm:$0x1]  ;;  %v2763_v62 = vld [vmem:[%s4497_s26 + $0x190] sm:$0xff] }
 0x219   : > { %v1646_v6 = vpop.f32.mrf.mxu0  ;;  %v2690_v48 = vadd.f32 %v2588_v12, %v1832_v61  ;;  %v3155_v12 = vmul.f32 %v3078_v19, %v2763_v62  ;;  %v5860_v62 = vld [vmem:[#allocation64_spill] sm:$0xff] }
 0x21a   : > { %3635 = vst.msk [vmem:[%s5268_s15 + $0x20] sm:$0xff] %vm681_vm0, %v3579_v56  ;;  %v1804_v25 = vadd.f32 %v1646_v6, %v1236_v20  ;;  %v5383_v47 = vpop.f32.mrf.mxu1  ;;  %v5848_v56 = vld [vmem:[#allocation57_spill] sm:$0xff]  ;;  %v2235_v49 = vpop.permute.xlu1 %2234 }
 0x21b   : > { %v3440_v60 = vpop.f32.mrf.mxu2 }
 0x21c   : > { %v2662_v8 = vadd.f32 %v4879_v14, %v1804_v25  ;;  %3961 = vmatmul.msk.f32.gmra.mxu0 %vm1445_vm1, %v1409_v40  ;;  %v3546_v57 = vadd.f32 %v3440_v60, %v2688_v32  ;;  %v1239_v14 = vadd.f32 %v4831_v31, %v4599_v38  ;;  %v2298_v38 = vmul.f32 %v2225_v15, %v1906_v7  ;;  %v3088_v32 = vpop.permute.xlu0 %3087  ;;  %v5849_v25 = vld [vmem:[#allocation67_spill] sm:$0xff]  ;;  %v1412_v15 = vld [vmem:[%s4260_s17 + $0xc0] sm:$0xff] }
 0x21d   : > { %3937 = vmatmul.msk.f32.gmra.mxu1 %vm681_vm0, %v614_v45  ;;  %4046 = vmatmul.msk.f32.gmra.mxu3 %vm1445_vm1, %v2297_v18  ;;  %v5850_v18 = vld [vmem:[#allocation19_spill] sm:$0xff] }
 0x21e   : > { %v3520_v52 = vadd.f32 %v4922_v27, %v2662_v8  ;;  %v3606_v34 = vadd.f32 %v5256_v46, %v3546_v57  ;;  %v2689_v27 = vadd.f32 %v2585_v4, %v1831_v0  ;;  %v5843_v4 = vld [vmem:[#allocation63_spill] sm:$0xff]  ;;  %v2230_v24 = vpop.permute.xlu2 %2229  ;;  %v1245_v60 = vadd.f32 %v5851_v16, %v5850_v18  ;;  %v5852_v57 = vld [vmem:[#allocation25_spill] sm:$0xff] }
 0x21f   : > { %v2299_v20 = vmul.f32 %v2230_v24, %v1907_v51  ;;  %v1908_v8 = vld [vmem:[%s4448_s24 + $0x1a8] sm:$0xff] }
 0x220   : > { %v3580_v2 = vadd.f32 %v5256_v46, %v3520_v52  ;;  %3662 = vst.msk [vmem:[%s5268_s15 + $0xf8] sm:$0xff] %vm681_vm0, %v3606_v34  ;;  %v2591_v44 = vpop.f32.mrf.mxu3  ;;  %4100 = vmatmul.msk.f32.gmra.mxu2 %vm1445_vm1, %v3153_v43  ;;  %v1833_v43 = vadd.f32 %v5852_v57, %v1323_v36  ;;  %v1413_v51 = vld [vmem:[%s4260_s17 + $0xc8] sm:$0xff] }
 0x221   : > { %v1649_v39 = vpop.f32.mrf.mxu0 }
 0x222   : > { %3636 = vst.msk [vmem:[%s5268_s15 + $0x28] sm:$0xff] %vm681_vm0, %v3580_v2  ;;  %v1805_v28 = vadd.f32 %v1649_v39, %v1239_v14  ;;  %v5410_v23 = vpop.f32.mrf.mxu1  ;;  %v2691_v7 = vadd.f32 %v2591_v44, %v1833_v43  ;;  %v2764_v2 = vld [vmem:[%s4497_s26 + $0x198] sm:$0xff]  ;;  %v2300_v39 = vmul.f32 %v2235_v49, %v1908_v8  ;;  %v2766_v8 = vld [vmem:[%s4497_s26 + $0x1a8] sm:$0xff] }
 0x223   : > { %v3443_v31 = vpop.f32.mrf.mxu2 }
 0x224   : > { %v2663_v22 = vadd.f32 %v4896_v10, %v1805_v28  ;;  %3962 = vmatmul.msk.f32.gmra.mxu0 %vm1445_vm1, %v1410_v26  ;;  %v3547_v9 = vadd.f32 %v3443_v31, %v2689_v27  ;;  %v5844_v10 = vld [vmem:[#allocation16_spill] sm:$0xff]  ;;  %v5853_v27 = vld [vmem:[#allocation97_spill] sm:$0xff]  ;;  %v3156_v31 = vmul.f32 %v3083_v59, %v2764_v2 }
 0x225   : > { %3938 = vmatmul.msk.f32.gmra.mxu1 %vm681_vm0, %v615_v37  ;;  %4047 = vmatmul.msk.f32.gmra.mxu3 %vm1445_vm1, %v2298_v38  ;;  %v1242_v29 = vadd.f32 %v5845_v5, %v5844_v10  ;;  %v1326_v28 = vadd.f32 %v5331_v35, %v5853_v27  ;;  %v5854_v37 = vld [vmem:[#allocation60_spill] sm:$0xff]  ;;  %v2240_v35 = vpop.permute.xlu0 %2239  ;;  %v5858_v10 = vld [vmem:[#allocation29_spill] sm:$0xff] }
 0x226   : > { %v3521_v1 = vadd.f32 %v5843_v4, %v2663_v22  ;;  %v3607_v33 = vadd.f32 %v5256_v46, %v3547_v9  ;;  %v3093_v44 = vpop.permute.xlu2 %3092  ;;  %v5857_v4 = vld [vmem:[#allocation54_spill] sm:$0xff] }
 0x227   : > { %v1834_v5 = vadd.f32 %v5858_v10, %v1326_v28  ;;  %v5868_v28 = vld [vmem:[#allocation31_spill] sm:$0xff] }
 0x228   : > { %v3581_v30 = vadd.f32 %v5256_v46, %v3521_v1  ;;  %3663 = vst.msk [vmem:[%s5268_s15 + $0x100] sm:$0xff] %vm681_vm0, %v3607_v33  ;;  %v2594_v63 = vpop.f32.mrf.mxu3  ;;  %4101 = vmatmul.msk.f32.gmra.mxu2 %vm1445_vm1, %v3154_v21  ;;  %v5856_v21 = vld [vmem:[#allocation23_spill] sm:$0xff]  ;;  %v1909_v33 = vld [vmem:[%s4448_s24 + $0x1b0] sm:$0xff] }
 0x229   : > { %v1652_v42 = vpop.f32.mrf.mxu0  ;;  %v1248_v1 = vadd.f32 %v5857_v4, %v5856_v21  ;;  %v2692_v55 = vadd.f32 %v2594_v63, %v1834_v5  ;;  %v2767_v21 = vld [vmem:[%s4497_s26 + $0x1b0] sm:$0xff]  ;;  %v3098_v4 = vpop.permute.xlu1 %3097  ;;  %v5872_v10 = vld [vmem:[#allocation71_spill] sm:$0xff] }
 0x22a   : > { %3637 = vst.msk [vmem:[%s5268_s15 + $0x30] sm:$0xff] %vm681_vm0, %v3581_v30  ;;  %v1806_v17 = vadd.f32 %v1652_v42, %v1242_v29  ;;  %v5441_v19 = vpop.f32.mrf.mxu1  ;;  %v2765_v30 = vld [vmem:[%s4497_s26 + $0x1a0] sm:$0xff]  ;;  %v2301_v42 = vmul.f32 %v2240_v35, %v1909_v33  ;;  %v5871_v35 = vld [vmem:[#allocation109_spill] sm:$0xff] }
 0x22b   : > { %v3446_v58 = vpop.f32.mrf.mxu2  ;;  %v3157_v63 = vmul.f32 %v3088_v32, %v2765_v30  ;;  %v1335_v33 = vadd.f32 %v5410_v23, %v5871_v35  ;;  %v5874_v30 = vld [vmem:[#allocation34_spill] sm:$0xff] }
 0x22c   : > { %v2664_v6 = vadd.f32 %v5848_v56, %v1806_v17  ;;  %3963 = vmatmul.msk.f32.gmra.mxu0 %vm1445_vm1, %v1411_v41  ;;  %v3548_v40 = vadd.f32 %v3446_v58, %v2690_v48  ;;  %v5859_v17 = vld [vmem:[#allocation101_spill] sm:$0xff] }
 0x22d   : > { %3939 = vmatmul.msk.f32.gmra.mxu1 %vm681_vm0, %v616_v54  ;;  %4048 = vmatmul.msk.f32.gmra.mxu3 %vm1445_vm1, %v2299_v20  ;;  %v1329_v54 = vadd.f32 %v5356_v53, %v5859_v17  ;;  %v5864_v53 = vld [vmem:[#allocation35_spill] sm:$0xff]  ;;  %v5876_v17 = vld [vmem:[#allocation41_spill] sm:$0xff] }
 0x22e   : > { %v3522_v45 = vadd.f32 %v5849_v25, %v2664_v6  ;;  %v3608_v11 = vadd.f32 %v5256_v46, %v3548_v40  ;;  %v5862_v6 = vld [vmem:[#allocation27_spill] sm:$0xff]  ;;  %v5863_v40 = vld [vmem:[#allocation56_spill] sm:$0xff]  ;;  %v2245_v25 = vpop.permute.xlu2 %2244 }
 0x230   : > { %v3582_v52 = vadd.f32 %v5256_v46, %v3522_v45  ;;  %3664 = vst.msk [vmem:[%s5268_s15 + $0x108] sm:$0xff] %vm681_vm0, %v3608_v11  ;;  %v2597_v34 = vpop.f32.mrf.mxu3  ;;  %4102 = vmatmul.msk.f32.gmra.mxu2 %vm1445_vm1, %v3155_v12  ;;  %v1251_v12 = vadd.f32 %v5863_v40, %v5862_v6  ;;  %v1910_v45 = vld [vmem:[%s4448_s24 + $0x1b8] sm:$0x1]  ;;  %v1835_v11 = vadd.f32 %v5864_v53, %v1329_v54  ;;  %v5877_v6 = vld [vmem:[#allocation112_spill] sm:$0xff] }
 0x231   : > { %v1655_v14 = vpop.f32.mrf.mxu0  ;;  %v2302_v57 = vmul.f32 %v2245_v25, %v1910_v45  ;;  %v1837_v54 = vadd.f32 %v5876_v17, %v1335_v33  ;;  %v1338_v40 = vadd.f32 %v5441_v19, %v5877_v6  ;;  %v5896_v6 = vld [vmem:[#allocation83_spill] sm:$0xff] }
 0x232   : > { %3638 = vst.msk [vmem:[%s5268_s15 + $0x38] sm:$0xff] %vm681_vm0, %v3582_v52  ;;  %v1807_v0 = vadd.f32 %v1655_v14, %v1245_v60  ;;  %v5466_v41 = vpop.f32.mrf.mxu1  ;;  %v2693_v32 = vadd.f32 %v2597_v34, %v1835_v11  ;;  %v5865_v52 = vld [vmem:[#allocation105_spill] sm:$0xff]  ;;  %v3158_v34 = vmul.f32 %v3093_v44, %v2766_v8  ;;  %v5879_v11 = vld [vmem:[#allocation82_spill] sm:$0xff]  ;;  %v5882_v8 = vld [vmem:[#allocation44_spill] sm:$0xff] }
 0x233   : > { %v3449_v26 = vpop.f32.mrf.mxu2  ;;  %v1332_v14 = vadd.f32 %v5383_v47, %v5865_v52 }
 0x234   : > { %v2665_v50 = vadd.f32 %v5854_v37, %v1807_v0  ;;  %3964 = vmatmul.msk.f32.gmra.mxu0 %vm1445_vm1, %v1412_v15  ;;  %v3549_v38 = vadd.f32 %v3449_v26, %v2691_v7  ;;  %v5866_v15 = vld [vmem:[#allocation68_spill] sm:$0xff]  ;;  %v5869_v37 = vld [vmem:[#allocation59_spill] sm:$0xff] }
 0x235   : > { %4049 = vmatmul.msk.f32.gmra.mxu3 %vm1445_vm1, %v2300_v39  ;;  %v5867_v39 = vld [vmem:[#allocation76_spill] sm:$0xff] }
 0x236   : > { %v3523_v22 = vadd.f32 %v5855_v3, %v2665_v50  ;;  %v3609_v9 = vadd.f32 %v5256_v46, %v3549_v38  ;;  %v1254_v50 = vadd.f32 %v5869_v37, %v5868_v28  ;;  %v5870_v38 = vld [vmem:[#allocation38_spill] sm:$0xff]  ;;  %v5885_v37 = vld [vmem:[#allocation85_spill] sm:$0xff] }
 0x238   : > { %v3583_v29 = vadd.f32 %v5256_v46, %v3523_v22  ;;  %3665 = vst.msk [vmem:[%s5268_s15 + $0x110] sm:$0xff] %vm681_vm0, %v3609_v9  ;;  %v2600_v24 = vpop.f32.mrf.mxu3  ;;  %4103 = vmatmul.msk.f32.gmra.mxu2 %vm1445_vm1, %v3156_v31  ;;  %v1836_v31 = vadd.f32 %v5870_v38, %v1332_v14 }
 0x239   : > { %v1658_v59 = vpop.f32.mrf.mxu0 }
 0x23a   : > { %3639 = vst.msk [vmem:[%s5268_s15 + $0x40] sm:$0xff] %vm681_vm0, %v3583_v29  ;;  %v1808_v61 = vadd.f32 %v1658_v59, %v1248_v1  ;;  %v5489_v2 = vpop.f32.mrf.mxu1  ;;  %v2694_v9 = vadd.f32 %v2600_v24, %v1836_v31  ;;  %v3159_v59 = vmul.f32 %v3098_v4, %v2767_v21  ;;  %v5886_v31 = vld [vmem:[#allocation40_spill] sm:$0xff] }
 0x23b   : > { %v3452_v48 = vpop.f32.mrf.mxu2 }
 0x23c   : > { %v2666_v20 = vadd.f32 %v5860_v62, %v1808_v61  ;;  %3965 = vmatmul.msk.f32.gmra.mxu0 %vm1445_vm1, %v1413_v51  ;;  %v3550_v58 = vadd.f32 %v3452_v48, %v2692_v55  ;;  %v5873_v51 = vld [vmem:[#allocation79_spill] sm:$0xff] }
 0x23d   : > { %4050 = vmatmul.msk.f32.gmra.mxu3 %vm1445_vm1, %v2301_v42  ;;  %v5875_v42 = vld [vmem:[#allocation62_spill] sm:$0xff] }
 0x23e   : > { %v3524_v36 = vadd.f32 %v5861_v13, %v2666_v20  ;;  %v3610_v56 = vadd.f32 %v5256_v46, %v3550_v58  ;;  %v1257_v48 = vadd.f32 %v5875_v42, %v5874_v30  ;;  %v2768_v13 = vld [vmem:[%s4497_s26 + $0x1b8] sm:$0x1]  ;;  %v5892_v42 = vld [vmem:[#allocation43_spill] sm:$0xff] }
 0x240   : > { %v3584_v18 = vadd.f32 %v5256_v46, %v3524_v36  ;;  %3666 = vst.msk [vmem:[%s5268_s15 + $0x118] sm:$0xff] %vm681_vm0, %v3610_v56  ;;  %v2603_v16 = vpop.f32.mrf.mxu3  ;;  %4104 = vmatmul.msk.f32.gmra.mxu2 %vm1445_vm1, %v3157_v63  ;;  %v3103_v36 = vpop.permute.xlu0 %3102 }
 0x241   : > { %v1661_v60 = vpop.f32.mrf.mxu0  ;;  %v2695_v58 = vadd.f32 %v2603_v16, %v1837_v54  ;;  %v3160_v53 = vmul.f32 %v3103_v36, %v2768_v13  ;;  %v5881_v16 = vld [vmem:[#allocation66_spill] sm:$0xff]  ;;  %v5894_v54 = vld [vmem:[#allocation3_spill] sm:$0xff]  ;;  %v5895_v36 = vld [vmem:[#allocation120_spill] sm:$0xff] }
 0x242   : > { %3640 = vst.msk [vmem:[%s5268_s15 + $0x48] sm:$0xff] %vm681_vm0, %v3584_v18  ;;  %v1809_v49 = vadd.f32 %v1661_v60, %v1251_v12  ;;  %v5509_v61 = vpop.f32.mrf.mxu1  ;;  %v5878_v12 = vld [vmem:[#allocation74_spill] sm:$0xff] }
 0x243   : > { %v3455_v43 = vpop.f32.mrf.mxu2 }
 0x244   : > { %v2667_v7 = vadd.f32 %v5866_v15, %v1809_v49  ;;  %v3551_v0 = vadd.f32 %v3455_v43, %v2693_v32  ;;  %v5880_v32 = vld [vmem:[#allocation37_spill] sm:$0xff] }
 0x245   : > { %4051 = vmatmul.msk.f32.gmra.mxu3 %vm1445_vm1, %v2302_v57  ;;  %v1260_v49 = vadd.f32 %v5881_v16, %v5880_v32  ;;  %v1838_v57 = vadd.f32 %v5882_v8, %v1338_v40  ;;  %v5900_v16 = vld [vmem:[#allocation5_spill] sm:$0xff] }
 0x246   : > { %v3525_v26 = vadd.f32 %v5867_v39, %v2667_v7  ;;  %v3611_v27 = vadd.f32 %v5256_v46, %v3551_v0 }
 0x248   : > { %v3585_v47 = vadd.f32 %v5256_v46, %v3525_v26  ;;  %3667 = vst.msk [vmem:[%s5268_s15 + $0x120] sm:$0xff] %vm681_vm0, %v3611_v27  ;;  %v2606_v3 = vpop.f32.mrf.mxu3  ;;  %4105 = vmatmul.msk.f32.gmra.mxu2 %vm1445_vm1, %v3158_v34  ;;  %v5883_v34 = vld [vmem:[#allocation115_spill] sm:$0xff]  ;;  %v5884_v26 = vld [vmem:[#allocation77_spill] sm:$0xff] }
 0x249   : > { %v1664_v22 = vpop.f32.mrf.mxu0  ;;  %v2696_v15 = vadd.f32 %v2606_v3, %v1838_v57  ;;  %v1341_v39 = vadd.f32 %v5466_v41, %v5883_v34 }
 0x24a   : > { %3641 = vst.msk [vmem:[%s5268_s15 + $0x50] sm:$0xff] %vm681_vm0, %v3585_v47  ;;  %v1810_v44 = vadd.f32 %v1664_v22, %v1254_v50  ;;  %v1349_v19 = vpop.f32.mrf.mxu1  ;;  %v5887_v47 = vld [vmem:[#allocation69_spill] sm:$0xff] }
 0x24b   : > { %v3458_v1 = vpop.f32.mrf.mxu2  ;;  %v1263_v22 = vadd.f32 %v5887_v47, %v5886_v31  ;;  %v5906_v47 = vld [vmem:[#allocation7_spill] sm:$0xff] }
 0x24c   : > { %v2668_v5 = vadd.f32 %v5872_v10, %v1810_v44  ;;  %v3552_v29 = vadd.f32 %v3458_v1, %v2694_v9  ;;  %v5888_v9 = vld [vmem:[#allocation47_spill] sm:$0xff]  ;;  %v5889_v10 = vld [vmem:[#allocation118_spill] sm:$0xff] }
 0x24d   : > { %v1839_v3 = vadd.f32 %v5888_v9, %v1341_v39 }
 0x24e   : > { %v3526_v55 = vadd.f32 %v5873_v51, %v2668_v5  ;;  %v3612_v24 = vadd.f32 %v5256_v46, %v3552_v29  ;;  %v1344_v5 = vadd.f32 %v5489_v2, %v5889_v10  ;;  %v5890_v29 = vld [vmem:[#allocation80_spill] sm:$0xff] }
 0x250   : > { %v3586_v62 = vadd.f32 %v5256_v46, %v3526_v55  ;;  %3668 = vst.msk [vmem:[%s5268_s15 + $0x128] sm:$0xff] %vm681_vm0, %v3612_v24  ;;  %v2609_v23 = vpop.f32.mrf.mxu3  ;;  %4106 = vmatmul.msk.f32.gmra.mxu2 %vm1445_vm1, %v3159_v59  ;;  %v5891_v55 = vld [vmem:[#allocation88_spill] sm:$0xff] }
 0x251   : > { %v1667_v20 = vpop.f32.mrf.mxu0  ;;  %v2697_v41 = vadd.f32 %v2609_v23, %v1839_v3 }
 0x252   : > { %3642 = vst.msk [vmem:[%s5268_s15 + $0x58] sm:$0xff] %vm681_vm0, %v3586_v62  ;;  %v1811_v63 = vadd.f32 %v1667_v20, %v1257_v48  ;;  %v1352_v35 = vpop.f32.mrf.mxu1  ;;  %v5893_v48 = vld [vmem:[#allocation72_spill] sm:$0xff]  ;;  %v1840_v62 = vadd.f32 %v5894_v54, %v1344_v5 }
 0x253   : > { %v3461_v56 = vpop.f32.mrf.mxu2  ;;  %v1266_v17 = vadd.f32 %v5893_v48, %v5892_v42  ;;  %v5912_v42 = vld [vmem:[#allocation9_spill] sm:$0xff] }
 0x254   : > { %v2669_v25 = vadd.f32 %v5878_v12, %v1811_v63  ;;  %v3553_v45 = vadd.f32 %v3461_v56, %v2695_v58  ;;  %v1347_v56 = vadd.f32 %v5509_v61, %v5895_v36 }
 0x256   : > { %v3527_v18 = vadd.f32 %v5879_v11, %v2669_v25  ;;  %v3613_v60 = vadd.f32 %v5256_v46, %v3553_v45  ;;  %v5897_v45 = vld [vmem:[#allocation91_spill] sm:$0xff] }
 0x258   : > { %v3587_v43 = vadd.f32 %v5256_v46, %v3527_v18  ;;  %3669 = vst.msk [vmem:[%s5268_s15 + $0x130] sm:$0xff] %vm681_vm0, %v3613_v60  ;;  %v2612_v52 = vpop.f32.mrf.mxu3  ;;  %4107 = vmatmul.msk.f32.gmra.mxu2 %vm1445_vm1, %v3160_v53  ;;  %v5898_v18 = vld [vmem:[#allocation45_spill] sm:$0xff]  ;;  %v5899_v60 = vld [vmem:[#allocation75_spill] sm:$0xff] }
 0x259   : > { %v1670_v14 = vpop.f32.mrf.mxu0  ;;  %v2698_v2 = vadd.f32 %v2612_v52, %v1840_v62  ;;  %v1269_v32 = vadd.f32 %v5899_v60, %v5898_v18  ;;  %v5918_v18 = vld [vmem:[#allocation11_spill] sm:$0xff] }
 0x25a   : > { %3643 = vst.msk [vmem:[%s5268_s15 + $0x60] sm:$0xff] %vm681_vm0, %v3587_v43  ;;  %v1812_v7 = vadd.f32 %v1670_v14, %v1260_v49  ;;  %v1355_v25 = vpop.f32.mrf.mxu1  ;;  %v1841_v49 = vadd.f32 %v5900_v16, %v1347_v56 }
 0x25b   : > { %v3464_v0 = vpop.f32.mrf.mxu2 }
 0x25c   : > { %v2670_v27 = vadd.f32 %v5884_v26, %v1812_v7  ;;  %v3554_v28 = vadd.f32 %v3464_v0, %v2696_v15  ;;  %v5901_v15 = vld [vmem:[#allocation122_spill] sm:$0xff]  ;;  %v5903_v26 = vld [vmem:[#allocation95_spill] sm:$0xff] }
 0x25d   : > { %v1350_v7 = vadd.f32 %v1349_v19, %v5901_v15  ;;  %v5902_v0 = vld [vmem:[#allocation86_spill] sm:$0xff] }
 0x25e   : > { %v3528_v50 = vadd.f32 %v5885_v37, %v2670_v27  ;;  %v3614_v38 = vadd.f32 %v5256_v46, %v3554_v28 }
 0x260   : > { %v3588_v44 = vadd.f32 %v5256_v46, %v3528_v50  ;;  %3670 = vst.msk [vmem:[%s5268_s15 + $0x138] sm:$0xff] %vm681_vm0, %v3614_v38  ;;  %v2615_v21 = vpop.f32.mrf.mxu3  ;;  %v5904_v50 = vld [vmem:[#allocation46_spill] sm:$0xff] }
 0x261   : > { %v1673_v4 = vpop.f32.mrf.mxu0  ;;  %v2699_v43 = vadd.f32 %v2615_v21, %v1841_v49  ;;  %v5905_v38 = vld [vmem:[#allocation78_spill] sm:$0xff] }
 0x262   : > { %3644 = vst.msk [vmem:[%s5268_s15 + $0x68] sm:$0xff] %vm681_vm0, %v3588_v44  ;;  %v1813_v1 = vadd.f32 %v1673_v4, %v1263_v22  ;;  %v1358_v37 = vpop.f32.mrf.mxu1  ;;  %v1272_v31 = vadd.f32 %v5905_v38, %v5904_v50  ;;  %v1842_v22 = vadd.f32 %v5906_v47, %v1350_v7  ;;  %v5924_v50 = vld [vmem:[#allocation13_spill] sm:$0xff] }
 0x263   : > { %v3467_v33 = vpop.f32.mrf.mxu2 }
 0x264   : > { %v2671_v59 = vadd.f32 %v5890_v29, %v1813_v1  ;;  %v3555_v51 = vadd.f32 %v3467_v33, %v2697_v41  ;;  %v5907_v41 = vld [vmem:[#allocation2_spill] sm:$0xff]  ;;  %v5908_v33 = vld [vmem:[#allocation89_spill] sm:$0xff]  ;;  %v5909_v29 = vld [vmem:[#allocation99_spill] sm:$0xff] }
 0x265   : > { %v1353_v1 = vadd.f32 %v1352_v35, %v5907_v41 }
 0x266   : > { %v3529_v24 = vadd.f32 %v5891_v55, %v2671_v59  ;;  %v3615_v30 = vadd.f32 %v5256_v46, %v3555_v51  ;;  %v5910_v55 = vld [vmem:[#allocation48_spill] sm:$0xff] }
 0x267   : > { %v1843_v48 = vadd.f32 %v5912_v42, %v1353_v1 }
 0x268   : > { %v3589_v23 = vadd.f32 %v5256_v46, %v3529_v24  ;;  %3671 = vst.msk [vmem:[%s5268_s15 + $0x140] sm:$0xff] %vm681_vm0, %v3615_v30  ;;  %v2618_v20 = vpop.f32.mrf.mxu3  ;;  %v5911_v24 = vld [vmem:[#allocation81_spill] sm:$0xff] }
 0x269   : > { %v1676_v58 = vpop.f32.mrf.mxu0  ;;  %v2700_v44 = vadd.f32 %v2618_v20, %v1842_v22  ;;  %v1275_v30 = vadd.f32 %v5911_v24, %v5910_v55  ;;  %v5930_v55 = vld [vmem:[#allocation15_spill] sm:$0xff] }
 0x26a   : > { %3645 = vst.msk [vmem:[%s5268_s15 + $0x70] sm:$0xff] %vm681_vm0, %v3589_v23  ;;  %v1814_v63 = vadd.f32 %v1676_v58, %v1266_v17  ;;  %v1361_v62 = vpop.f32.mrf.mxu1 }
 0x26b   : > { %v3470_v13 = vpop.f32.mrf.mxu2 }
 0x26c   : > { %v2672_v40 = vadd.f32 %v5896_v6, %v1814_v63  ;;  %v3556_v12 = vadd.f32 %v3470_v13, %v2698_v2  ;;  %v5913_v2 = vld [vmem:[#allocation4_spill] sm:$0xff]  ;;  %v5915_v6 = vld [vmem:[#allocation103_spill] sm:$0xff] }
 0x26d   : > { %v1356_v63 = vadd.f32 %v1355_v25, %v5913_v2  ;;  %v5914_v13 = vld [vmem:[#allocation92_spill] sm:$0xff] }
 0x26e   : > { %v3530_v53 = vadd.f32 %v5897_v45, %v2672_v40  ;;  %v3616_v11 = vadd.f32 %v5256_v46, %v3556_v12  ;;  %v5916_v45 = vld [vmem:[#allocation49_spill] sm:$0xff] }
 0x26f   : > { %v1844_v60 = vadd.f32 %v5918_v18, %v1356_v63  ;;  %v5933_v63 = vld [vmem:[#allocation113_spill] sm:$0xff] }
 0x270   : > { %v3590_v8 = vadd.f32 %v5256_v46, %v3530_v53  ;;  %3672 = vst.msk [vmem:[%s5268_s15 + $0x148] sm:$0xff] %vm681_vm0, %v3616_v11  ;;  %v2621_v57 = vpop.f32.mrf.mxu3  ;;  %v5917_v53 = vld [vmem:[#allocation84_spill] sm:$0xff] }
 0x271   : > { %v1679_v61 = vpop.f32.mrf.mxu0  ;;  %v2701_v23 = vadd.f32 %v2621_v57, %v1843_v48  ;;  %v1278_v11 = vadd.f32 %v5917_v53, %v5916_v45  ;;  %v5936_v45 = vld [vmem:[#allocation18_spill] sm:$0xff] }
 0x272   : > { %3646 = vst.msk [vmem:[%s5268_s15 + $0x78] sm:$0xff] %vm681_vm0, %v3590_v8  ;;  %v1815_v52 = vadd.f32 %v1679_v61, %v1269_v32  ;;  %v1364_v57 = vpop.f32.mrf.mxu1 }
 0x273   : > { %v3473_v14 = vpop.f32.mrf.mxu2 }
 0x274   : > { %v2673_v34 = vadd.f32 %v5902_v0, %v1815_v52  ;;  %v3557_v39 = vadd.f32 %v3473_v14, %v2699_v43  ;;  %v5919_v43 = vld [vmem:[#allocation6_spill] sm:$0xff]  ;;  %v5920_v14 = vld [vmem:[#allocation96_spill] sm:$0xff]  ;;  %v5921_v0 = vld [vmem:[#allocation107_spill] sm:$0xff] }
 0x275   : > { %v1359_v52 = vadd.f32 %v1358_v37, %v5919_v43 }
 0x276   : > { %v3531_v27 = vadd.f32 %v5903_v26, %v2673_v34  ;;  %v3617_v28 = vadd.f32 %v5256_v46, %v3557_v39  ;;  %v5922_v26 = vld [vmem:[#allocation51_spill] sm:$0xff] }
 0x277   : > { %v1845_v38 = vadd.f32 %v5924_v50, %v1359_v52  ;;  %v5939_v52 = vld [vmem:[#allocation116_spill] sm:$0xff] }
 0x278   : > { %v3591_v9 = vadd.f32 %v5256_v46, %v3531_v27  ;;  %3673 = vst.msk [vmem:[%s5268_s15 + $0x150] sm:$0xff] %vm681_vm0, %v3617_v28  ;;  %v2624_v3 = vpop.f32.mrf.mxu3  ;;  %v5923_v27 = vld [vmem:[#allocation87_spill] sm:$0xff] }
 0x279   : > { %v1682_v19 = vpop.f32.mrf.mxu0  ;;  %v2702_v25 = vadd.f32 %v2624_v3, %v1844_v60  ;;  %v1281_v28 = vadd.f32 %v5923_v27, %v5922_v26 }
 0x27a   : > { %3647 = vst.msk [vmem:[%s5268_s15 + $0x80] sm:$0xff] %vm681_vm0, %v3591_v9  ;;  %v1816_v21 = vadd.f32 %v1682_v19, %v1272_v31  ;;  %v5925_v19 = vld [vmem:[#allocation8_spill] sm:$0xff]  ;;  %v1367_v1 = vpop.f32.mrf.mxu1 }
 0x27b   : > { %v3476_v4 = vpop.f32.mrf.mxu2 }
 0x27c   : > { %v2674_v10 = vadd.f32 %v5908_v33, %v1816_v21  ;;  %v3558_v5 = vadd.f32 %v3476_v4, %v2700_v44  ;;  %v1362_v44 = vadd.f32 %v1361_v62, %v5925_v19  ;;  %v5926_v21 = vld [vmem:[#allocation100_spill] sm:$0xff]  ;;  %v5927_v33 = vld [vmem:[#allocation110_spill] sm:$0xff] }
 0x27e   : > { %v3532_v59 = vadd.f32 %v5909_v29, %v2674_v10  ;;  %v3618_v51 = vadd.f32 %v5256_v46, %v3558_v5  ;;  %v5928_v29 = vld [vmem:[#allocation53_spill] sm:$0xff]  ;;  %v1846_v24 = vadd.f32 %v5930_v55, %v1362_v44  ;;  %v5945_v44 = vld [vmem:[#allocation119_spill] sm:$0xff] }
 0x280   : > { %v3592_v17 = vadd.f32 %v5256_v46, %v3532_v59  ;;  %3674 = vst.msk [vmem:[%s5268_s15 + $0x158] sm:$0xff] %vm681_vm0, %v3618_v51  ;;  %v2627_v54 = vpop.f32.mrf.mxu3  ;;  %v5929_v59 = vld [vmem:[#allocation90_spill] sm:$0xff] }
 0x281   : > { %v1685_v35 = vpop.f32.mrf.mxu0  ;;  %v2703_v37 = vadd.f32 %v2627_v54, %v1845_v38  ;;  %v1284_v51 = vadd.f32 %v5929_v59, %v5928_v29 }
 0x282   : > { %3648 = vst.msk [vmem:[%s5268_s15 + $0x88] sm:$0xff] %vm681_vm0, %v3592_v17  ;;  %v1817_v20 = vadd.f32 %v1685_v35, %v1275_v30  ;;  %v5931_v35 = vld [vmem:[#allocation10_spill] sm:$0xff] }
 0x283   : > { %v3479_v58 = vpop.f32.mrf.mxu2 }
 0x284   : > { %v2675_v36 = vadd.f32 %v5914_v13, %v1817_v20  ;;  %v3559_v56 = vadd.f32 %v3479_v58, %v2701_v23  ;;  %v1365_v23 = vadd.f32 %v1364_v57, %v5931_v35  ;;  %v5932_v20 = vld [vmem:[#allocation104_spill] sm:$0xff] }
 0x286   : > { %v3533_v40 = vadd.f32 %v5915_v6, %v2675_v36  ;;  %v3619_v12 = vadd.f32 %v5256_v46, %v3559_v56  ;;  %v1370_v56 = vpop.f32.mrf.mxu1  ;;  %v5934_v6 = vld [vmem:[#allocation55_spill] sm:$0xff]  ;;  %v1847_v53 = vadd.f32 %v5936_v45, %v1365_v23  ;;  %v5951_v23 = vld [vmem:[#allocation121_spill] sm:$0xff] }
 0x288   : > { %v3593_v32 = vadd.f32 %v5256_v46, %v3533_v40  ;;  %3675 = vst.msk [vmem:[%s5268_s15 + $0x160] sm:$0xff] %vm681_vm0, %v3619_v12  ;;  %v2630_v16 = vpop.f32.mrf.mxu3  ;;  %v5935_v40 = vld [vmem:[#allocation94_spill] sm:$0xff] }
 0x289   : > { %v1688_v49 = vpop.f32.mrf.mxu0  ;;  %v2704_v48 = vadd.f32 %v2630_v16, %v1846_v24  ;;  %v1287_v12 = vadd.f32 %v5935_v40, %v5934_v6 }
 0x28a   : > { %3649 = vst.msk [vmem:[%s5268_s15 + $0x90] sm:$0xff] %vm681_vm0, %v3593_v32  ;;  %v1818_v8 = vadd.f32 %v1688_v49, %v1278_v11  ;;  %v5937_v49 = vld [vmem:[#allocation12_spill] sm:$0xff] }
 0x28b   : > { %v3482_v61 = vpop.f32.mrf.mxu2 }
 0x28c   : > { %v2676_v15 = vadd.f32 %v5920_v14, %v1818_v8  ;;  %v3560_v7 = vadd.f32 %v3482_v61, %v2702_v25  ;;  %v1368_v25 = vadd.f32 %v1367_v1, %v5937_v49  ;;  %v5938_v8 = vld [vmem:[#allocation108_spill] sm:$0xff]  ;;  %v5946_v1 = vld [vmem:[#allocation61_spill] sm:$0xff] }
 0x28e   : > { %v3534_v34 = vadd.f32 %v5921_v0, %v2676_v15  ;;  %v3620_v39 = vadd.f32 %v5256_v46, %v3560_v7  ;;  %v5940_v7 = vld [vmem:[#allocation58_spill] sm:$0xff] }
 0x28f   : > { %v5941_v0 = vld [vmem:[#allocation98_spill] sm:$0xff] }
 0x290   : > { %v3594_v31 = vadd.f32 %v5256_v46, %v3534_v34  ;;  %3676 = vst.msk [vmem:[%s5268_s15 + $0x168] sm:$0xff] %vm681_vm0, %v3620_v39  ;;  %v2633_v47 = vpop.f32.mrf.mxu3  ;;  %v1290_v34 = vadd.f32 %v5941_v0, %v5940_v7  ;;  %v5942_v39 = vld [vmem:[#allocation22_spill] sm:$0xff] }
 0x291   : > { %v1691_v22 = vpop.f32.mrf.mxu0  ;;  %v2705_v60 = vadd.f32 %v2633_v47, %v1847_v53  ;;  %v1848_v26 = vadd.f32 %v5942_v39, %v1368_v25 }
 0x292   : > { %3650 = vst.msk [vmem:[%s5268_s15 + $0x98] sm:$0xff] %vm681_vm0, %v3594_v31  ;;  %v1819_v9 = vadd.f32 %v1691_v22, %v1281_v28  ;;  %v1373_v28 = vpop.f32.mrf.mxu1  ;;  %v5943_v22 = vld [vmem:[#allocation14_spill] sm:$0xff] }
 0x293   : > { %v3485_v3 = vpop.f32.mrf.mxu2 }
 0x294   : > { %v2677_v4 = vadd.f32 %v5926_v21, %v1819_v9  ;;  %v3561_v41 = vadd.f32 %v3485_v3, %v2703_v37  ;;  %v1371_v37 = vadd.f32 %v1370_v56, %v5943_v22  ;;  %v5944_v9 = vld [vmem:[#allocation111_spill] sm:$0xff]  ;;  %v5961_v22 = vld [vmem:[#allocation28_spill] sm:$0xff] }
 0x296   : > { %v3535_v10 = vadd.f32 %v5927_v33, %v2677_v4  ;;  %v3621_v5 = vadd.f32 %v5256_v46, %v3561_v41  ;;  %v5947_v33 = vld [vmem:[#allocation102_spill] sm:$0xff] }
 0x298   : > { %v3595_v30 = vadd.f32 %v5256_v46, %v3535_v10  ;;  %3677 = vst.msk [vmem:[%s5268_s15 + $0x170] sm:$0xff] %vm681_vm0, %v3621_v5  ;;  %v2636_v54 = vpop.f32.mrf.mxu3  ;;  %v1293_v10 = vadd.f32 %v5947_v33, %v5946_v1  ;;  %v5948_v5 = vld [vmem:[#allocation26_spill] sm:$0xff]  ;;  %v5963_v33 = vld [vmem:[#allocation32_spill] sm:$0xff] }
 0x299   : > { %v1694_v42 = vpop.f32.mrf.mxu0  ;;  %v2706_v38 = vadd.f32 %v2636_v54, %v1848_v26  ;;  %v1849_v29 = vadd.f32 %v5948_v5, %v1371_v37  ;;  %v5950_v54 = vld [vmem:[#allocation114_spill] sm:$0xff] }
 0x29a   : > { %3651 = vst.msk [vmem:[%s5268_s15 + $0xa0] sm:$0xff] %vm681_vm0, %v3595_v30  ;;  %v1820_v17 = vadd.f32 %v1694_v42, %v1284_v51  ;;  %v1376_v30 = vpop.f32.mrf.mxu1 }
 0x29b   : > { %v3488_v62 = vpop.f32.mrf.mxu2 }
 0x29c   : > { %v2678_v58 = vadd.f32 %v5932_v20, %v1820_v17  ;;  %v3562_v2 = vadd.f32 %v3488_v62, %v2704_v48  ;;  %v5949_v48 = vld [vmem:[#allocation17_spill] sm:$0xff] }
 0x29d   : > { %v1374_v17 = vadd.f32 %v1373_v28, %v5949_v48 }
 0x29e   : > { %v3536_v13 = vadd.f32 %v5933_v63, %v2678_v58  ;;  %v3622_v36 = vadd.f32 %v5256_v46, %v3562_v2  ;;  %v5952_v2 = vld [vmem:[#allocation65_spill] sm:$0xff]  ;;  %v5953_v63 = vld [vmem:[#allocation106_spill] sm:$0xff] }
 0x2a0   : > { %v3596_v11 = vadd.f32 %v5256_v46, %v3536_v13  ;;  %3678 = vst.msk [vmem:[%s5268_s15 + $0x178] sm:$0xff] %vm681_vm0, %v3622_v36  ;;  %v2639_v43 = vpop.f32.mrf.mxu3  ;;  %v1296_v13 = vadd.f32 %v5953_v63, %v5952_v2  ;;  %v5954_v36 = vld [vmem:[#allocation30_spill] sm:$0xff] }
 0x2a1   : > { %v1697_v18 = vpop.f32.mrf.mxu0  ;;  %v2707_v55 = vadd.f32 %v2639_v43, %v1849_v29  ;;  %v1850_v56 = vadd.f32 %v5954_v36, %v1374_v17  ;;  %v5958_v43 = vld [vmem:[#allocation33_spill] sm:$0xff] }
 0x2a2   : > { %3652 = vst.msk [vmem:[%s5268_s15 + $0xa8] sm:$0xff] %vm681_vm0, %v3596_v11  ;;  %v1821_v32 = vadd.f32 %v1697_v18, %v1287_v12  ;;  %v5955_v18 = vld [vmem:[#allocation20_spill] sm:$0xff]  ;;  %v1379_v25 = vpop.f32.mrf.mxu1 }
 0x2a3   : > { %v3491_v16 = vpop.f32.mrf.mxu2 }
 0x2a4   : > { %v2679_v57 = vadd.f32 %v5938_v8, %v1821_v32  ;;  %v3563_v61 = vadd.f32 %v3491_v16, %v2705_v60  ;;  %v1377_v60 = vadd.f32 %v1376_v30, %v5955_v18  ;;  %v5956_v32 = vld [vmem:[#allocation117_spill] sm:$0xff]  ;;  %v5957_v8 = vld [vmem:[#allocation123_spill] sm:$0xff] }
 0x2a6   : > { %v3537_v14 = vadd.f32 %v5939_v52, %v2679_v57  ;;  %v3623_v15 = vadd.f32 %v5256_v46, %v3563_v61  ;;  %v1851_v52 = vadd.f32 %v5958_v43, %v1377_v60 }
 0x2a8   : > { %v3597_v27 = vadd.f32 %v5256_v46, %v3537_v14  ;;  %3679 = vst.msk [vmem:[%s5268_s15 + $0x180] sm:$0xff] %vm681_vm0, %v3623_v15  ;;  %v2642_v41 = vpop.f32.mrf.mxu3 }
 0x2a9   : > { %v1700_v50 = vpop.f32.mrf.mxu0  ;;  %v2708_v45 = vadd.f32 %v2642_v41, %v1850_v56 }
 0x2aa   : > { %3653 = vst.msk [vmem:[%s5268_s15 + $0xb0] sm:$0xff] %vm681_vm0, %v3597_v27  ;;  %v1822_v31 = vadd.f32 %v1700_v50, %v1290_v34  ;;  %v5959_v34 = vld [vmem:[#allocation24_spill] sm:$0xff]  ;;  %v1382_v28 = vpop.f32.mrf.mxu1 }
 0x2ab   : > { %v3494_v47 = vpop.f32.mrf.mxu2  ;;  %v1380_v39 = vadd.f32 %v1379_v25, %v5959_v34  ;;  %v5960_v50 = vld [vmem:[#allocation36_spill] sm:$0xff]  ;;  %v1383_v37 = vadd.f32 %v1382_v28, %v5961_v22 }
 0x2ac   : > { %v2680_v3 = vadd.f32 %v5944_v9, %v1822_v31  ;;  %v3564_v19 = vadd.f32 %v3494_v47, %v2706_v38 }
 0x2ad   : > { %v1852_v38 = vadd.f32 %v5960_v50, %v1380_v39 }
 0x2ae   : > { %v3538_v21 = vadd.f32 %v5945_v44, %v2680_v3  ;;  %v3624_v4 = vadd.f32 %v5256_v46, %v3564_v19  ;;  %v5962_v44 = vld [vmem:[#allocation39_spill] sm:$0xff] }
 0x2b0   : > { %v3598_v59 = vadd.f32 %v5256_v46, %v3538_v21  ;;  %3680 = vst.msk [vmem:[%s5268_s15 + $0x188] sm:$0xff] %vm681_vm0, %v3624_v4  ;;  %v4130_v46 = vld [vmem:[%s5719_s12] ss:$0 sm:$0xff]  ;;  %v2645_v40 = vpop.f32.mrf.mxu3  ;;  %v1853_v21 = vadd.f32 %v5962_v44, %v1383_v37 }
 0x2b1   : > { %v1703_v51 = vpop.f32.mrf.mxu0  ;;  %v2709_v15 = vadd.f32 %v2645_v40, %v1851_v52 }
 0x2b2   : > { %3654 = vst.msk [vmem:[%s5268_s15 + $0xb8] sm:$0xff] %vm681_vm0, %v3598_v59  ;;  %v1823_v24 = vadd.f32 %v1703_v51, %v1293_v10  ;;  %v1385_v4 = vpop.f32.mrf.mxu1  ;;  %v5964_v51 = vld [vmem:[#allocation42_spill] sm:$0xff] }
 0x2b3   : > { %v3497_v42 = vpop.f32.mrf.mxu2  ;;  %v1386_v10 = vadd.f32 %v1385_v4, %v5963_v33 }
 0x2b4   : > { %v2681_v62 = vadd.f32 %v5950_v54, %v1823_v24  ;;  %v3565_v35 = vadd.f32 %v3497_v42, %v2707_v55 }
 0x2b5   : > { %v1854_v55 = vadd.f32 %v5964_v51, %v1386_v10 }
 0x2b6   : > { %v3539_v20 = vadd.f32 %v5951_v23, %v2681_v62  ;;  %v3625_v58 = vadd.f32 %v4130_v46, %v3565_v35 }
 0x2b8   : > { %v3599_v6 = vadd.f32 %v4130_v46, %v3539_v20  ;;  %3681 = vst.msk [vmem:[%s5268_s15 + $0x190] sm:$0xff] %vm681_vm0, %v3625_v58  ;;  %v2648_v7 = vpop.f32.mrf.mxu3 }
 0x2b9   : > { %v1706_v12 = vpop.f32.mrf.mxu0  ;;  %v2710_v31 = vadd.f32 %v2648_v7, %v1852_v38 }
 0x2ba   : > { %3655 = vst.msk [vmem:[%s5268_s15 + $0xc0] sm:$0xff] %vm681_vm0, %v3599_v6  ;;  %v1824_v53 = vadd.f32 %v1706_v12, %v1296_v13 }
 0x2bb   : > { %v3500_v11 = vpop.f32.mrf.mxu2 }
 0x2bc   : > { %v2682_v16 = vadd.f32 %v5956_v32, %v1824_v53  ;;  %v3566_v49 = vadd.f32 %v3500_v11, %v2708_v45 }
 0x2be   : > { %v3540_v57 = vadd.f32 %v5957_v8, %v2682_v16  ;;  %v3626_v61 = vadd.f32 %v4130_v46, %v3566_v49 }
 0x2c0   : > { %v3600_v14 = vadd.f32 %v4130_v46, %v3540_v57  ;;  %3682 = vst.msk [vmem:[%s5268_s15 + $0x198] sm:$0xff] %vm681_vm0, %v3626_v61  ;;  %v2651_v3 = vpop.f32.mrf.mxu3 }
 0x2c1   : > { %v2711_v41 = vadd.f32 %v2651_v3, %v1853_v21 }
 0x2c2   : > { %3656 = vst.msk [vmem:[%s5268_s15 + $0xc8] sm:$0xff] %vm681_vm0, %v3600_v14 }
 0x2c3   : > { %v3503_v0 = vpop.f32.mrf.mxu2 }
 0x2c4   : > { %v3567_v26 = vadd.f32 %v3503_v0, %v2709_v15 }
 0x2c6   : > { %v3627_v27 = vadd.f32 %v4130_v46, %v3567_v26 }
 0x2c8   : > { %3683 = vst.msk [vmem:[%s5268_s15 + $0x1a0] sm:$0xff] %vm681_vm0, %v3627_v27  ;;  %v2654_v59 = vpop.f32.mrf.mxu3 }
 0x2c9   : > { %v2712_v24 = vadd.f32 %v2654_v59, %v1854_v55 }
 0x2cb   : > { %v3506_v47 = vpop.f32.mrf.mxu2 }
 0x2cc   : > { %v3568_v9 = vadd.f32 %v3506_v47, %v2710_v31 }
 0x2ce   : > { %v3628_v19 = vadd.f32 %v4130_v46, %v3568_v9 }
 0x2d0   : > { %3684 = vst.msk [vmem:[%s5268_s15 + $0x1a8] sm:$0xff] %vm681_vm0, %v3628_v19 }
 0x2d3   : > { %v3509_v1 = vpop.f32.mrf.mxu2 }
 0x2d4   : > { %v3569_v5 = vadd.f32 %v3509_v1, %v2711_v41 }
 0x2d6   : > { %v3629_v29 = vadd.f32 %v4130_v46, %v3569_v5 }
 0x2d8   : > { %3685 = vst.msk [vmem:[%s5268_s15 + $0x1b0] sm:$0xff] %vm681_vm0, %v3629_v29 }
 0x2db   : > { %v3512_v30 = vpop.f32.mrf.mxu2 }
 0x2dc   : > { %v3570_v42 = vadd.f32 %v3512_v30, %v2712_v24 }
 0x2de   : > { %v3630_v48 = vadd.f32 %v4130_v46, %v3570_v42 }
 0x2e0   : > { %3687 = vst.msk [vmem:[%s5268_s15 + $0x1b8] sm:$0x1] %vm3686_vm2, %v3630_v48 }
 0x2e1 PF: > { %s23_s25 = sadd.s32 1, %s4137_s25  }
 0x2e2   : > { %p20_p4 = scmp.ge.s32.totalorder %s23_s25, 4  }
 0x2e4   :  { %22 = sbr.rel (!%p20_p4) target bundleno = 1 (0x1), region = 120 }

// kernel: squeeze.47
= control target key start
LH: loop header
LB: loop body
LE: loop exit
PB: predicated region body
PF: predicated region fallthrough
CT: control target
= control target key end

     0   :  { %vm3_vm0 = vcmask 261120   ;;  %s105_s0 = inlined_call_operand.vmem [shape: f32[1,18,32], index: 0, kind: input, shape index: {}]   ;;  %s106_s1 = inlined_call_operand.vmem [shape: f32[2,3,3,32], index: 1, kind: output, shape index: {}]  }
   0x1   :  { %v2_v0 = vld [vmem:[%s105_s0] sm:$0xff]   ;;  %v61_v1 = vld [vmem:[%s105_s0 + $0x8] sm:$0xff]   ;;  %v62_v2 = vld [vmem:[%s105_s0 + $0x10] sm:$0x3]  }
   0x2   :  { %4 = vst.msk [vmem:[#allocation0] sm:$0x7] %vm3_vm0, %v2_v0  }
   0x3   :  { %6 = vst.msk [vmem:[#allocation0 + $0x5] sm:$0x38] %vm3_vm0, %v2_v0  }
   0x4   :  { %8 = vst.msk [vmem:[#allocation0 + $0xa] sm:$0xc0] %vm3_vm0, %v2_v0  }
   0x5   :  { %13 = vst.msk [vmem:[#allocation0 + $0x12] ss:$6 sm:$0x3] %vm3_vm0, %v61_v1  }
   0x6   :  { %15 = vst.msk [vmem:[#allocation0 + $0x17] sm:$0xc] %vm3_vm0, %v61_v1  }
   0x7   :  { %17 = vst.msk [vmem:[#allocation0 + $0x1c] sm:$0x70] %vm3_vm0, %v61_v1  }
   0x8   :  { %19 = vst.msk [vmem:[#allocation0 + $0x21] sm:$0x80] %vm3_vm0, %v61_v1  }
   0x9   :  { %24 = vst.msk [vmem:[#allocation0 + $0x29] sm:$0x3] %vm3_vm0, %v62_v2   ;;  %v27_v3 = vld [vmem:[#allocation0] sm:$0xf] }
   0xa   :  { %30 = vst [vmem:[%s106_s1] sm:$0xf] %v27_v3  ;;  %v32_v4 = vld [vmem:[#allocation0 + $0x8] sm:$0xf] }
   0xb   :  { %63 = vst [vmem:[%s106_s1 + $0x4] sm:$0xf] %v32_v4 }
   0xc   :  { %v38_v5 = vld [vmem:[#allocation0 + $0x10] sm:$0xf] }
   0xd   :  { %64 = vst [vmem:[%s106_s1 + $0x8] sm:$0xf] %v38_v5  ;;  %v44_v6 = vld [vmem:[#allocation0 + $0x18] sm:$0xf] }
   0xe   :  { %65 = vst [vmem:[%s106_s1 + $0xc] sm:$0xf] %v44_v6  ;;  %v50_v7 = vld [vmem:[#allocation0 + $0x20] sm:$0xf] }
   0xf   :  { %66 = vst [vmem:[%s106_s1 + $0x10] sm:$0xf] %v50_v7 }
  0x10   :  { %v56_v8 = vld [vmem:[#allocation0 + $0x28] sm:$0xf] }
  0x11   :  { %67 = vst [vmem:[%s106_s1 + $0x14] sm:$0xf] %v56_v8 }

// kernel: scene_graph_forward.7
= control target key start
LH: loop header
LB: loop body
LE: loop exit
PB: predicated region body
PF: predicated region fallthrough
CT: control target
= control target key end

     0   :  { %s1080_s12 = smov 0   ;;  %s1382_s0 = inlined_call_operand.vmem [shape: f32[2,18,1568], index: 0, kind: input, shape index: {}]   ;;  %s1383_s1 = inlined_call_operand.vmem [shape: f32[2,1568,32], index: 1, kind: input, shape index: {}]   ;;  %s1384_s2 = inlined_call_operand.vmem [shape: f32[2,1,32], index: 2, kind: input, shape index: {}]   ;;  %s1385_s3 = inlined_call_operand.vmem [shape: f32[2,18,32], index: 3, kind: output, shape index: {}]  }
   0x1 LB: > { %s1007_s13 = sadd.s32 4294967295, %s1058_s12   ;;  %p1011_p0 = scmp.ge.s32.totalorder %s1058_s12, 1  ;;  %s1058_s12 = sphi %s1080_s12, %s13_s12  }
   0x2   : > { %p155_p1 = scmp.lt.s32.totalorder %s1058_s12, 3 }
   0x4   : > { %p156_p2 = pnand %p1011_p0, %p155_p1 }
   0x5   : > { %p187_p3 = scmp.lt.s32.totalorder (!%p156_p2), %s1007_s13, 1 }
   0x6   : > { %159 = sbr.rel (%p156_p2) target bundleno = 447 (0x1bf), region = 32 }
   0xb   : > { %s1387_s13 = smov (!%p187_p3, %s1007_s13), 1  ;;  %vm483_vm0 = vcmask 261120   ;;  %vm840_vm1 = vcmask 254976  }
   0xc   : > { %s1029_s14 = smul.u32 1568, %s1387_s13  ;;  %s199_s24 = scalar_lea.vmem %s1384_s2, %s1387_s13 }
   0xd   : > { %s1028_s18 = smul.u32 312, %s1387_s13 }
   0xe   : > { %s1094_s17 = scalar_lea.vmem %s1383_s1, %s1029_s14  ;;  %s1030_s27 = smul.u32 24, %s1387_s13 }
   0xf   : > { %v298_v0 = vld [vmem:[%s1094_s17 + $0x78] sm:$0xff]  ;;  %v297_v3 = vld [vmem:[%s1094_s17 + $0x70] sm:$0xff]  ;;  %v296_v7 = vld [vmem:[%s1094_s17 + $0x68] sm:$0xff]  ;;  %s1167_s21 = scalar_lea.vmem %s1382_s0, %s1028_s18 }
  0x10   : > { %v314_v1 = vld [vmem:[%s1094_s17 + $0xf8] sm:$0xff]  ;;  %493 = vmatpush.msra.mxu0 %v298_v0  ;;  %v313_v4 = vld [vmem:[%s1094_s17 + $0xf0] sm:$0xff]  ;;  %v312_v8 = vld [vmem:[%s1094_s17 + $0xe8] sm:$0xff]  ;;  %s1368_s30 = scalar_lea.vmem %s1385_s3, %s1030_s27 }
  0x11   : > { %v330_v2 = vld [vmem:[%s1094_s17 + $0x178] sm:$0xff]  ;;  %519 = vmatpush.msra.mxu1 %v314_v1  ;;  %v329_v5 = vld [vmem:[%s1094_s17 + $0x170] sm:$0xff]  ;;  %v328_v9 = vld [vmem:[%s1094_s17 + $0x168] sm:$0xff] }
  0x12   : > { %545 = vmatpush.msra.mxu2 %v330_v2  ;;  %v346_v6 = vld [vmem:[%s1094_s17 + $0x1f8] sm:$0xff]  ;;  %494 = vmatpush.msra.mxu0 %v297_v3  ;;  %v345_v10 = vld [vmem:[%s1094_s17 + $0x1f0] sm:$0xff]  ;;  %v295_v11 = vld [vmem:[%s1094_s17 + $0x60] sm:$0xff] }
  0x13   : > { %520 = vmatpush.msra.mxu1 %v313_v4  ;;  %571 = vmatpush.msra.mxu3 %v346_v6  ;;  %v311_v12 = vld [vmem:[%s1094_s17 + $0xe0] sm:$0xff]  ;;  %v344_v14 = vld [vmem:[%s1094_s17 + $0x1e8] sm:$0xff]  ;;  %v294_v15 = vld [vmem:[%s1094_s17 + $0x58] sm:$0xff] }
  0x14   : > { %546 = vmatpush.msra.mxu2 %v329_v5  ;;  %495 = vmatpush.msra.mxu0 %v296_v7  ;;  %v327_v13 = vld [vmem:[%s1094_s17 + $0x160] sm:$0xff]  ;;  %v310_v16 = vld [vmem:[%s1094_s17 + $0xd8] sm:$0xff]  ;;  %v293_v19 = vld [vmem:[%s1094_s17 + $0x50] sm:$0xff] }
  0x15   : > { %521 = vmatpush.msra.mxu1 %v312_v8  ;;  %572 = vmatpush.msra.mxu3 %v345_v10  ;;  %v326_v17 = vld [vmem:[%s1094_s17 + $0x158] sm:$0xff]  ;;  %v343_v18 = vld [vmem:[%s1094_s17 + $0x1e0] sm:$0xff]  ;;  %v309_v20 = vld [vmem:[%s1094_s17 + $0xd0] sm:$0xff] }
  0x16   : > { %547 = vmatpush.msra.mxu2 %v328_v9  ;;  %496 = vmatpush.msra.mxu0 %v295_v11  ;;  %v325_v21 = vld [vmem:[%s1094_s17 + $0x150] sm:$0xff]  ;;  %v342_v22 = vld [vmem:[%s1094_s17 + $0x1d8] sm:$0xff]  ;;  %v292_v23 = vld [vmem:[%s1094_s17 + $0x48] sm:$0xff] }
  0x17   : > { %522 = vmatpush.msra.mxu1 %v311_v12  ;;  %573 = vmatpush.msra.mxu3 %v344_v14  ;;  %v308_v24 = vld [vmem:[%s1094_s17 + $0xc8] sm:$0xff]  ;;  %v341_v26 = vld [vmem:[%s1094_s17 + $0x1d0] sm:$0xff]  ;;  %v291_v27 = vld [vmem:[%s1094_s17 + $0x40] sm:$0xff] }
  0x18   : > { %548 = vmatpush.msra.mxu2 %v327_v13  ;;  %497 = vmatpush.msra.mxu0 %v294_v15  ;;  %v324_v25 = vld [vmem:[%s1094_s17 + $0x148] sm:$0xff]  ;;  %v307_v28 = vld [vmem:[%s1094_s17 + $0xc0] sm:$0xff]  ;;  %v290_v31 = vld [vmem:[%s1094_s17 + $0x38] sm:$0xff] }
  0x19   : > { %523 = vmatpush.msra.mxu1 %v310_v16  ;;  %574 = vmatpush.msra.mxu3 %v343_v18  ;;  %v323_v29 = vld [vmem:[%s1094_s17 + $0x140] sm:$0xff]  ;;  %v340_v30 = vld [vmem:[%s1094_s17 + $0x1c8] sm:$0xff]  ;;  %v306_v32 = vld [vmem:[%s1094_s17 + $0xb8] sm:$0xff] }
  0x1a   : > { %549 = vmatpush.msra.mxu2 %v326_v17  ;;  %498 = vmatpush.msra.mxu0 %v293_v19  ;;  %v322_v33 = vld [vmem:[%s1094_s17 + $0x138] sm:$0xff]  ;;  %v339_v34 = vld [vmem:[%s1094_s17 + $0x1c0] sm:$0xff]  ;;  %v289_v35 = vld [vmem:[%s1094_s17 + $0x30] sm:$0xff] }
  0x1b   : > { %524 = vmatpush.msra.mxu1 %v309_v20  ;;  %575 = vmatpush.msra.mxu3 %v342_v22  ;;  %v305_v36 = vld [vmem:[%s1094_s17 + $0xb0] sm:$0xff]  ;;  %v338_v38 = vld [vmem:[%s1094_s17 + $0x1b8] sm:$0xff]  ;;  %v288_v39 = vld [vmem:[%s1094_s17 + $0x28] sm:$0xff] }
  0x1c   : > { %550 = vmatpush.msra.mxu2 %v325_v21  ;;  %499 = vmatpush.msra.mxu0 %v292_v23  ;;  %v321_v37 = vld [vmem:[%s1094_s17 + $0x130] sm:$0xff]  ;;  %v304_v40 = vld [vmem:[%s1094_s17 + $0xa8] sm:$0xff]  ;;  %v287_v43 = vld [vmem:[%s1094_s17 + $0x20] sm:$0xff] }
  0x1d   : > { %525 = vmatpush.msra.mxu1 %v308_v24  ;;  %576 = vmatpush.msra.mxu3 %v341_v26  ;;  %v320_v41 = vld [vmem:[%s1094_s17 + $0x128] sm:$0xff]  ;;  %v337_v42 = vld [vmem:[%s1094_s17 + $0x1b0] sm:$0xff]  ;;  %v303_v44 = vld [vmem:[%s1094_s17 + $0xa0] sm:$0xff] }
  0x1e   : > { %551 = vmatpush.msra.mxu2 %v324_v25  ;;  %500 = vmatpush.msra.mxu0 %v291_v27  ;;  %v319_v45 = vld [vmem:[%s1094_s17 + $0x120] sm:$0xff]  ;;  %v336_v46 = vld [vmem:[%s1094_s17 + $0x1a8] sm:$0xff]  ;;  %v286_v47 = vld [vmem:[%s1094_s17 + $0x18] sm:$0xff] }
  0x1f   : > { %526 = vmatpush.msra.mxu1 %v307_v28  ;;  %577 = vmatpush.msra.mxu3 %v340_v30  ;;  %v302_v48 = vld [vmem:[%s1094_s17 + $0x98] sm:$0xff]  ;;  %v335_v50 = vld [vmem:[%s1094_s17 + $0x1a0] sm:$0xff]  ;;  %v285_v51 = vld [vmem:[%s1094_s17 + $0x10] sm:$0xff] }
  0x20   : > { %552 = vmatpush.msra.mxu2 %v323_v29  ;;  %501 = vmatpush.msra.mxu0 %v290_v31  ;;  %v318_v49 = vld [vmem:[%s1094_s17 + $0x118] sm:$0xff]  ;;  %v301_v52 = vld [vmem:[%s1094_s17 + $0x90] sm:$0xff]  ;;  %v284_v55 = vld [vmem:[%s1094_s17 + $0x8] sm:$0xff] }
  0x21   : > { %527 = vmatpush.msra.mxu1 %v306_v32  ;;  %578 = vmatpush.msra.mxu3 %v339_v34  ;;  %v317_v53 = vld [vmem:[%s1094_s17 + $0x110] sm:$0xff]  ;;  %v334_v54 = vld [vmem:[%s1094_s17 + $0x198] sm:$0xff]  ;;  %v300_v56 = vld [vmem:[%s1094_s17 + $0x88] sm:$0xff] }
  0x22   : > { %553 = vmatpush.msra.mxu2 %v322_v33  ;;  %502 = vmatpush.msra.mxu0 %v289_v35  ;;  %v316_v57 = vld [vmem:[%s1094_s17 + $0x108] sm:$0xff]  ;;  %v333_v58 = vld [vmem:[%s1094_s17 + $0x190] sm:$0xff]  ;;  %v283_v59 = vld [vmem:[%s1094_s17] sm:$0xff] }
  0x23   : > { %528 = vmatpush.msra.mxu1 %v305_v36  ;;  %579 = vmatpush.msra.mxu3 %v338_v38  ;;  %v299_v60 = vld [vmem:[%s1094_s17 + $0x80] sm:$0xff]  ;;  %v332_v62 = vld [vmem:[%s1094_s17 + $0x188] sm:$0xff]  ;;  %v362_v63 = vld [vmem:[%s1094_s17 + $0x278] sm:$0xff] }
  0x24   : > { %554 = vmatpush.msra.mxu2 %v321_v37  ;;  %503 = vmatpush.msra.mxu0 %v288_v39  ;;  %v315_v61 = vld [vmem:[%s1094_s17 + $0x100] sm:$0xff]  ;;  %v378_v0 = vld [vmem:[%s1094_s17 + $0x2f8] sm:$0xff]  ;;  %v361_v3 = vld [vmem:[%s1094_s17 + $0x270] sm:$0xff] }
  0x25   : > { %529 = vmatpush.msra.mxu1 %v304_v40  ;;  %580 = vmatpush.msra.mxu3 %v337_v42  ;;  %v394_v1 = vld [vmem:[%s1094_s17 + $0x378] sm:$0xff]  ;;  %v331_v2 = vld [vmem:[%s1094_s17 + $0x180] sm:$0xff]  ;;  %v377_v4 = vld [vmem:[%s1094_s17 + $0x2f0] sm:$0xff] }
  0x26   : > { %555 = vmatpush.msra.mxu2 %v320_v41  ;;  %504 = vmatpush.msra.mxu0 %v287_v43  ;;  %v393_v5 = vld [vmem:[%s1094_s17 + $0x370] sm:$0xff]  ;;  %v410_v6 = vld [vmem:[%s1094_s17 + $0x3f8] sm:$0xff]  ;;  %v360_v7 = vld [vmem:[%s1094_s17 + $0x268] sm:$0xff] }
  0x27   : > { %530 = vmatpush.msra.mxu1 %v303_v44  ;;  %581 = vmatpush.msra.mxu3 %v336_v46  ;;  %v376_v8 = vld [vmem:[%s1094_s17 + $0x2e8] sm:$0xff]  ;;  %v205_v9 = vld [vmem:[%s1167_s21] sm:$0xff]  ;;  %v207_v10 = vld [vmem:[%s1167_s21 + $0x10] sm:$0xff] }
  0x28   : > { %556 = vmatpush.msra.mxu2 %v319_v45  ;;  %505 = vmatpush.msra.mxu0 %v286_v47  ;;  %v392_v11 = vld [vmem:[%s1094_s17 + $0x368] sm:$0xff]  ;;  %v409_v12 = vld [vmem:[%s1094_s17 + $0x3f0] sm:$0xff]  ;;  %v359_v13 = vld [vmem:[%s1094_s17 + $0x260] sm:$0xff]  ;;  %v244_v17 = vmax.f32 %v205_v9, 0.0  ;;  %v246_v18 = vmax.f32 %v207_v10, 0.0 }
  0x29   : > { %531 = vmatpush.msra.mxu1 %v302_v48  ;;  %582 = vmatpush.msra.mxu3 %v335_v50  ;;  %v375_v14 = vld [vmem:[%s1094_s17 + $0x2e0] sm:$0xff]  ;;  %v408_v16 = vld [vmem:[%s1094_s17 + $0x3e8] sm:$0xff]  ;;  %v208_v20 = vld [vmem:[%s1167_s21 + $0x18] sm:$0xff] }
  0x2a   : > { %557 = vmatpush.msra.mxu2 %v318_v49  ;;  %506 = vmatpush.msra.mxu0 %v285_v51  ;;  %v391_v15 = vld [vmem:[%s1094_s17 + $0x360] sm:$0xff]  ;;  %v206_v19 = vld [vmem:[%s1167_s21 + $0x8] sm:$0xff]  ;;  %v358_v21 = vld [vmem:[%s1094_s17 + $0x258] sm:$0xff]  ;;  %v247_v26 = vmax.f32 %v208_v20, 0.0 }
  0x2b   : > { %532 = vmatpush.msra.mxu1 %v301_v52  ;;  %583 = vmatpush.msra.mxu3 %v334_v54  ;;  %v374_v22 = vld [vmem:[%s1094_s17 + $0x2d8] sm:$0xff]  ;;  %v407_v24 = vld [vmem:[%s1094_s17 + $0x3e0] sm:$0xff]  ;;  %v245_v25 = vmax.f32 %v206_v19, 0.0  ;;  %v357_v27 = vld [vmem:[%s1094_s17 + $0x250] sm:$0xff] }
  0x2c   : > { %558 = vmatpush.msra.mxu2 %v317_v53  ;;  %507 = vmatpush.msra.mxu0 %v284_v55  ;;  %v390_v23 = vld [vmem:[%s1094_s17 + $0x358] sm:$0xff]  ;;  %v373_v28 = vld [vmem:[%s1094_s17 + $0x2d0] sm:$0xff]  ;;  %v356_v31 = vld [vmem:[%s1094_s17 + $0x248] sm:$0xff] }
  0x2d   : > { %533 = vmatpush.msra.mxu1 %v300_v56  ;;  %584 = vmatpush.msra.mxu3 %v333_v58  ;;  %v389_v29 = vld [vmem:[%s1094_s17 + $0x350] sm:$0xff]  ;;  %v406_v30 = vld [vmem:[%s1094_s17 + $0x3d8] sm:$0xff]  ;;  %v372_v32 = vld [vmem:[%s1094_s17 + $0x2c8] sm:$0xff] }
  0x2e   : > { %559 = vmatpush.msra.mxu2 %v316_v57  ;;  %508 = vmatpush.msra.mxu0 %v283_v59  ;;  %v218_v33 = vld [vmem:[%s1167_s21 + $0x68] sm:$0xff]  ;;  %v220_v34 = vld [vmem:[%s1167_s21 + $0x78] sm:$0xff]  ;;  %v405_v36 = vld [vmem:[%s1094_s17 + $0x3d0] sm:$0xff] }
  0x2f   : > { %534 = vmatpush.msra.mxu1 %v299_v60  ;;  %585 = vmatpush.msra.mxu3 %v332_v62  ;;  %v388_v35 = vld [vmem:[%s1094_s17 + $0x348] sm:$0xff]  ;;  %v355_v37 = vld [vmem:[%s1094_s17 + $0x240] sm:$0xff]  ;;  %v257_v41 = vmax.f32 %v218_v33, 0.0  ;;  %v259_v42 = vmax.f32 %v220_v34, 0.0  ;;  %v219_v43 = vld [vmem:[%s1167_s21 + $0x70] sm:$0xff] }
  0x30   : > { %560 = vmatpush.msra.mxu2 %v315_v61  ;;  %597 = vmatpush.msrb.mxu0 %v362_v63  ;;  %v371_v38 = vld [vmem:[%s1094_s17 + $0x2c0] sm:$0xff]  ;;  %v404_v40 = vld [vmem:[%s1094_s17 + $0x3c8] sm:$0xff]  ;;  %v354_v45 = vld [vmem:[%s1094_s17 + $0x238] sm:$0xff]  ;;  %v258_v49 = vmax.f32 %v219_v43, 0.0 }
  0x31   : > { %623 = vmatpush.msrb.mxu1 %v378_v0  ;;  %586 = vmatpush.msra.mxu3 %v331_v2  ;;  %v387_v39 = vld [vmem:[%s1094_s17 + $0x340] sm:$0xff]  ;;  %v370_v46 = vld [vmem:[%s1094_s17 + $0x2b8] sm:$0xff]  ;;  %v353_v51 = vld [vmem:[%s1094_s17 + $0x230] sm:$0xff] }
  0x32   : > { %649 = vmatpush.msrb.mxu2 %v394_v1  ;;  %598 = vmatpush.msrb.mxu0 %v361_v3  ;;  %v221_v44 = vld [vmem:[%s1167_s21 + $0x80] sm:$0xff]  ;;  %v386_v47 = vld [vmem:[%s1094_s17 + $0x338] sm:$0xff]  ;;  %v369_v52 = vld [vmem:[%s1094_s17 + $0x2b0] sm:$0xff] }
  0x33   : > { %624 = vmatpush.msrb.mxu1 %v377_v4  ;;  %675 = vmatpush.msrb.mxu3 %v410_v6  ;;  %v403_v48 = vld [vmem:[%s1094_s17 + $0x3c0] sm:$0xff]  ;;  %v260_v50 = vmax.f32 %v221_v44, 0.0  ;;  %v385_v53 = vld [vmem:[%s1094_s17 + $0x330] sm:$0xff]  ;;  %v402_v54 = vld [vmem:[%s1094_s17 + $0x3b8] sm:$0xff] }
  0x34   : > { %650 = vmatpush.msrb.mxu2 %v393_v5  ;;  %599 = vmatpush.msrb.mxu0 %v360_v7  ;;  %v352_v55 = vld [vmem:[%s1094_s17 + $0x228] sm:$0xff]  ;;  %v231_v57 = vld [vmem:[%s1167_s21 + $0xd0] sm:$0x3]  ;;  %v233_v58 = vld [vmem:[%s1167_s21 + $0xe0] sm:$0x3] }
  0x35   : > { %625 = vmatpush.msrb.mxu1 %v376_v8  ;;  %676 = vmatpush.msrb.mxu3 %v409_v12  ;;  %v368_v56 = vld [vmem:[%s1094_s17 + $0x2a8] sm:$0xff]  ;;  %v401_v60 = vld [vmem:[%s1094_s17 + $0x3b0] sm:$0xff]  ;;  %v351_v61 = vld [vmem:[%s1094_s17 + $0x220] sm:$0xff]  ;;  %v270_v1 = vmax.f32 %v231_v57, 0.0  ;;  %v272_v2 = vmax.f32 %v233_v58, 0.0 }
  0x36   : > { %651 = vmatpush.msrb.mxu2 %v392_v11  ;;  %600 = vmatpush.msrb.mxu0 %v359_v13  ;;  %v384_v59 = vld [vmem:[%s1094_s17 + $0x328] sm:$0xff]  ;;  %v367_v62 = vld [vmem:[%s1094_s17 + $0x2a0] sm:$0xff]  ;;  %v232_v3 = vld [vmem:[%s1167_s21 + $0xd8] sm:$0x3] }
  0x37   : > { %626 = vmatpush.msrb.mxu1 %v375_v14  ;;  %677 = vmatpush.msrb.mxu3 %v408_v16  ;;  %v383_v63 = vld [vmem:[%s1094_s17 + $0x320] sm:$0xff]  ;;  %v400_v0 = vld [vmem:[%s1094_s17 + $0x3a8] sm:$0xff]  ;;  %v350_v5 = vld [vmem:[%s1094_s17 + $0x218] sm:$0xff]  ;;  %v271_v9 = vmax.f32 %v232_v3, 0.0 }
  0x38   : > { %652 = vmatpush.msrb.mxu2 %v391_v15  ;;  %509 = vmatmul.f32.vlgmr.msra.gmra.mxu0 %v244_v17  ;;  %v234_v4 = vld [vmem:[%s1167_s21 + $0xe8] sm:$0x3]  ;;  %v366_v6 = vld [vmem:[%s1094_s17 + $0x298] sm:$0xff]  ;;  %v399_v8 = vld [vmem:[%s1094_s17 + $0x3a0] sm:$0xff] }
  0x39   : > { %561 = vmatmul.f32.vlgmr.msra.gmra.mxu2 %v246_v18  ;;  %601 = vmatpush.msrb.mxu0 %v358_v21  ;;  %v382_v7 = vld [vmem:[%s1094_s17 + $0x318] sm:$0xff]  ;;  %v273_v10 = vmax.f32 %v234_v4, 0.0  ;;  %v349_v11 = vld [vmem:[%s1094_s17 + $0x210] sm:$0xff]  ;;  %v348_v15 = vld [vmem:[%s1094_s17 + $0x208] sm:$0xff] }
  0x3a   : > { %627 = vmatpush.msrb.mxu1 %v374_v22  ;;  %653 = vmatpush.msrb.mxu2 %v390_v23  ;;  %v365_v12 = vld [vmem:[%s1094_s17 + $0x290] sm:$0xff]  ;;  %v398_v14 = vld [vmem:[%s1094_s17 + $0x398] sm:$0xff]  ;;  %v364_v16 = vld [vmem:[%s1094_s17 + $0x288] sm:$0xff] }
  0x3b   : > { %678 = vmatpush.msrb.mxu3 %v407_v24  ;;  %535 = vmatmul.f32.vlgmr.msra.gmra.mxu1 %v245_v25  ;;  %v381_v13 = vld [vmem:[%s1094_s17 + $0x310] sm:$0xff]  ;;  %v209_v17 = vld [vmem:[%s1167_s21 + $0x20] sm:$0xff]  ;;  %v380_v19 = vld [vmem:[%s1094_s17 + $0x308] sm:$0xff] }
  0x3c   : > { %587 = vmatmul.f32.vlgmr.msra.gmra.mxu3 %v247_v26  ;;  %602 = vmatpush.msrb.mxu0 %v357_v27  ;;  %v211_v18 = vld [vmem:[%s1167_s21 + $0x30] sm:$0xff]  ;;  %v347_v21 = vld [vmem:[%s1094_s17 + $0x200] sm:$0xff]  ;;  %v396_v24 = vld [vmem:[%s1094_s17 + $0x388] sm:$0xff]  ;;  %v248_v25 = vmax.f32 %v209_v17, 0.0 }
  0x3d   : > { %628 = vmatpush.msrb.mxu1 %v373_v28  ;;  %654 = vmatpush.msrb.mxu2 %v389_v29  ;;  %v397_v20 = vld [vmem:[%s1094_s17 + $0x390] sm:$0xff]  ;;  %v363_v22 = vld [vmem:[%s1094_s17 + $0x280] sm:$0xff]  ;;  %v250_v26 = vmax.f32 %v211_v18, 0.0  ;;  %v210_v27 = vld [vmem:[%s1167_s21 + $0x28] sm:$0xff] }
  0x3e   : > { %679 = vmatpush.msrb.mxu3 %v406_v30  ;;  %603 = vmatpush.msrb.mxu0 %v356_v31  ;;  %v379_v23 = vld [vmem:[%s1094_s17 + $0x300] sm:$0xff]  ;;  %v212_v28 = vld [vmem:[%s1167_s21 + $0x38] sm:$0xff]  ;;  %v249_v33 = vmax.f32 %v210_v27, 0.0  ;;  %v456_v43 = vld [vmem:[%s1094_s17 + $0x568] sm:$0xff] }
  0x3f   : > { %629 = vmatpush.msrb.mxu1 %v372_v32  ;;  %655 = vmatpush.msrb.mxu2 %v388_v35  ;;  %v426_v29 = vld [vmem:[%s1094_s17 + $0x478] sm:$0xff]  ;;  %v395_v32 = vld [vmem:[%s1094_s17 + $0x380] sm:$0xff]  ;;  %v251_v34 = vmax.f32 %v212_v28, 0.0  ;;  %v425_v35 = vld [vmem:[%s1094_s17 + $0x470] sm:$0xff] }
  0x40   : > { %680 = vmatpush.msrb.mxu3 %v405_v36  ;;  %604 = vmatpush.msrb.mxu0 %v355_v37  ;;  %v442_v30 = vld [vmem:[%s1094_s17 + $0x4f8] sm:$0xff]  ;;  %v441_v36 = vld [vmem:[%s1094_s17 + $0x4f0] sm:$0xff]  ;;  %v452_v3 = vld [vmem:[%s1094_s17 + $0x548] sm:$0xff] }
  0x41   : > { %630 = vmatpush.msrb.mxu1 %v371_v38  ;;  %656 = vmatpush.msrb.mxu2 %v387_v39  ;;  %v458_v31 = vld [vmem:[%s1094_s17 + $0x578] sm:$0xff]  ;;  %v457_v37 = vld [vmem:[%s1094_s17 + $0x570] sm:$0xff]  ;;  %v424_v39 = vld [vmem:[%s1094_s17 + $0x468] sm:$0xff] }
  0x42   : > { %681 = vmatpush.msrb.mxu3 %v404_v40  ;;  %512 = vmatmul.f32.gmra.mxu0 %v257_v41  ;;  %v474_v38 = vld [vmem:[%s1094_s17 + $0x5f8] sm:$0xff]  ;;  %v440_v40 = vld [vmem:[%s1094_s17 + $0x4e8] sm:$0xff]  ;;  %v473_v44 = vld [vmem:[%s1094_s17 + $0x5f0] sm:$0xff] }
  0x43   : > { %564 = vmatmul.f32.gmra.mxu2 %v259_v42  ;;  %605 = vmatpush.msrb.mxu0 %v354_v45  ;;  %v222_v41 = vld [vmem:[%s1167_s21 + $0x88] sm:$0xff]  ;;  %v224_v42 = vld [vmem:[%s1167_s21 + $0x98] sm:$0xff]  ;;  %v423_v45 = vld [vmem:[%s1094_s17 + $0x460] sm:$0xff] }
  0x44   : > { %631 = vmatpush.msrb.mxu1 %v370_v46  ;;  %657 = vmatpush.msrb.mxu2 %v386_v47  ;;  %v439_v46 = vld [vmem:[%s1094_s17 + $0x4e0] sm:$0xff]  ;;  %v469_v4 = vld [vmem:[%s1094_s17 + $0x5d0] sm:$0xff] }
  0x45   : > { %682 = vmatpush.msrb.mxu3 %v403_v48  ;;  %538 = vmatmul.f32.gmra.mxu1 %v258_v49  ;;  %v455_v47 = vld [vmem:[%s1094_s17 + $0x560] sm:$0xff]  ;;  %v472_v48 = vld [vmem:[%s1094_s17 + $0x5e8] sm:$0xff]  ;;  %v261_v49 = vmax.f32 %v222_v41, 0.0 }
  0x46   : > { %590 = vmatmul.f32.gmra.mxu3 %v260_v50  ;;  %606 = vmatpush.msrb.mxu0 %v353_v51  ;;  %v263_v50 = vmax.f32 %v224_v42, 0.0  ;;  %v223_v51 = vld [vmem:[%s1167_s21 + $0x90] sm:$0xff]  ;;  %v415_v27 = vld [vmem:[%s1094_s17 + $0x420] sm:$0xff]  ;;  %v214_v42 = vld [vmem:[%s1167_s21 + $0x48] sm:$0xff] }
  0x47   : > { %632 = vmatpush.msrb.mxu1 %v369_v52  ;;  %658 = vmatpush.msrb.mxu2 %v385_v53  ;;  %v225_v52 = vld [vmem:[%s1167_s21 + $0xa0] sm:$0xff]  ;;  %v422_v53 = vld [vmem:[%s1094_s17 + $0x458] sm:$0xff]  ;;  %v262_v57 = vmax.f32 %v223_v51, 0.0  ;;  %v253_v51 = vmax.f32 %v214_v42, 0.0 }
  0x48   : > { %683 = vmatpush.msrb.mxu3 %v402_v54  ;;  %607 = vmatpush.msrb.mxu0 %v352_v55  ;;  %v438_v54 = vld [vmem:[%s1094_s17 + $0x4d8] sm:$0xff]  ;;  %v264_v58 = vmax.f32 %v225_v52, 0.0  ;;  %v431_v28 = vld [vmem:[%s1094_s17 + $0x4a0] sm:$0xff] }
  0x49   : > { %633 = vmatpush.msrb.mxu1 %v368_v56  ;;  %659 = vmatpush.msrb.mxu2 %v384_v59  ;;  %v454_v55 = vld [vmem:[%s1094_s17 + $0x558] sm:$0xff]  ;;  %v471_v56 = vld [vmem:[%s1094_s17 + $0x5e0] sm:$0xff]  ;;  %v421_v59 = vld [vmem:[%s1094_s17 + $0x450] sm:$0xff] }
  0x4a   : > { %684 = vmatpush.msrb.mxu3 %v401_v60  ;;  %608 = vmatpush.msrb.mxu0 %v351_v61  ;;  %v437_v60 = vld [vmem:[%s1094_s17 + $0x4d0] sm:$0xff]  ;;  %v213_v41 = vld [vmem:[%s1167_s21 + $0x40] sm:$0xff]  ;;  %v216_v52 = vld [vmem:[%s1167_s21 + $0x58] sm:$0xff] }
  0x4b   : > { %634 = vmatpush.msrb.mxu1 %v367_v62  ;;  %660 = vmatpush.msrb.mxu2 %v383_v63  ;;  %v453_v61 = vld [vmem:[%s1094_s17 + $0x550] sm:$0xff]  ;;  %v470_v62 = vld [vmem:[%s1094_s17 + $0x5d8] sm:$0xff]  ;;  %v420_v63 = vld [vmem:[%s1094_s17 + $0x448] sm:$0xff] }
  0x4c   : > { %685 = vmatpush.msrb.mxu3 %v400_v0  ;;  %515 = vmatmul.f32.gmra.mxu0 %v270_v1  ;;  %v436_v0 = vld [vmem:[%s1094_s17 + $0x4c8] sm:$0xff]  ;;  %v235_v1 = vld [vmem:[%s1167_s21 + $0xf0] sm:$0x3] }
  0x4d   : > { %567 = vmatmul.f32.gmra.mxu2 %v272_v2  ;;  %609 = vmatpush.msrb.mxu0 %v350_v5  ;;  %v237_v2 = vld [vmem:[%s1167_s21 + $0x100] sm:$0x3] }
  0x4e   : > { %635 = vmatpush.msrb.mxu1 %v366_v6  ;;  %661 = vmatpush.msrb.mxu2 %v382_v7  ;;  %v419_v5 = vld [vmem:[%s1094_s17 + $0x440] sm:$0xff] }
  0x4f   : > { %686 = vmatpush.msrb.mxu3 %v399_v8  ;;  %541 = vmatmul.f32.gmra.mxu1 %v271_v9  ;;  %v435_v6 = vld [vmem:[%s1094_s17 + $0x4c0] sm:$0xff]  ;;  %v468_v8 = vld [vmem:[%s1094_s17 + $0x5c8] sm:$0xff]  ;;  %v274_v9 = vmax.f32 %v235_v1, 0.0 }
  0x50   : > { %593 = vmatmul.f32.gmra.mxu3 %v273_v10  ;;  %610 = vmatpush.msrb.mxu0 %v349_v11  ;;  %v451_v7 = vld [vmem:[%s1094_s17 + $0x540] sm:$0xff]  ;;  %v276_v10 = vmax.f32 %v237_v2, 0.0  ;;  %v236_v11 = vld [vmem:[%s1167_s21 + $0xf8] sm:$0x3] }
  0x51   : > { %636 = vmatpush.msrb.mxu1 %v365_v12  ;;  %662 = vmatpush.msrb.mxu2 %v381_v13  ;;  %v238_v12 = vld [vmem:[%s1167_s21 + $0x108] sm:$0x3]  ;;  %v418_v13 = vld [vmem:[%s1094_s17 + $0x438] sm:$0xff]  ;;  %v275_v17 = vmax.f32 %v236_v11, 0.0  ;;  %v475_v1 = vld [vmem:[%s1094_s17 + $0x600] sm:$0xff] }
  0x52   : > { %687 = vmatpush.msrb.mxu3 %v398_v14  ;;  %611 = vmatpush.msrb.mxu0 %v348_v15  ;;  %v434_v14 = vld [vmem:[%s1094_s17 + $0x4b8] sm:$0xff]  ;;  %v277_v18 = vmax.f32 %v238_v12, 0.0  ;;  %v217_v12 = vld [vmem:[%s1167_s21 + $0x60] sm:$0xff] }
  0x53   : > { %637 = vmatpush.msrb.mxu1 %v364_v16  ;;  %663 = vmatpush.msrb.mxu2 %v380_v19  ;;  %v450_v15 = vld [vmem:[%s1094_s17 + $0x538] sm:$0xff]  ;;  %v467_v16 = vld [vmem:[%s1094_s17 + $0x5c0] sm:$0xff]  ;;  %v417_v19 = vld [vmem:[%s1094_s17 + $0x430] sm:$0xff] }
  0x54   : > { %688 = vmatpush.msrb.mxu3 %v397_v20  ;;  %612 = vmatpush.msrb.mxu0 %v347_v21  ;;  %v433_v20 = vld [vmem:[%s1094_s17 + $0x4b0] sm:$0xff] }
  0x55   : > { %638 = vmatpush.msrb.mxu1 %v363_v22  ;;  %664 = vmatpush.msrb.mxu2 %v379_v23  ;;  %v449_v21 = vld [vmem:[%s1094_s17 + $0x530] sm:$0xff]  ;;  %v466_v22 = vld [vmem:[%s1094_s17 + $0x5b8] sm:$0xff]  ;;  %v416_v23 = vld [vmem:[%s1094_s17 + $0x428] sm:$0xff] }
  0x56   : > { %689 = vmatpush.msrb.mxu3 %v396_v24  ;;  %613 = vmatmul.f32.vlgmr.msrb.gmra.mxu0 %v248_v25  ;;  %v432_v24 = vld [vmem:[%s1094_s17 + $0x4a8] sm:$0xff] }
  0x57   : > { %665 = vmatmul.f32.vlgmr.msrb.gmra.mxu2 %v250_v26  ;;  %701 = vmatpush.msra.mxu0 %v426_v29  ;;  %v448_v25 = vld [vmem:[%s1094_s17 + $0x528] sm:$0xff]  ;;  %v465_v26 = vld [vmem:[%s1094_s17 + $0x5b0] sm:$0xff]  ;;  %v447_v29 = vld [vmem:[%s1094_s17 + $0x520] sm:$0xff] }
  0x58   : > { %727 = vmatpush.msra.mxu1 %v442_v30  ;;  %753 = vmatpush.msra.mxu2 %v458_v31  ;;  %v464_v30 = vld [vmem:[%s1094_s17 + $0x5a8] sm:$0xff]  ;;  %v414_v31 = vld [vmem:[%s1094_s17 + $0x418] sm:$0xff] }
  0x59   : > { %690 = vmatpush.msrb.mxu3 %v395_v32  ;;  %639 = vmatmul.f32.vlgmr.msrb.gmra.mxu1 %v249_v33  ;;  %v430_v32 = vld [vmem:[%s1094_s17 + $0x498] sm:$0xff] }
  0x5a   : > { %691 = vmatmul.f32.vlgmr.msrb.gmra.mxu3 %v251_v34  ;;  %702 = vmatpush.msra.mxu0 %v425_v35  ;;  %v446_v33 = vld [vmem:[%s1094_s17 + $0x518] sm:$0xff]  ;;  %v463_v34 = vld [vmem:[%s1094_s17 + $0x5a0] sm:$0xff]  ;;  %v413_v35 = vld [vmem:[%s1094_s17 + $0x410] sm:$0xff] }
  0x5b   : > { %728 = vmatpush.msra.mxu1 %v441_v36  ;;  %754 = vmatpush.msra.mxu2 %v457_v37  ;;  %v429_v36 = vld [vmem:[%s1094_s17 + $0x490] sm:$0xff] }
  0x5c   : > { %779 = vmatpush.msra.mxu3 %v474_v38  ;;  %703 = vmatpush.msra.mxu0 %v424_v39  ;;  %v445_v37 = vld [vmem:[%s1094_s17 + $0x510] sm:$0xff]  ;;  %v462_v38 = vld [vmem:[%s1094_s17 + $0x598] sm:$0xff]  ;;  %v412_v39 = vld [vmem:[%s1094_s17 + $0x408] sm:$0xff] }
  0x5d   : > { %729 = vmatpush.msra.mxu1 %v440_v40  ;;  %755 = vmatpush.msra.mxu2 %v456_v43  ;;  %v428_v40 = vld [vmem:[%s1094_s17 + $0x488] sm:$0xff] }
  0x5e   : > { %780 = vmatpush.msra.mxu3 %v473_v44  ;;  %704 = vmatpush.msra.mxu0 %v423_v45  ;;  %v444_v43 = vld [vmem:[%s1094_s17 + $0x508] sm:$0xff]  ;;  %v461_v44 = vld [vmem:[%s1094_s17 + $0x590] sm:$0xff] }
  0x5f   : > { %730 = vmatpush.msra.mxu1 %v439_v46  ;;  %756 = vmatpush.msra.mxu2 %v455_v47  ;;  %v215_v45 = vld [vmem:[%s1167_s21 + $0x50] sm:$0xff]  ;;  %v411_v46 = vld [vmem:[%s1094_s17 + $0x400] sm:$0xff] }
  0x60   : > { %781 = vmatpush.msra.mxu3 %v472_v48  ;;  %616 = vmatmul.f32.gmra.mxu0 %v261_v49  ;;  %v427_v47 = vld [vmem:[%s1094_s17 + $0x480] sm:$0xff]  ;;  %v460_v49 = vld [vmem:[%s1094_s17 + $0x588] sm:$0xff] }
  0x61   : > { %668 = vmatmul.f32.gmra.mxu2 %v263_v50  ;;  %705 = vmatpush.msra.mxu0 %v422_v53  ;;  %v443_v48 = vld [vmem:[%s1094_s17 + $0x500] sm:$0xff]  ;;  %v252_v50 = vmax.f32 %v213_v41, 0.0  ;;  %v254_v53 = vmax.f32 %v215_v45, 0.0 }
  0x62   : > { %731 = vmatpush.msra.mxu1 %v438_v54  ;;  %757 = vmatpush.msra.mxu2 %v454_v55  ;;  %v478_v54 = vld [vmem:[%s1094_s17 + $0x618] sm:$0xff]  ;;  %v459_v55 = vld [vmem:[%s1094_s17 + $0x580] sm:$0xff] }
  0x63   : > { %782 = vmatpush.msra.mxu3 %v471_v56  ;;  %642 = vmatmul.f32.gmra.mxu1 %v262_v57  ;;  %v255_v56 = vmax.f32 %v216_v52, 0.0  ;;  %v477_v57 = vld [vmem:[%s1094_s17 + $0x610] sm:$0xff] }
  0x64   : > { %694 = vmatmul.f32.gmra.mxu3 %v264_v58  ;;  %706 = vmatpush.msra.mxu0 %v421_v59  ;;  %v226_v58 = vld [vmem:[%s1167_s21 + $0xa8] sm:$0xff]  ;;  %v227_v59 = vld [vmem:[%s1167_s21 + $0xb0] sm:$0xff] }
  0x65   : > { %732 = vmatpush.msra.mxu1 %v437_v60  ;;  %758 = vmatpush.msra.mxu2 %v453_v61  ;;  %v228_v60 = vld [vmem:[%s1167_s21 + $0xb8] sm:$0xff]  ;;  %v476_v61 = vld [vmem:[%s1094_s17 + $0x608] sm:$0xff] }
  0x66   : > { %783 = vmatpush.msra.mxu3 %v470_v62  ;;  %707 = vmatpush.msra.mxu0 %v420_v63  ;;  %v265_v62 = vmax.f32 %v226_v58, 0.0  ;;  %v266_v63 = vmax.f32 %v227_v59, 0.0  ;;  %v267_v2 = vmax.f32 %v228_v60, 0.0 }
  0x67   : > { %733 = vmatpush.msra.mxu1 %v436_v0  ;;  %759 = vmatpush.msra.mxu2 %v452_v3  ;;  %v229_v0 = vld [vmem:[%s1167_s21 + $0xc0] sm:$0xff] }
  0x68   : > { %784 = vmatpush.msra.mxu3 %v469_v4  ;;  %708 = vmatpush.msra.mxu0 %v419_v5  ;;  %v268_v3 = vmax.f32 %v229_v0, 0.0  ;;  %v239_v4 = vld [vmem:[%s1167_s21 + $0x110] sm:$0x3]  ;;  %v240_v5 = vld [vmem:[%s1167_s21 + $0x118] sm:$0x3] }
  0x69   : > { %734 = vmatpush.msra.mxu1 %v435_v6  ;;  %760 = vmatpush.msra.mxu2 %v451_v7  ;;  %v241_v6 = vld [vmem:[%s1167_s21 + $0x120] sm:$0x3]  ;;  %v278_v7 = vmax.f32 %v239_v4, 0.0 }
  0x6a   : > { %785 = vmatpush.msra.mxu3 %v468_v8  ;;  %619 = vmatmul.f32.gmra.mxu0 %v274_v9  ;;  %v279_v8 = vmax.f32 %v240_v5, 0.0  ;;  %v242_v9 = vld [vmem:[%s1167_s21 + $0x128] sm:$0x3] }
  0x6b   : > { %671 = vmatmul.f32.gmra.mxu2 %v276_v10  ;;  %709 = vmatpush.msra.mxu0 %v418_v13  ;;  %v280_v10 = vmax.f32 %v241_v6, 0.0  ;;  %v281_v11 = vmax.f32 %v242_v9, 0.0  ;;  %v230_v13 = vld [vmem:[%s1167_s21 + $0xc8] sm:$0xff] }
  0x6c   : > { %735 = vmatpush.msra.mxu1 %v434_v14  ;;  %761 = vmatpush.msra.mxu2 %v450_v15  ;;  %v243_v14 = vld [vmem:[%s1167_s21 + $0x130] sm:$0x3]  ;;  %v256_v15 = vmax.f32 %v217_v12, 0.0 }
  0x6d   : > { %786 = vmatpush.msra.mxu3 %v467_v16  ;;  %645 = vmatmul.f32.gmra.mxu1 %v275_v17  ;;  %v269_v16 = vmax.f32 %v230_v13, 0.0  ;;  %v282_v17 = vmax.f32 %v243_v14, 0.0 }
  0x6e   : > { %697 = vmatmul.f32.gmra.mxu3 %v277_v18  ;;  %710 = vmatpush.msra.mxu0 %v417_v19 }
  0x6f   : > { %736 = vmatpush.msra.mxu1 %v433_v20  ;;  %762 = vmatpush.msra.mxu2 %v449_v21 }
  0x70   : > { %787 = vmatpush.msra.mxu3 %v466_v22  ;;  %711 = vmatpush.msra.mxu0 %v416_v23 }
  0x71   : > { %737 = vmatpush.msra.mxu1 %v432_v24  ;;  %763 = vmatpush.msra.mxu2 %v448_v25 }
  0x72   : > { %788 = vmatpush.msra.mxu3 %v465_v26  ;;  %712 = vmatpush.msra.mxu0 %v415_v27 }
  0x73   : > { %738 = vmatpush.msra.mxu1 %v431_v28  ;;  %764 = vmatpush.msra.mxu2 %v447_v29 }
  0x74   : > { %789 = vmatpush.msra.mxu3 %v464_v30  ;;  %713 = vmatpush.msra.mxu0 %v414_v31 }
  0x75   : > { %739 = vmatpush.msra.mxu1 %v430_v32  ;;  %765 = vmatpush.msra.mxu2 %v446_v33 }
  0x76   : > { %790 = vmatpush.msra.mxu3 %v463_v34  ;;  %714 = vmatpush.msra.mxu0 %v413_v35 }
  0x77   : > { %740 = vmatpush.msra.mxu1 %v429_v36  ;;  %766 = vmatpush.msra.mxu2 %v445_v37  ;;  %v1039_v36 = vld [vmem:[%s199_s24] ss:$0 sm:$0xff] }
  0x78   : > { %791 = vmatpush.msra.mxu3 %v462_v38  ;;  %715 = vmatpush.msra.mxu0 %v412_v39 }
  0x79   : > { %741 = vmatpush.msra.mxu1 %v428_v40  ;;  %767 = vmatpush.msra.mxu2 %v444_v43 }
  0x7a   : > { %792 = vmatpush.msra.mxu3 %v461_v44  ;;  %716 = vmatpush.msra.mxu0 %v411_v46 }
  0x7b   : > { %742 = vmatpush.msra.mxu1 %v427_v47  ;;  %768 = vmatpush.msra.mxu2 %v443_v48 }
  0x7c   : > { %793 = vmatpush.msra.mxu3 %v460_v49  ;;  %717 = vmatmul.f32.vlgmr.msra.gmra.mxu0 %v252_v50 }
  0x7d   : > { %743 = vmatmul.f32.vlgmr.msra.gmra.mxu1 %v253_v51  ;;  %769 = vmatmul.f32.vlgmr.msra.gmra.mxu2 %v254_v53 }
  0x7e   : > { %817 = vmatpush.msrb.mxu0 %v478_v54  ;;  %794 = vmatpush.msra.mxu3 %v459_v55 }
  0x7f   : > { %1021 = vmatpush.msrb.mxu2 %v478_v54  ;;  %795 = vmatmul.f32.vlgmr.msra.gmra.mxu3 %v255_v56 }
  0x80   : > { %818 = vmatpush.msrb.mxu0 %v477_v57  ;;  %1020 = vmatpush.msrb.mxu1 %v478_v54 }
  0x81   : > { %1023 = vmatpush.msrb.mxu2 %v477_v57 }
  0x82   : > { %819 = vmatpush.msrb.mxu0 %v476_v61  ;;  %1022 = vmatpush.msrb.mxu1 %v477_v57 }
  0x83   : > { %1025 = vmatpush.msrb.mxu2 %v476_v61 }
  0x84   : > { %820 = vmatpush.msrb.mxu0 %v475_v1  ;;  %1024 = vmatpush.msrb.mxu1 %v476_v61 }
  0x85   : > { %720 = vmatmul.f32.gmra.mxu0 %v265_v62  ;;  %746 = vmatmul.f32.gmra.mxu1 %v266_v63 }
  0x86   : > { %772 = vmatmul.f32.gmra.mxu2 %v267_v2  ;;  %1026 = vmatpush.msrb.mxu1 %v475_v1 }
  0x87   : > { %1027 = vmatpush.msrb.mxu2 %v475_v1  ;;  %798 = vmatmul.f32.gmra.mxu3 %v268_v3 }
  0x8d   : > { %723 = vmatmul.f32.gmra.mxu0 %v278_v7  ;;  %749 = vmatmul.f32.gmra.mxu1 %v279_v8 }
  0x8e   : > { %775 = vmatmul.f32.gmra.mxu2 %v280_v10 }
  0x8f   : > { %801 = vmatmul.f32.gmra.mxu3 %v281_v11 }
  0x95   : > { %1015 = vmatmul.msk.f32.vlgmr.msrb.gmra.mxu0 %vm483_vm0, %v256_v15  ;;  %1016 = vmatmul.msk.f32.vlgmr.msrb.gmra.mxu1 %vm483_vm0, %v269_v16 }
  0x96   : > { %1017 = vmatmul.msk.f32.vlgmr.msrb.gmra.mxu2 %vm483_vm0, %v282_v17 }
  0xb5   : > { %v510_v18 = vpop.f32.mrf.mxu0 }
  0xb6   : > { %v511_v37 = vadd.f32 %v1039_v36, %v510_v18 }
  0xb8   : > { %v536_v19 = vpop.f32.mrf.mxu1 }
  0xb9   : > { %v537_v39 = vadd.f32 %v536_v19, %v511_v37 }
  0xbc   : > { %v562_v20 = vpop.f32.mrf.mxu2 }
  0xbd   : > { %v563_v45 = vadd.f32 %v562_v20, %v537_v39 }
  0xbf   : > { %v588_v21 = vpop.f32.mrf.mxu3  ;;  %v513_v22 = vpop.f32.mrf.mxu0 }
  0xc0   : > { %v514_v40 = vadd.f32 %v1039_v36, %v513_v22  ;;  %v589_v48 = vadd.f32 %v588_v21, %v563_v45 }
  0xc2   : > { %v539_v23 = vpop.f32.mrf.mxu1 }
  0xc3   : > { %v540_v46 = vadd.f32 %v539_v23, %v514_v40 }
  0xc6   : > { %v565_v24 = vpop.f32.mrf.mxu2 }
  0xc7   : > { %v566_v49 = vadd.f32 %v565_v24, %v540_v46 }
  0xc9   : > { %v591_v25 = vpop.f32.mrf.mxu3  ;;  %v516_v26 = vpop.f32.mrf.mxu0 }
  0xca   : > { %v517_v44 = vadd.f32 %v1039_v36, %v516_v26  ;;  %v592_v56 = vadd.f32 %v591_v25, %v566_v49 }
  0xcc   : > { %v542_v27 = vpop.f32.mrf.mxu1 }
  0xcd   : > { %v543_v47 = vadd.f32 %v542_v27, %v517_v44 }
  0xd0   : > { %v568_v28 = vpop.f32.mrf.mxu2 }
  0xd1   : > { %v569_v55 = vadd.f32 %v568_v28, %v543_v47 }
  0xd3   : > { %v594_v29 = vpop.f32.mrf.mxu3  ;;  %v614_v30 = vpop.f32.mrf.mxu0 }
  0xd4   : > { %v615_v53 = vadd.f32 %v614_v30, %v589_v48  ;;  %v595_v59 = vadd.f32 %v594_v29, %v569_v55 }
  0xd6   : > { %v640_v31 = vpop.f32.mrf.mxu1 }
  0xd7   : > { %v641_v57 = vadd.f32 %v640_v31, %v615_v53 }
  0xda   : > { %v666_v32 = vpop.f32.mrf.mxu2 }
  0xdb   : > { %v667_v60 = vadd.f32 %v666_v32, %v641_v57 }
  0xdd   : > { %v692_v33 = vpop.f32.mrf.mxu3  ;;  %v617_v34 = vpop.f32.mrf.mxu0 }
  0xde   : > { %v618_v58 = vadd.f32 %v617_v34, %v592_v56  ;;  %v693_v3 = vadd.f32 %v692_v33, %v667_v60 }
  0xe0   : > { %v643_v35 = vpop.f32.mrf.mxu1 }
  0xe1   : > { %v644_v1 = vadd.f32 %v643_v35, %v618_v58 }
  0xe4   : > { %v669_v38 = vpop.f32.mrf.mxu2 }
  0xe5   : > { %v670_v4 = vadd.f32 %v669_v38, %v644_v1 }
  0xe7   : > { %v695_v41 = vpop.f32.mrf.mxu3  ;;  %v620_v42 = vpop.f32.mrf.mxu0 }
  0xe8   : > { %v621_v62 = vadd.f32 %v620_v42, %v595_v59  ;;  %v696_v8 = vadd.f32 %v695_v41, %v670_v4 }
  0xea   : > { %v646_v43 = vpop.f32.mrf.mxu1 }
  0xeb   : > { %v647_v5 = vadd.f32 %v646_v43, %v621_v62 }
  0xee   : > { %v672_v50 = vpop.f32.mrf.mxu2 }
  0xef   : > { %v673_v7 = vadd.f32 %v672_v50, %v647_v5 }
  0xf1   : > { %v698_v54 = vpop.f32.mrf.mxu3 }
  0xf2   : > { %v699_v15 = vadd.f32 %v698_v54, %v673_v7 }
  0xf9   : > { %v718_v51 = vpop.f32.mrf.mxu0 }
  0xfa   : > { %v744_v52 = vpop.f32.mrf.mxu1  ;;  %v719_v6 = vadd.f32 %v718_v51, %v693_v3 }
  0xfc   : > { %v745_v12 = vadd.f32 %v744_v52, %v719_v6 }
 0x100   : > { %v770_v61 = vpop.f32.mrf.mxu2 }
 0x101   : > { %v771_v16 = vadd.f32 %v770_v61, %v745_v12 }
 0x102   : > { %v721_v63 = vpop.f32.mrf.mxu0  ;;  %v747_v0 = vpop.f32.mrf.mxu1 }
 0x103   : > { %v796_v2 = vpop.f32.mrf.mxu3  ;;  %v722_v13 = vadd.f32 %v721_v63, %v696_v8 }
 0x104   : > { %v797_v19 = vadd.f32 %v796_v2, %v771_v16 }
 0x105   : > { %v748_v18 = vadd.f32 %v747_v0, %v722_v13 }
 0x109   : > { %v773_v9 = vpop.f32.mrf.mxu2 }
 0x10a   : > { %v724_v10 = vpop.f32.mrf.mxu0  ;;  %v750_v11 = vpop.f32.mrf.mxu1  ;;  %v774_v20 = vadd.f32 %v773_v9, %v748_v18 }
 0x10b   : > { %v799_v14 = vpop.f32.mrf.mxu3  ;;  %v725_v17 = vadd.f32 %v724_v10, %v699_v15 }
 0x10c   : > { %v800_v27 = vadd.f32 %v799_v14, %v774_v20 }
 0x10d   : > { %v751_v22 = vadd.f32 %v750_v11, %v725_v17 }
 0x111   : > { %v776_v21 = vpop.f32.mrf.mxu2 }
 0x112   : > { %v822_v23 = vpop.f32.mrf.mxu0  ;;  %v777_v25 = vadd.f32 %v776_v21, %v751_v22  ;;  %v825_v26 = vpop.f32.mrf.mxu1 }
 0x113   : > { %v1349_v24 = vadd.f32 %v822_v23, %v797_v19  ;;  %v802_v28 = vpop.f32.mrf.mxu3  ;;  %v1353_v30 = vadd.f32 %v825_v26, %v800_v27 }
 0x114   : > { %v803_v32 = vadd.f32 %v802_v28, %v777_v25 }
 0x115   : > { %v831_v29 = vmul.f32 %v1349_v24, %v1349_v24  ;;  %v832_v35 = vmul.f32 %v1353_v30, %v1353_v30 }
 0x117   : > { %v834_v31 = vsel %vm483_vm0, %v831_v29, 0.0  ;;  %v837_v38 = vsel %vm483_vm0, %v832_v35, 0.0 }
 0x118   : > { %835 = vadd.xlane.f32.xlu0 %v834_v31 }
 0x119   : > { %v828_v33 = vpop.f32.mrf.mxu2 }
 0x11a   : > { %v1356_v34 = vadd.f32 %v828_v33, %v803_v32 }
 0x11c   : > { %v833_v36 = vmul.f32 %v1356_v34, %v1356_v34 }
 0x11e   : > { %v841_v37 = vsel %vm840_vm1, %v833_v36, 0.0 }
 0x11f   : > { %842 = vadd.xlane.f32.xlu1 %v841_v37 }
 0x120   : > { %838 = vadd.xlane.f32.xlu0 %v837_v38 }
 0x18b   : > { %v836_v39 = vpop.xlane.xlu0 %835 }
 0x18c   : > { %1040 = vrsqrt.f32 %v836_v39  ;;  %vm851_vm2 = vcmp.eq.f32.partialorder %v836_v39, inf  ;;  %v854_v55 = vand.u32 2147483648, %v836_v39  ;;  %vm853_vm3 = vcmp.eq.f32.partialorder %v836_v39, 0.0 }
 0x192   : > { %v1041_v40 = vpop.eup %1040  ;;  %v843_v41 = vpop.xlane.xlu1 %842 }
 0x193   : > { %v845_v42 = vmul.f32 %v1041_v40, %v836_v39  ;;  %1042 = vrsqrt.f32 %v843_v41  ;;  %v839_v43 = vpop.xlane.xlu0 %838  ;;  %vm875_vm4 = vcmp.eq.f32.partialorder %v843_v41, inf  ;;  %v878_v2 = vand.u32 2147483648, %v843_v41 }
 0x194   : > { %1044 = vrsqrt.f32 %v839_v43  ;;  %vm877_vm5 = vcmp.eq.f32.partialorder %v843_v41, 0.0  ;;  %vm863_vm6 = vcmp.eq.f32.partialorder %v839_v43, inf  ;;  %v866_v6 = vand.u32 2147483648, %v839_v43 }
 0x195   : > { %v846_v44 = vmul.f32 %v1041_v40, %v845_v42  ;;  %vm865_vm7 = vcmp.eq.f32.partialorder %v839_v43, 0.0 }
 0x197   : > { %v847_v45 = vmul.f32 0.5, %v846_v44 }
 0x199   : > { %v1043_v46 = vpop.eup %1042  ;;  %v848_v47 = vsub.f32 1.5, %v847_v45 }
 0x19a   : > { %v1045_v48 = vpop.eup %1044  ;;  %v869_v49 = vmul.f32 %v1043_v46, %v843_v41 }
 0x19b   : > { %v849_v50 = vmul.f32 %v1041_v40, %v848_v47  ;;  %v857_v51 = vmul.f32 %v1045_v48, %v839_v43 }
 0x19c   : > { %v870_v52 = vmul.f32 %v1043_v46, %v869_v49 }
 0x19d   : > { %v850_v53 = vmul.f32 %v849_v50, %v836_v39  ;;  %v858_v54 = vmul.f32 %v1045_v48, %v857_v51 }
 0x19e   : > { %v871_v56 = vmul.f32 0.5, %v870_v52 }
 0x19f   : > { %v852_v57 = vsel %vm851_vm2, %v836_v39, %v850_v53  ;;  %v859_v58 = vmul.f32 0.5, %v858_v54 }
 0x1a0   : > { %v855_v59 = vsel %vm853_vm3, %v854_v55, %v852_v57  ;;  %v872_v60 = vsub.f32 1.5, %v871_v56 }
 0x1a1   : > { %v880_v61 = vadd.f32 1e-07, %v855_v59  ;;  %v860_v62 = vsub.f32 1.5, %v859_v58 }
 0x1a2   : > { %v873_v63 = vmul.f32 %v1043_v46, %v872_v60 }
 0x1a3   : > { %1046 = vrcp.f32 %v880_v61  ;;  %v861_v1 = vmul.f32 %v1045_v48, %v860_v62  ;;  %v894_v14 = vand.u32 2147483648, %v880_v61  ;;  %v892_v16 = vand.u32 2147483647, %v880_v61 }
 0x1a4   : > { %v874_v0 = vmul.f32 %v873_v63, %v843_v41  ;;  %vm888_vm9 = vweird.f32 %v880_v61 }
 0x1a5   : > { %v862_v4 = vmul.f32 %v861_v1, %v839_v43  ;;  %v895_v19 = vor.u32 1.1754944e-38, %v894_v14  ;;  %vm893_vm11 = vcmp.eq.f32.partialorder %v892_v16, 8.507059e+37 }
 0x1a6   : > { %v876_v3 = vsel %vm875_vm4, %v843_v41, %v874_v0 }
 0x1a7   : > { %v879_v5 = vsel %vm877_vm5, %v878_v2, %v876_v3  ;;  %v864_v8 = vsel %vm863_vm6, %v839_v43, %v862_v4 }
 0x1a8   : > { %v882_v7 = vadd.f32 1e-07, %v879_v5  ;;  %v867_v10 = vsel %vm865_vm7, %v866_v6, %v864_v8 }
 0x1a9   : > { %v1047_v9 = vpop.eup %1046  ;;  %v881_v12 = vadd.f32 1e-07, %v867_v10 }
 0x1aa   : > { %v884_v11 = vmul.f32 %v1047_v9, %v880_v61  ;;  %1048 = vrcp.f32 %v882_v7  ;;  %vm889_vm8 = vweird.f32 %v1047_v9  ;;  %v924_v27 = vand.u32 2147483648, %v882_v7 }
 0x1ab   : > { %1050 = vrcp.f32 %v881_v12  ;;  %vm890_vm10 = vmor %vm888_vm9, %vm889_vm8  ;;  %v922_v31 = vand.u32 2147483647, %v882_v7  ;;  %vm918_vm13 = vweird.f32 %v882_v7  ;;  %v909_v35 = vand.u32 2147483648, %v881_v12 }
 0x1ac   : > { %v885_v13 = vsub.f32 1.0, %v884_v11  ;;  %v925_v36 = vor.u32 1.1754944e-38, %v924_v27  ;;  %v907_v38 = vand.u32 2147483647, %v881_v12  ;;  %vm903_vm3 = vweird.f32 %v881_v12 }
 0x1ad   : > { %vm923_vm2 = vcmp.eq.f32.partialorder %v922_v31, 8.507059e+37  ;;  %v910_v42 = vor.u32 1.1754944e-38, %v909_v35 }
 0x1ae   : > { %v886_v15 = vmul.f32 %v1047_v9, %v885_v13  ;;  %vm908_vm5 = vcmp.eq.f32.partialorder %v907_v38, 8.507059e+37 }
 0x1b0   : > { %v1049_v17 = vpop.eup %1048  ;;  %v887_v18 = vadd.f32 %v1047_v9, %v886_v15 }
 0x1b1   : > { %v914_v20 = vmul.f32 %v1049_v17, %v882_v7  ;;  %v1051_v22 = vpop.eup %1050  ;;  %vm919_vm12 = vweird.f32 %v1049_v17 }
 0x1b2   : > { %v891_v21 = vsel %vm890_vm10, %v1047_v9, %v887_v18  ;;  %v899_v28 = vmul.f32 %v1051_v22, %v881_v12  ;;  %vm920_vm14 = vmor %vm918_vm13, %vm919_vm12  ;;  %vm904_vm15 = vweird.f32 %v1051_v22 }
 0x1b3   : > { %v896_v23 = vsel %vm893_vm11, %v895_v19, %v891_v21  ;;  %v915_v25 = vsub.f32 1.0, %v914_v20  ;;  %vm905_vm4 = vmor %vm903_vm3, %vm904_vm15 }
 0x1b4   : > { %v897_v26 = vmul.f32 %v896_v23, %v1349_v24  ;;  %v900_v32 = vsub.f32 1.0, %v899_v28 }
 0x1b5   : > { %v916_v29 = vmul.f32 %v1049_v17, %v915_v25 }
 0x1b6   : > { %928 = vst.msk [vmem:[%s1368_s30] sm:$0xff] %vm483_vm0, %v897_v26  ;;  %v901_v37 = vmul.f32 %v1051_v22, %v900_v32 }
 0x1b7   : > { %v917_v33 = vadd.f32 %v1049_v17, %v916_v29 }
 0x1b8   : > { %v902_v40 = vadd.f32 %v1051_v22, %v901_v37 }
 0x1b9   : > { %v921_v39 = vsel %vm920_vm14, %v1049_v17, %v917_v33 }
 0x1ba   : > { %v926_v24 = vsel %vm923_vm2, %v925_v36, %v921_v39  ;;  %v906_v43 = vsel %vm905_vm4, %v1051_v22, %v902_v40 }
 0x1bb   : > { %v927_v41 = vmul.f32 %v926_v24, %v1356_v34  ;;  %v911_v44 = vsel %vm908_vm5, %v910_v42, %v906_v43 }
 0x1bc   : > { %v912_v45 = vmul.f32 %v911_v44, %v1353_v30 }
 0x1bd   : > { %930 = vst.msk [vmem:[%s1368_s30 + $0x10] sm:$0x3] %vm840_vm1, %v927_v41 }
 0x1be   : > { %929 = vst.msk [vmem:[%s1368_s30 + $0x8] sm:$0xff] %vm483_vm0, %v912_v45 }
 0x1bf PF: > { %s13_s12 = sadd.s32 1, %s1058_s12  }
 0x1c0   : > { %p10_p4 = scmp.ge.s32.totalorder %s13_s12, 4  }
 0x1c2   :  { %12 = sbr.rel (!%p10_p4) target bundleno = 1 (0x1), region = 68 }

// kernel: squeeze.46
= control target key start
LH: loop header
LB: loop body
LE: loop exit
PB: predicated region body
PF: predicated region fallthrough
CT: control target
= control target key end

     0   :  { %vm3_vm0 = vcmask 261120   ;;  %s39_s0 = inlined_call_operand.vmem [shape: f32[1,6,32], index: 0, kind: input, shape index: {}]   ;;  %s40_s1 = inlined_call_operand.vmem [shape: f32[2,3,32], index: 1, kind: output, shape index: {}]  }
   0x1   :  { %v2_v0 = vld [vmem:[%s39_s0] sm:$0x3f]  }
   0x2   :  { %4 = vst.msk [vmem:[#allocation0] sm:$0x7] %vm3_vm0, %v2_v0  }
   0x3   :  { %6 = vst.msk [vmem:[#allocation0 + $0x5] sm:$0x38] %vm3_vm0, %v2_v0  }
   0x9   :  { %v9_v1 = vld [vmem:[#allocation0] sm:$0xf] }
   0xa   :  { %12 = vst [vmem:[%s40_s1] sm:$0xf] %v9_v1  ;;  %v14_v2 = vld [vmem:[#allocation0 + $0x8] sm:$0xf] }
   0xb   :  { %19 = vst [vmem:[%s40_s1 + $0x4] sm:$0xf] %v14_v2 }

</bundles_post_ra>
